<compile_context>
chip_gen: v5e
topology: v5e:2x2
jax: 0.10.0
libtpu: 0.0.40
codegen_flags: <defaults>
</compile_context>

<pallas_src>
import functools

import jax
import jax.numpy as jnp
from jax import lax
from jax.experimental import pallas as pl
from jax.experimental.pallas import tpu as pltpu


# ----------------------------------------------------------------------------
# Fused kernel, stride = 1:
#   x -> split halves -> [x1 passthrough] / [pw1+BN+ReLU -> dw3x3x3+BN -> pw2+BN+ReLU]
#   concat + channel_shuffle(2) folded into the interleaved columns of the final matmul
#   (even output lanes = x1 via an identity block, no ReLU; odd lanes = branch 2, ReLU).
# ----------------------------------------------------------------------------
def _fused_s1_kernel(x_ref, w1_ref, b1_ref, wd_ref, bd_ref, wct_ref, wcb_ref, bc_ref,
                     o_ref, scr_ref, *, D, H, W, C1, Cm):
    M = D * H * W
    xf = x_ref[0].astype(jnp.float32).reshape(M, x_ref.shape[-1])
    x1 = xf[:, :C1]                       # passthrough half
    x2 = xf[:, C1:]                       # processed half

    # pw1 (BN scale folded into weights) + bias + ReLU
    h = jnp.dot(x2, w1_ref[...], preferred_element_type=jnp.float32) + b1_ref[...]
    h = jnp.maximum(h, 0.0)

    # zero-padded VMEM scratch: halo for the 3x3x3 depthwise (stride 1, pad 1)
    scr_ref[...] = jnp.zeros_like(scr_ref)
    scr_ref[1:1 + D, 1:1 + H, 1:1 + W, :] = h.reshape(D, H, W, Cm)

    wd = wd_ref[...]                      # (27, Cm), BN scale folded
    acc = jnp.zeros((D, H, W, Cm), jnp.float32)
    t = 0
    for kd in range(3):
        for kh in range(3):
            for kw in range(3):
                acc = acc + scr_ref[kd:kd + D, kh:kh + H, kw:kw + W, :] \
                    * wd[t].reshape(1, 1, 1, Cm)
                t += 1
    hd = acc.reshape(M, Cm) + bd_ref[...]

    # final 1x1x1 conv + BN + ReLU with concat + channel_shuffle(2) folded into the
    # interleaved weight layout (built in the wrapper). ReLU only on the odd lanes.
    z = (jnp.dot(x1, wct_ref[...], preferred_element_type=jnp.float32)
         + jnp.dot(hd, wcb_ref[...], preferred_element_type=jnp.float32)
         + bc_ref[...])
    odd = (lax.broadcasted_iota(jnp.int32, (1, z.shape[-1]), 1) % 2) == 1
    z = jnp.where(odd, jnp.maximum(z, 0.0), z)
    o_ref[0] = z.reshape(D, H, W, z.shape[-1]).astype(o_ref.dtype)


# ----------------------------------------------------------------------------
# Stride-2 depthwise helper: 27 taps on a zero-padded, W-parity-merged volume.
#   sq[(i, j, m, p*C + c)] holds the padded input at spatial index (i, j, 2*m + p),
#   channel c, where padded index = original + 1 along D/H and original + 2 along W.
#   Every tap is a static contiguous slice (no strided slices / gathers).
# ----------------------------------------------------------------------------
def _dw3x3x3_stride2_taps(sq, wd, Do, Ho, Wo, C):
    Dp, Hp = sq.shape[0], sq.shape[1]
    sq6 = sq.reshape(Dp // 2, 2, Hp // 2, 2, sq.shape[2], 2 * C)  # leading-dim split only
    acc = jnp.zeros((Do, Ho, Wo, C), jnp.float32)
    t = 0
    for kd in range(3):
        for kh in range(3):
            for kw in range(3):
                s = kw + 1                    # scratch W index = 2*wo + kw + 1
                tap = sq6[kd // 2:kd // 2 + Do, kd % 2,
                          kh // 2:kh // 2 + Ho, kh % 2,
                          s // 2:s // 2 + Wo,
                          (s % 2) * C:(s % 2) * C + C]
                acc = acc + tap * wd[t].reshape(1, 1, 1, C)
                t += 1
    return acc


# ----------------------------------------------------------------------------
# Fused kernel, stride = 2: both branches in one kernel (x is read from HBM once).
#   branch1: dw(s=2)+BN -> pw+BN+ReLU ; branch2: pw1+BN+ReLU -> dw(s=2)+BN -> pw2+BN+ReLU
#   concat + channel_shuffle(2) folded into interleaved weights of the final matmuls.
# ----------------------------------------------------------------------------
def _fused_s2_kernel(xq_ref, wd1_ref, bd1_ref, w1_ref, b1_ref, wd2_ref, bd2_ref,
                     wct_ref, wcb_ref, bc_ref, o_ref, s1_ref, s2_ref,
                     *, D, H, W, Cin, Cm):
    W2 = W // 2
    Do, Ho, Wo = (D + 1) // 2, (H + 1) // 2, W2
    Mo = Do * Ho * Wo

    xq = xq_ref[0].astype(jnp.float32)        # (D, H, W2, 2*Cin), W pairs merged into lanes

    # branch 2 pw1 (+folded BN) + ReLU, computed directly in the W-pair layout via a
    # block-diagonal weight (both W parities use the same 1x1x1 conv).
    xf = xq.reshape(D * H * W2, 2 * Cin)
    h2 = jnp.dot(xf, w1_ref[...], preferred_element_type=jnp.float32) + b1_ref[...]
    h2 = jnp.maximum(h2, 0.0).reshape(D, H, W2, 2 * Cm)

    # zero-padded scratches: halos live in VMEM, nothing padded in HBM
    s1_ref[...] = jnp.zeros_like(s1_ref)
    s2_ref[...] = jnp.zeros_like(s2_ref)
    s1_ref[1:1 + D, 1:1 + H, 1:1 + W2, :] = xq      # branch 1 depthwise input = x
    s2_ref[1:1 + D, 1:1 + H, 1:1 + W2, :] = h2      # branch 2 depthwise input

    hd1 = _dw3x3x3_stride2_taps(s1_ref[...], wd1_ref[...], Do, Ho, Wo, Cin)
    hd2 = _dw3x3x3_stride2_taps(s2_ref[...], wd2_ref[...], Do, Ho, Wo, Cm)
    hd1 = hd1.reshape(Mo, Cin) + bd1_ref[...]
    hd2 = hd2.reshape(Mo, Cm) + bd2_ref[...]

    # final 1x1x1 convs of both branches + BN + ReLU, channel-shuffled output:
    # even output lanes <- branch 1, odd output lanes <- branch 2.
    z = (jnp.dot(hd1, wct_ref[...], preferred_element_type=jnp.float32)
         + jnp.dot(hd2, wcb_ref[...], preferred_element_type=jnp.float32)
         + bc_ref[...])
    z = jnp.maximum(z, 0.0)
    o_ref[0] = z.reshape(Do, Ho, Wo, z.shape[-1]).astype(o_ref.dtype)


# ----------------------------------------------------------------------------
# Wrappers: BN folding, shuffle-folded weight construction, pallas_call plumbing
# ----------------------------------------------------------------------------
def _fold_pw(w, bn):
    return (w * bn[0]).astype(jnp.float32), bn[1].astype(jnp.float32)


def _fold_dw(w, bn):
    return (w * bn[0]).reshape(27, -1).astype(jnp.float32), bn[1].astype(jnp.float32)


def _inverted_residual_s1(params, x_cl):
    N, D, H, W, C = x_cl.shape
    C1 = C // 2
    w1, b1 = _fold_pw(params["b2_pw1_w"], params["b2_pw1_bn"])
    wd, bd = _fold_dw(params["b2_dw_w"], params["b2_dw_bn"])
    w2, b2 = _fold_pw(params["b2_pw2_w"], params["b2_pw2_bn"])
    Cm = w1.shape[1]
    half = w2.shape[1]
    Cout = 2 * half

    # concat + channel_shuffle(groups=2) folded into the final matmul:
    #   out[:, 2j]   = x1[:, j]              (identity columns, no ReLU)
    #   out[:, 2j+1] = (hd @ w2)[:, j] + b2  (ReLU)
    wct = jnp.zeros((C1, Cout), jnp.float32).at[:, 0::2].set(
        jnp.eye(C1, half, dtype=jnp.float32))
    wcb = jnp.zeros((Cm, Cout), jnp.float32).at[:, 1::2].set(w2)
    bc = jnp.zeros((Cout,), jnp.float32).at[1::2].set(b2).reshape(1, Cout)

    kernel = functools.partial(_fused_s1_kernel, D=D, H=H, W=W, C1=C1, Cm=Cm)
    return pl.pallas_call(
        kernel,
        out_shape=jax.ShapeDtypeStruct((N, D, H, W, Cout), x_cl.dtype),
        grid=(N,),
        in_specs=[
            pl.BlockSpec((1, D, H, W, C), lambda n: (n, 0, 0, 0, 0)),
            pl.BlockSpec(w1.shape, lambda n: (0, 0)),
            pl.BlockSpec((1, Cm), lambda n: (0, 0)),
            pl.BlockSpec(wd.shape, lambda n: (0, 0)),
            pl.BlockSpec((1, Cm), lambda n: (0, 0)),
            pl.BlockSpec(wct.shape, lambda n: (0, 0)),
            pl.BlockSpec(wcb.shape, lambda n: (0, 0)),
            pl.BlockSpec(bc.shape, lambda n: (0, 0)),
        ],
        out_specs=pl.BlockSpec((1, D, H, W, Cout), lambda n: (n, 0, 0, 0, 0)),
        scratch_shapes=[pltpu.VMEM((D + 2, H + 2, W + 2, Cm), jnp.float32)],
        compiler_params=pltpu.CompilerParams(
            dimension_semantics=("parallel",),
            vmem_limit_bytes=32 * 1024 * 1024),
    )(x_cl, w1, b1.reshape(1, Cm), wd, bd.reshape(1, Cm), wct, wcb, bc)


def _inverted_residual_s2(params, x_cl):
    N, D, H, W, Cin = x_cl.shape
    if W % 2 == 1:
        # one extra zero column keeps the W-pair-merged layout valid and is numerically
        # identical to the conv's implicit right padding for k=3, s=2, p=1.
        x_cl = jnp.pad(x_cl, ((0, 0), (0, 0), (0, 0), (0, 1), (0, 0)))
        W += 1
    W2 = W // 2
    xq = x_cl.reshape(N, D, H, W2, 2 * Cin)   # free view: merge W parity into the lane dim

    wd1, bd1 = _fold_dw(params["b1_dw_w"], params["b1_dw_bn"])
    w1p, b1p = _fold_pw(params["b1_pw_w"], params["b1_pw_bn"])
    w21, b21 = _fold_pw(params["b2_pw1_w"], params["b2_pw1_bn"])
    wd2, bd2 = _fold_dw(params["b2_dw_w"], params["b2_dw_bn"])
    w22, b22 = _fold_pw(params["b2_pw2_w"], params["b2_pw2_bn"])
    Cm = w21.shape[1]
    half = w22.shape[1]
    Cout = 2 * half

    # block-diagonal pw1 weight so the matmul runs directly on W-pair-merged rows
    w1blk = (jnp.zeros((2 * Cin, 2 * Cm), jnp.float32)
             .at[:Cin, :Cm].set(w21).at[Cin:, Cm:].set(w21))
    b1dup = jnp.concatenate([b21, b21]).reshape(1, 2 * Cm)

    # concat + channel_shuffle(groups=2) folded into the final matmuls
    wct = jnp.zeros((Cin, Cout), jnp.float32).at[:, 0::2].set(w1p)
    wcb = jnp.zeros((Cm, Cout), jnp.float32).at[:, 1::2].set(w22)
    bc = (jnp.zeros((Cout,), jnp.float32).at[0::2].set(b1p).at[1::2].set(b22)
          .reshape(1, Cout))

    Do, Ho, Wo = (D + 1) // 2, (H + 1) // 2, W2
    Dp, Hp, Wq = D + 2 + D % 2, H + 2 + H % 2, W2 + 1

    kernel = functools.partial(_fused_s2_kernel, D=D, H=H, W=W, Cin=Cin, Cm=Cm)
    return pl.pallas_call(
        kernel,
        out_shape=jax.ShapeDtypeStruct((N, Do, Ho, Wo, Cout), x_cl.dtype),
        grid=(N,),
        in_specs=[
            pl.BlockSpec((1, D, H, W2, 2 * Cin), lambda n: (n, 0, 0, 0, 0)),
            pl.BlockSpec(wd1.shape, lambda n: (0, 0)),
            pl.BlockSpec((1, Cin), lambda n: (0, 0)),
            pl.BlockSpec(w1blk.shape, lambda n: (0, 0)),
            pl.BlockSpec(b1dup.shape, lambda n: (0, 0)),
            pl.BlockSpec(wd2.shape, lambda n: (0, 0)),
            pl.BlockSpec((1, Cm), lambda n: (0, 0)),
            pl.BlockSpec(wct.shape, lambda n: (0, 0)),
            pl.BlockSpec(wcb.shape, lambda n: (0, 0)),
            pl.BlockSpec(bc.shape, lambda n: (0, 0)),
        ],
        out_specs=pl.BlockSpec((1, Do, Ho, Wo, Cout), lambda n: (n, 0, 0, 0, 0)),
        scratch_shapes=[pltpu.VMEM((Dp, Hp, Wq, 2 * Cin), jnp.float32),
                        pltpu.VMEM((Dp, Hp, Wq, 2 * Cm), jnp.float32)],
        compiler_params=pltpu.CompilerParams(
            dimension_semantics=("parallel",),
            vmem_limit_bytes=32 * 1024 * 1024),
    )(xq, wd1, bd1.reshape(1, Cin), w1blk, b1dup, wd2, bd2.reshape(1, Cm), wct, wcb, bc)


def inverted_residual_forward(params, x_ncdhw, stride):
    # x_ncdhw: (N, C, D, H, W) to match the PyTorch interface
    x = jnp.transpose(x_ncdhw, (0, 2, 3, 4, 1))      # -> NDHWC
    if stride == 1:
        y = _inverted_residual_s1(params, x)
    else:
        y = _inverted_residual_s2(params, x)
    return jnp.transpose(y, (0, 4, 1, 2, 3))         # back to NCDHW


# ----------------------------------------------------------------------------
# Parameter init (inference-mode BN running stats)
# ----------------------------------------------------------------------------
def _init_bn(key, c):
    k1, k2, k3, k4 = jax.random.split(key, 4)
    gamma = 1.0 + 0.1 * jax.random.normal(k1, (c,), jnp.float32)
    beta = 0.1 * jax.random.normal(k2, (c,), jnp.float32)
    mean = 0.1 * jax.random.normal(k3, (c,), jnp.float32)
    var = jax.random.uniform(k4, (c,), jnp.float32, 0.5, 1.5)
    eps = 1e-5
    scale = gamma / jnp.sqrt(var + eps)
    bias = beta - mean * scale
    return (scale, bias)


def init_inverted_residual_params(key, inp, oup, stride):
    assert stride in (1, 2)
    oup_inc = oup // 2
    ks = jax.random.split(key, 10)
    p = {}
    if stride == 2:
        p["b1_dw_w"] = 0.1 * jax.random.normal(ks[0], (3, 3, 3, inp), jnp.float32)
        p["b1_dw_bn"] = _init_bn(ks[1], inp)
        p["b1_pw_w"] = 0.1 * jax.random.normal(ks[2], (inp, oup_inc), jnp.float32)
        p["b1_pw_bn"] = _init_bn(ks[3], oup_inc)
        cin2 = inp
    else:
        cin2 = oup_inc
    p["b2_pw1_w"] = 0.1 * jax.random.normal(ks[4], (cin2, oup_inc), jnp.float32)
    p["b2_pw1_bn"] = _init_bn(ks[5], oup_inc)
    p["b2_dw_w"] = 0.1 * jax.random.normal(ks[6], (3, 3, 3, oup_inc), jnp.float32)
    p["b2_dw_bn"] = _init_bn(ks[7], oup_inc)
    p["b2_pw2_w"] = 0.1 * jax.random.normal(ks[8], (oup_inc, oup_inc), jnp.float32)
    p["b2_pw2_bn"] = _init_bn(ks[9], oup_inc)
    return p


# ----------------------------------------------------------------------------
# Pure-JAX reference (NCDHW, mirrors the PyTorch module) for verification
# ----------------------------------------------------------------------------
def _ref_pw(x, w, bn, relu):
    y = jnp.einsum("ncdhw,ck->nkdhw", x, w)
    y = y * bn[0][None, :, None, None, None] + bn[1][None, :, None, None, None]
    return jnp.maximum(y, 0.0) if relu else y


def _ref_dw(x, w, bn, stride):
    C = x.shape[1]
    wt = jnp.transpose(w, (3, 0, 1, 2))[:, None]  # (C, 1, 3, 3, 3)
    y = jax.lax.conv_general_dilated(
        x, wt, window_strides=(stride, stride, stride), padding=((1, 1),) * 3,
        dimension_numbers=("NCDHW", "OIDHW", "NCDHW"), feature_group_count=C)
    return y * bn[0][None, :, None, None, None] + bn[1][None, :, None, None, None]


def _ref_channel_shuffle(x, groups):
    n, c, d, h, w = x.shape
    x = x.reshape(n, groups, c // groups, d, h, w)
    x = jnp.transpose(x, (0, 2, 1, 3, 4, 5))
    return x.reshape(n, c, d, h, w)


def ref_forward(params, x, stride):
    if stride == 1:
        c = x.shape[1]
        x1, x2 = x[:, : c // 2], x[:, c // 2:]
        h = _ref_pw(x2, params["b2_pw1_w"], params["b2_pw1_bn"], True)
        h = _ref_dw(h, params["b2_dw_w"], params["b2_dw_bn"], 1)
        h = _ref_pw(h, params["b2_pw2_w"], params["b2_pw2_bn"], True)
        out = jnp.concatenate([x1, h], axis=1)
    else:
        h1 = _ref_dw(x, params["b1_dw_w"], params["b1_dw_bn"], 2)
        h1 = _ref_pw(h1, params["b1_pw_w"], params["b1_pw_bn"], True)
        h2 = _ref_pw(x, params["b2_pw1_w"], params["b2_pw1_bn"], True)
        h2 = _ref_dw(h2, params["b2_dw_w"], params["b2_dw_bn"], 2)
        h2 = _ref_pw(h2, params["b2_pw2_w"], params["b2_pw2_bn"], True)
        out = jnp.concatenate([h1, h2], axis=1)
    return _ref_channel_shuffle(out, 2)


# ----------------------------------------------------------------------------
if __name__ == "__main__":
    key = jax.random.PRNGKey(0)
    kx, kp1, kp2 = jax.random.split(key, 3)

    # small 3-D input: N=2, C=16, D=4, H=8, W=8 (NCDHW, like PyTorch Conv3d)
    x = jax.random.normal(kx, (2, 16, 4, 8, 8), jnp.float32)

    # Tolerance accounts for possible default-precision (bf16-pass) TPU matmuls on either
    # the kernel or the reference path; real bugs show up as O(0.1-1) errors.
    TOL = 2e-2

    # stride=1 block: inp=oup=16
    p1 = init_inverted_residual_params(kp1, inp=16, oup=16, stride=1)
    y1 = jax.block_until_ready(inverted_residual_forward(p1, x, stride=1))
    r1 = ref_forward(p1, x, stride=1)
    assert y1.shape == (2, 16, 4, 8, 8)
    assert jnp.allclose(y1, r1, atol=TOL, rtol=TOL), (
        f"stride=1 mismatch, max|diff|={float(jnp.max(jnp.abs(y1 - r1)))}")

    # stride=2 block: inp=16, oup=32 (spatial downsample by 2)
    p2 = init_inverted_residual_params(kp2, inp=16, oup=32, stride=2)
    y2 = jax.block_until_ready(inverted_residual_forward(p2, x, stride=2))
    r2 = ref_forward(p2, x, stride=2)
    assert y2.shape == (2, 32, 2, 4, 4)
    assert jnp.allclose(y2, r2, atol=TOL, rtol=TOL), (
        f"stride=2 mismatch, max|diff|={float(jnp.max(jnp.abs(y2 - r2)))}")

    print("KERNEL_OK")
</pallas_src>

<mosaic_0001>
module attributes {stable_mosaic.version = 11 : i64} {
  func.func @_fused_s1_kernel(%arg0: i32, %arg1: memref<1x4x8x8x16xf32, #tpu.memory_space<vmem>>, %arg2: memref<8x8xf32, #tpu.memory_space<vmem>>, %arg3: memref<1x8xf32, #tpu.memory_space<vmem>>, %arg4: memref<27x8xf32, #tpu.memory_space<vmem>>, %arg5: memref<1x8xf32, #tpu.memory_space<vmem>>, %arg6: memref<8x16xf32, #tpu.memory_space<vmem>>, %arg7: memref<8x16xf32, #tpu.memory_space<vmem>>, %arg8: memref<1x16xf32, #tpu.memory_space<vmem>>, %arg9: memref<1x4x8x8x16xf32, #tpu.memory_space<vmem>>, %arg10: memref<6x10x10x8xf32, #tpu.memory_space<vmem>>) attributes {dimension_semantics = [#tpu.dimension_semantics<parallel>], iteration_bounds = array<i64: 2>, scalar_prefetch = 0 : i64, scratch_operands = 1 : i64, tpu.core_type = #tpu.core_type<tc>, window_params = [{transform_indices = @transform_0, window_bounds = array<i64: 1, 4, 8, 8, 16>}, {pipeline_mode = #tpu.pipeline_mode<synchronous>, transform_indices = @transform_1, window_bounds = array<i64: 8, 8>}, {pipeline_mode = #tpu.pipeline_mode<synchronous>, transform_indices = @transform_2, window_bounds = array<i64: 1, 8>}, {pipeline_mode = #tpu.pipeline_mode<synchronous>, transform_indices = @transform_3, window_bounds = array<i64: 27, 8>}, {pipeline_mode = #tpu.pipeline_mode<synchronous>, transform_indices = @transform_4, window_bounds = array<i64: 1, 8>}, {pipeline_mode = #tpu.pipeline_mode<synchronous>, transform_indices = @transform_5, window_bounds = array<i64: 8, 16>}, {pipeline_mode = #tpu.pipeline_mode<synchronous>, transform_indices = @transform_6, window_bounds = array<i64: 8, 16>}, {pipeline_mode = #tpu.pipeline_mode<synchronous>, transform_indices = @transform_7, window_bounds = array<i64: 1, 16>}, {transform_indices = @transform_8, window_bounds = array<i64: 1, 4, 8, 8, 16>}]} {
    %c0 = arith.constant 0 : index
    %c0_0 = arith.constant 0 : index
    %c0_1 = arith.constant 0 : index
    %c0_2 = arith.constant 0 : index
    %c0_3 = arith.constant 0 : index
    %0 = vector.load %arg1[%c0, %c0_0, %c0_1, %c0_2, %c0_3] : memref<1x4x8x8x16xf32, #tpu.memory_space<vmem>>, vector<1x4x8x8x16xf32>
    %1 = vector.shape_cast %0 : vector<1x4x8x8x16xf32> to vector<4x8x8x16xf32>
    %2 = vector.shape_cast %1 : vector<4x8x8x16xf32> to vector<256x16xf32>
    %3 = vector.extract_strided_slice %2 {offsets = [0, 0], sizes = [256, 8], strides = [1, 1]} : vector<256x16xf32> to vector<256x8xf32>
    %4 = vector.extract_strided_slice %2 {offsets = [0, 8], sizes = [256, 8], strides = [1, 1]} : vector<256x16xf32> to vector<256x8xf32>
    %c0_4 = arith.constant 0 : index
    %c0_5 = arith.constant 0 : index
    %5 = vector.load %arg2[%c0_4, %c0_5] : memref<8x8xf32, #tpu.memory_space<vmem>>, vector<8x8xf32>
    %cst = arith.constant dense<0.000000e+00> : vector<256x8xf32>
    %6 = tpu.matmul %4, %5, %cst {dimension_numbers = #tpu.dot_dimension_numbers<[1], [0], [0], [1], [0, 0, 1, 1], [], []>} : vector<256x8xf32>, vector<8x8xf32>, vector<256x8xf32> -> vector<256x8xf32>
    %c0_6 = arith.constant 0 : index
    %c0_7 = arith.constant 0 : index
    %7 = vector.load %arg3[%c0_6, %c0_7] : memref<1x8xf32, #tpu.memory_space<vmem>>, vector<1x8xf32>
    %8 = vector.broadcast %7 : vector<1x8xf32> to vector<256x8xf32>
    %9 = arith.addf %6, %8 : vector<256x8xf32>
    %cst_8 = arith.constant 0.000000e+00 : f32
    %10 = vector.broadcast %cst_8 : f32 to vector<256x8xf32>
    %11 = arith.maximumf %9, %10 : vector<256x8xf32>
    %cst_9 = arith.constant 0.000000e+00 : f32
    %12 = vector.broadcast %cst_9 : f32 to vector<6x10x10x8xf32>
    %c0_10 = arith.constant 0 : index
    %c0_11 = arith.constant 0 : index
    %c0_12 = arith.constant 0 : index
    %c0_13 = arith.constant 0 : index
    %13 = vector.load %arg10[%c0_10, %c0_11, %c0_12, %c0_13] : memref<6x10x10x8xf32, #tpu.memory_space<vmem>>, vector<6x10x10x8xf32>
    tpu.vector_store %arg10[%c0_10, %c0_11, %c0_12, %c0_13], %12 {strides = array<i32>} : memref<6x10x10x8xf32, #tpu.memory_space<vmem>>, vector<6x10x10x8xf32>,
    %14 = vector.shape_cast %11 : vector<256x8xf32> to vector<4x8x8x8xf32>
    %c1 = arith.constant 1 : index
    %c1_14 = arith.constant 1 : index
    %c1_15 = arith.constant 1 : index
    %c0_16 = arith.constant 0 : index
    %15 = vector.load %arg10[%c1, %c1_14, %c1_15, %c0_16] : memref<6x10x10x8xf32, #tpu.memory_space<vmem>>, vector<4x8x8x8xf32>
    tpu.vector_store %arg10[%c1, %c1_14, %c1_15, %c0_16], %14 {strides = array<i32>} : memref<6x10x10x8xf32, #tpu.memory_space<vmem>>, vector<4x8x8x8xf32>,
    %c0_17 = arith.constant 0 : index
    %c0_18 = arith.constant 0 : index
    %16 = vector.load %arg4[%c0_17, %c0_18] : memref<27x8xf32, #tpu.memory_space<vmem>>, vector<27x8xf32>
    %cst_19 = arith.constant 0.000000e+00 : f32
    %17 = vector.broadcast %cst_19 : f32 to vector<4x8x8x8xf32>
    %c0_20 = arith.constant 0 : index
    %c0_21 = arith.constant 0 : index
    %c0_22 = arith.constant 0 : index
    %c0_23 = arith.constant 0 : index
    %18 = vector.load %arg10[%c0_20, %c0_21, %c0_22, %c0_23] : memref<6x10x10x8xf32, #tpu.memory_space<vmem>>, vector<4x8x8x8xf32>
    %19 = vector.extract_strided_slice %16 {offsets = [0, 0], sizes = [1, 8], strides = [1, 1]} : vector<27x8xf32> to vector<1x8xf32>
    %20 = vector.shape_cast %19 : vector<1x8xf32> to vector<8xf32>
    %21 = vector.shape_cast %20 : vector<8xf32> to vector<1x1x1x8xf32>
    %22 = vector.broadcast %21 : vector<1x1x1x8xf32> to vector<4x8x8x8xf32>
    %23 = arith.mulf %18, %22 : vector<4x8x8x8xf32>
    %24 = arith.addf %17, %23 : vector<4x8x8x8xf32>
    %c0_24 = arith.constant 0 : index
    %c0_25 = arith.constant 0 : index
    %c1_26 = arith.constant 1 : index
    %c0_27 = arith.constant 0 : index
    %25 = vector.load %arg10[%c0_24, %c0_25, %c1_26, %c0_27] : memref<6x10x10x8xf32, #tpu.memory_space<vmem>>, vector<4x8x8x8xf32>
    %26 = vector.extract_strided_slice %16 {offsets = [1, 0], sizes = [1, 8], strides = [1, 1]} : vector<27x8xf32> to vector<1x8xf32>
    %27 = vector.shape_cast %26 : vector<1x8xf32> to vector<8xf32>
    %28 = vector.shape_cast %27 : vector<8xf32> to vector<1x1x1x8xf32>
    %29 = vector.broadcast %28 : vector<1x1x1x8xf32> to vector<4x8x8x8xf32>
    %30 = arith.mulf %25, %29 : vector<4x8x8x8xf32>
    %31 = arith.addf %24, %30 : vector<4x8x8x8xf32>
    %c0_28 = arith.constant 0 : index
    %c0_29 = arith.constant 0 : index
    %c2 = arith.constant 2 : index
    %c0_30 = arith.constant 0 : index
    %32 = vector.load %arg10[%c0_28, %c0_29, %c2, %c0_30] : memref<6x10x10x8xf32, #tpu.memory_space<vmem>>, vector<4x8x8x8xf32>
    %33 = vector.extract_strided_slice %16 {offsets = [2, 0], sizes = [1, 8], strides = [1, 1]} : vector<27x8xf32> to vector<1x8xf32>
    %34 = vector.shape_cast %33 : vector<1x8xf32> to vector<8xf32>
    %35 = vector.shape_cast %34 : vector<8xf32> to vector<1x1x1x8xf32>
    %36 = vector.broadcast %35 : vector<1x1x1x8xf32> to vector<4x8x8x8xf32>
    %37 = arith.mulf %32, %36 : vector<4x8x8x8xf32>
    %38 = arith.addf %31, %37 : vector<4x8x8x8xf32>
    %c0_31 = arith.constant 0 : index
    %c1_32 = arith.constant 1 : index
    %c0_33 = arith.constant 0 : index
    %c0_34 = arith.constant 0 : index
    %39 = vector.load %arg10[%c0_31, %c1_32, %c0_33, %c0_34] : memref<6x10x10x8xf32, #tpu.memory_space<vmem>>, vector<4x8x8x8xf32>
    %40 = vector.extract_strided_slice %16 {offsets = [3, 0], sizes = [1, 8], strides = [1, 1]} : vector<27x8xf32> to vector<1x8xf32>
    %41 = vector.shape_cast %40 : vector<1x8xf32> to vector<8xf32>
    %42 = vector.shape_cast %41 : vector<8xf32> to vector<1x1x1x8xf32>
    %43 = vector.broadcast %42 : vector<1x1x1x8xf32> to vector<4x8x8x8xf32>
    %44 = arith.mulf %39, %43 : vector<4x8x8x8xf32>
    %45 = arith.addf %38, %44 : vector<4x8x8x8xf32>
    %c0_35 = arith.constant 0 : index
    %c1_36 = arith.constant 1 : index
    %c1_37 = arith.constant 1 : index
    %c0_38 = arith.constant 0 : index
    %46 = vector.load %arg10[%c0_35, %c1_36, %c1_37, %c0_38] : memref<6x10x10x8xf32, #tpu.memory_space<vmem>>, vector<4x8x8x8xf32>
    %47 = vector.extract_strided_slice %16 {offsets = [4, 0], sizes = [1, 8], strides = [1, 1]} : vector<27x8xf32> to vector<1x8xf32>
    %48 = vector.shape_cast %47 : vector<1x8xf32> to vector<8xf32>
    %49 = vector.shape_cast %48 : vector<8xf32> to vector<1x1x1x8xf32>
    %50 = vector.broadcast %49 : vector<1x1x1x8xf32> to vector<4x8x8x8xf32>
    %51 = arith.mulf %46, %50 : vector<4x8x8x8xf32>
    %52 = arith.addf %45, %51 : vector<4x8x8x8xf32>
    %c0_39 = arith.constant 0 : index
    %c1_40 = arith.constant 1 : index
    %c2_41 = arith.constant 2 : index
    %c0_42 = arith.constant 0 : index
    %53 = vector.load %arg10[%c0_39, %c1_40, %c2_41, %c0_42] : memref<6x10x10x8xf32, #tpu.memory_space<vmem>>, vector<4x8x8x8xf32>
    %54 = vector.extract_strided_slice %16 {offsets = [5, 0], sizes = [1, 8], strides = [1, 1]} : vector<27x8xf32> to vector<1x8xf32>
    %55 = vector.shape_cast %54 : vector<1x8xf32> to vector<8xf32>
    %56 = vector.shape_cast %55 : vector<8xf32> to vector<1x1x1x8xf32>
    %57 = vector.broadcast %56 : vector<1x1x1x8xf32> to vector<4x8x8x8xf32>
    %58 = arith.mulf %53, %57 : vector<4x8x8x8xf32>
    %59 = arith.addf %52, %58 : vector<4x8x8x8xf32>
    %c0_43 = arith.constant 0 : index
    %c2_44 = arith.constant 2 : index
    %c0_45 = arith.constant 0 : index
    %c0_46 = arith.constant 0 : index
    %60 = vector.load %arg10[%c0_43, %c2_44, %c0_45, %c0_46] : memref<6x10x10x8xf32, #tpu.memory_space<vmem>>, vector<4x8x8x8xf32>
    %61 = vector.extract_strided_slice %16 {offsets = [6, 0], sizes = [1, 8], strides = [1, 1]} : vector<27x8xf32> to vector<1x8xf32>
    %62 = vector.shape_cast %61 : vector<1x8xf32> to vector<8xf32>
    %63 = vector.shape_cast %62 : vector<8xf32> to vector<1x1x1x8xf32>
    %64 = vector.broadcast %63 : vector<1x1x1x8xf32> to vector<4x8x8x8xf32>
    %65 = arith.mulf %60, %64 : vector<4x8x8x8xf32>
    %66 = arith.addf %59, %65 : vector<4x8x8x8xf32>
    %c0_47 = arith.constant 0 : index
    %c2_48 = arith.constant 2 : index
    %c1_49 = arith.constant 1 : index
    %c0_50 = arith.constant 0 : index
    %67 = vector.load %arg10[%c0_47, %c2_48, %c1_49, %c0_50] : memref<6x10x10x8xf32, #tpu.memory_space<vmem>>, vector<4x8x8x8xf32>
    %68 = vector.extract_strided_slice %16 {offsets = [7, 0], sizes = [1, 8], strides = [1, 1]} : vector<27x8xf32> to vector<1x8xf32>
    %69 = vector.shape_cast %68 : vector<1x8xf32> to vector<8xf32>
    %70 = vector.shape_cast %69 : vector<8xf32> to vector<1x1x1x8xf32>
    %71 = vector.broadcast %70 : vector<1x1x1x8xf32> to vector<4x8x8x8xf32>
    %72 = arith.mulf %67, %71 : vector<4x8x8x8xf32>
    %73 = arith.addf %66, %72 : vector<4x8x8x8xf32>
    %c0_51 = arith.constant 0 : index
    %c2_52 = arith.constant 2 : index
    %c2_53 = arith.constant 2 : index
    %c0_54 = arith.constant 0 : index
    %74 = vector.load %arg10[%c0_51, %c2_52, %c2_53, %c0_54] : memref<6x10x10x8xf32, #tpu.memory_space<vmem>>, vector<4x8x8x8xf32>
    %75 = vector.extract_strided_slice %16 {offsets = [8, 0], sizes = [1, 8], strides = [1, 1]} : vector<27x8xf32> to vector<1x8xf32>
    %76 = vector.shape_cast %75 : vector<1x8xf32> to vector<8xf32>
    %77 = vector.shape_cast %76 : vector<8xf32> to vector<1x1x1x8xf32>
    %78 = vector.broadcast %77 : vector<1x1x1x8xf32> to vector<4x8x8x8xf32>
    %79 = arith.mulf %74, %78 : vector<4x8x8x8xf32>
    %80 = arith.addf %73, %79 : vector<4x8x8x8xf32>
    %c1_55 = arith.constant 1 : index
    %c0_56 = arith.constant 0 : index
    %c0_57 = arith.constant 0 : index
    %c0_58 = arith.constant 0 : index
    %81 = vector.load %arg10[%c1_55, %c0_56, %c0_57, %c0_58] : memref<6x10x10x8xf32, #tpu.memory_space<vmem>>, vector<4x8x8x8xf32>
    %82 = vector.extract_strided_slice %16 {offsets = [9, 0], sizes = [1, 8], strides = [1, 1]} : vector<27x8xf32> to vector<1x8xf32>
    %83 = vector.shape_cast %82 : vector<1x8xf32> to vector<8xf32>
    %84 = vector.shape_cast %83 : vector<8xf32> to vector<1x1x1x8xf32>
    %85 = vector.broadcast %84 : vector<1x1x1x8xf32> to vector<4x8x8x8xf32>
    %86 = arith.mulf %81, %85 : vector<4x8x8x8xf32>
    %87 = arith.addf %80, %86 : vector<4x8x8x8xf32>
    %c1_59 = arith.constant 1 : index
    %c0_60 = arith.constant 0 : index
    %c1_61 = arith.constant 1 : index
    %c0_62 = arith.constant 0 : index
    %88 = vector.load %arg10[%c1_59, %c0_60, %c1_61, %c0_62] : memref<6x10x10x8xf32, #tpu.memory_space<vmem>>, vector<4x8x8x8xf32>
    %89 = vector.extract_strided_slice %16 {offsets = [10, 0], sizes = [1, 8], strides = [1, 1]} : vector<27x8xf32> to vector<1x8xf32>
    %90 = vector.shape_cast %89 : vector<1x8xf32> to vector<8xf32>
    %91 = vector.shape_cast %90 : vector<8xf32> to vector<1x1x1x8xf32>
    %92 = vector.broadcast %91 : vector<1x1x1x8xf32> to vector<4x8x8x8xf32>
    %93 = arith.mulf %88, %92 : vector<4x8x8x8xf32>
    %94 = arith.addf %87, %93 : vector<4x8x8x8xf32>
    %c1_63 = arith.constant 1 : index
    %c0_64 = arith.constant 0 : index
    %c2_65 = arith.constant 2 : index
    %c0_66 = arith.constant 0 : index
    %95 = vector.load %arg10[%c1_63, %c0_64, %c2_65, %c0_66] : memref<6x10x10x8xf32, #tpu.memory_space<vmem>>, vector<4x8x8x8xf32>
    %96 = vector.extract_strided_slice %16 {offsets = [11, 0], sizes = [1, 8], strides = [1, 1]} : vector<27x8xf32> to vector<1x8xf32>
    %97 = vector.shape_cast %96 : vector<1x8xf32> to vector<8xf32>
    %98 = vector.shape_cast %97 : vector<8xf32> to vector<1x1x1x8xf32>
    %99 = vector.broadcast %98 : vector<1x1x1x8xf32> to vector<4x8x8x8xf32>
    %100 = arith.mulf %95, %99 : vector<4x8x8x8xf32>
    %101 = arith.addf %94, %100 : vector<4x8x8x8xf32>
    %c1_67 = arith.constant 1 : index
    %c1_68 = arith.constant 1 : index
    %c0_69 = arith.constant 0 : index
    %c0_70 = arith.constant 0 : index
    %102 = vector.load %arg10[%c1_67, %c1_68, %c0_69, %c0_70] : memref<6x10x10x8xf32, #tpu.memory_space<vmem>>, vector<4x8x8x8xf32>
    %103 = vector.extract_strided_slice %16 {offsets = [12, 0], sizes = [1, 8], strides = [1, 1]} : vector<27x8xf32> to vector<1x8xf32>
    %104 = vector.shape_cast %103 : vector<1x8xf32> to vector<8xf32>
    %105 = vector.shape_cast %104 : vector<8xf32> to vector<1x1x1x8xf32>
    %106 = vector.broadcast %105 : vector<1x1x1x8xf32> to vector<4x8x8x8xf32>
    %107 = arith.mulf %102, %106 : vector<4x8x8x8xf32>
    %108 = arith.addf %101, %107 : vector<4x8x8x8xf32>
    %c1_71 = arith.constant 1 : index
    %c1_72 = arith.constant 1 : index
    %c1_73 = arith.constant 1 : index
    %c0_74 = arith.constant 0 : index
    %109 = vector.load %arg10[%c1_71, %c1_72, %c1_73, %c0_74] : memref<6x10x10x8xf32, #tpu.memory_space<vmem>>, vector<4x8x8x8xf32>
    %110 = vector.extract_strided_slice %16 {offsets = [13, 0], sizes = [1, 8], strides = [1, 1]} : vector<27x8xf32> to vector<1x8xf32>
    %111 = vector.shape_cast %110 : vector<1x8xf32> to vector<8xf32>
    %112 = vector.shape_cast %111 : vector<8xf32> to vector<1x1x1x8xf32>
    %113 = vector.broadcast %112 : vector<1x1x1x8xf32> to vector<4x8x8x8xf32>
    %114 = arith.mulf %109, %113 : vector<4x8x8x8xf32>
    %115 = arith.addf %108, %114 : vector<4x8x8x8xf32>
    %c1_75 = arith.constant 1 : index
    %c1_76 = arith.constant 1 : index
    %c2_77 = arith.constant 2 : index
    %c0_78 = arith.constant 0 : index
    %116 = vector.load %arg10[%c1_75, %c1_76, %c2_77, %c0_78] : memref<6x10x10x8xf32, #tpu.memory_space<vmem>>, vector<4x8x8x8xf32>
    %117 = vector.extract_strided_slice %16 {offsets = [14, 0], sizes = [1, 8], strides = [1, 1]} : vector<27x8xf32> to vector<1x8xf32>
    %118 = vector.shape_cast %117 : vector<1x8xf32> to vector<8xf32>
    %119 = vector.shape_cast %118 : vector<8xf32> to vector<1x1x1x8xf32>
    %120 = vector.broadcast %119 : vector<1x1x1x8xf32> to vector<4x8x8x8xf32>
    %121 = arith.mulf %116, %120 : vector<4x8x8x8xf32>
    %122 = arith.addf %115, %121 : vector<4x8x8x8xf32>
    %c1_79 = arith.constant 1 : index
    %c2_80 = arith.constant 2 : index
    %c0_81 = arith.constant 0 : index
    %c0_82 = arith.constant 0 : index
    %123 = vector.load %arg10[%c1_79, %c2_80, %c0_81, %c0_82] : memref<6x10x10x8xf32, #tpu.memory_space<vmem>>, vector<4x8x8x8xf32>
    %124 = vector.extract_strided_slice %16 {offsets = [15, 0], sizes = [1, 8], strides = [1, 1]} : vector<27x8xf32> to vector<1x8xf32>
    %125 = vector.shape_cast %124 : vector<1x8xf32> to vector<8xf32>
    %126 = vector.shape_cast %125 : vector<8xf32> to vector<1x1x1x8xf32>
    %127 = vector.broadcast %126 : vector<1x1x1x8xf32> to vector<4x8x8x8xf32>
    %128 = arith.mulf %123, %127 : vector<4x8x8x8xf32>
    %129 = arith.addf %122, %128 : vector<4x8x8x8xf32>
    %c1_83 = arith.constant 1 : index
    %c2_84 = arith.constant 2 : index
    %c1_85 = arith.constant 1 : index
    %c0_86 = arith.constant 0 : index
    %130 = vector.load %arg10[%c1_83, %c2_84, %c1_85, %c0_86] : memref<6x10x10x8xf32, #tpu.memory_space<vmem>>, vector<4x8x8x8xf32>
    %131 = vector.extract_strided_slice %16 {offsets = [16, 0], sizes = [1, 8], strides = [1, 1]} : vector<27x8xf32> to vector<1x8xf32>
    %132 = vector.shape_cast %131 : vector<1x8xf32> to vector<8xf32>
    %133 = vector.shape_cast %132 : vector<8xf32> to vector<1x1x1x8xf32>
    %134 = vector.broadcast %133 : vector<1x1x1x8xf32> to vector<4x8x8x8xf32>
    %135 = arith.mulf %130, %134 : vector<4x8x8x8xf32>
    %136 = arith.addf %129, %135 : vector<4x8x8x8xf32>
    %c1_87 = arith.constant 1 : index
    %c2_88 = arith.constant 2 : index
    %c2_89 = arith.constant 2 : index
    %c0_90 = arith.constant 0 : index
    %137 = vector.load %arg10[%c1_87, %c2_88, %c2_89, %c0_90] : memref<6x10x10x8xf32, #tpu.memory_space<vmem>>, vector<4x8x8x8xf32>
    %138 = vector.extract_strided_slice %16 {offsets = [17, 0], sizes = [1, 8], strides = [1, 1]} : vector<27x8xf32> to vector<1x8xf32>
    %139 = vector.shape_cast %138 : vector<1x8xf32> to vector<8xf32>
    %140 = vector.shape_cast %139 : vector<8xf32> to vector<1x1x1x8xf32>
    %141 = vector.broadcast %140 : vector<1x1x1x8xf32> to vector<4x8x8x8xf32>
    %142 = arith.mulf %137, %141 : vector<4x8x8x8xf32>
    %143 = arith.addf %136, %142 : vector<4x8x8x8xf32>
    %c2_91 = arith.constant 2 : index
    %c0_92 = arith.constant 0 : index
    %c0_93 = arith.constant 0 : index
    %c0_94 = arith.constant 0 : index
    %144 = vector.load %arg10[%c2_91, %c0_92, %c0_93, %c0_94] : memref<6x10x10x8xf32, #tpu.memory_space<vmem>>, vector<4x8x8x8xf32>
    %145 = vector.extract_strided_slice %16 {offsets = [18, 0], sizes = [1, 8], strides = [1, 1]} : vector<27x8xf32> to vector<1x8xf32>
    %146 = vector.shape_cast %145 : vector<1x8xf32> to vector<8xf32>
    %147 = vector.shape_cast %146 : vector<8xf32> to vector<1x1x1x8xf32>
    %148 = vector.broadcast %147 : vector<1x1x1x8xf32> to vector<4x8x8x8xf32>
    %149 = arith.mulf %144, %148 : vector<4x8x8x8xf32>
    %150 = arith.addf %143, %149 : vector<4x8x8x8xf32>
    %c2_95 = arith.constant 2 : index
    %c0_96 = arith.constant 0 : index
    %c1_97 = arith.constant 1 : index
    %c0_98 = arith.constant 0 : index
    %151 = vector.load %arg10[%c2_95, %c0_96, %c1_97, %c0_98] : memref<6x10x10x8xf32, #tpu.memory_space<vmem>>, vector<4x8x8x8xf32>
    %152 = vector.extract_strided_slice %16 {offsets = [19, 0], sizes = [1, 8], strides = [1, 1]} : vector<27x8xf32> to vector<1x8xf32>
    %153 = vector.shape_cast %152 : vector<1x8xf32> to vector<8xf32>
    %154 = vector.shape_cast %153 : vector<8xf32> to vector<1x1x1x8xf32>
    %155 = vector.broadcast %154 : vector<1x1x1x8xf32> to vector<4x8x8x8xf32>
    %156 = arith.mulf %151, %155 : vector<4x8x8x8xf32>
    %157 = arith.addf %150, %156 : vector<4x8x8x8xf32>
    %c2_99 = arith.constant 2 : index
    %c0_100 = arith.constant 0 : index
    %c2_101 = arith.constant 2 : index
    %c0_102 = arith.constant 0 : index
    %158 = vector.load %arg10[%c2_99, %c0_100, %c2_101, %c0_102] : memref<6x10x10x8xf32, #tpu.memory_space<vmem>>, vector<4x8x8x8xf32>
    %159 = vector.extract_strided_slice %16 {offsets = [20, 0], sizes = [1, 8], strides = [1, 1]} : vector<27x8xf32> to vector<1x8xf32>
    %160 = vector.shape_cast %159 : vector<1x8xf32> to vector<8xf32>
    %161 = vector.shape_cast %160 : vector<8xf32> to vector<1x1x1x8xf32>
    %162 = vector.broadcast %161 : vector<1x1x1x8xf32> to vector<4x8x8x8xf32>
    %163 = arith.mulf %158, %162 : vector<4x8x8x8xf32>
    %164 = arith.addf %157, %163 : vector<4x8x8x8xf32>
    %c2_103 = arith.constant 2 : index
    %c1_104 = arith.constant 1 : index
    %c0_105 = arith.constant 0 : index
    %c0_106 = arith.constant 0 : index
    %165 = vector.load %arg10[%c2_103, %c1_104, %c0_105, %c0_106] : memref<6x10x10x8xf32, #tpu.memory_space<vmem>>, vector<4x8x8x8xf32>
    %166 = vector.extract_strided_slice %16 {offsets = [21, 0], sizes = [1, 8], strides = [1, 1]} : vector<27x8xf32> to vector<1x8xf32>
    %167 = vector.shape_cast %166 : vector<1x8xf32> to vector<8xf32>
    %168 = vector.shape_cast %167 : vector<8xf32> to vector<1x1x1x8xf32>
    %169 = vector.broadcast %168 : vector<1x1x1x8xf32> to vector<4x8x8x8xf32>
    %170 = arith.mulf %165, %169 : vector<4x8x8x8xf32>
    %171 = arith.addf %164, %170 : vector<4x8x8x8xf32>
    %c2_107 = arith.constant 2 : index
    %c1_108 = arith.constant 1 : index
    %c1_109 = arith.constant 1 : index
    %c0_110 = arith.constant 0 : index
    %172 = vector.load %arg10[%c2_107, %c1_108, %c1_109, %c0_110] : memref<6x10x10x8xf32, #tpu.memory_space<vmem>>, vector<4x8x8x8xf32>
    %173 = vector.extract_strided_slice %16 {offsets = [22, 0], sizes = [1, 8], strides = [1, 1]} : vector<27x8xf32> to vector<1x8xf32>
    %174 = vector.shape_cast %173 : vector<1x8xf32> to vector<8xf32>
    %175 = vector.shape_cast %174 : vector<8xf32> to vector<1x1x1x8xf32>
    %176 = vector.broadcast %175 : vector<1x1x1x8xf32> to vector<4x8x8x8xf32>
    %177 = arith.mulf %172, %176 : vector<4x8x8x8xf32>
    %178 = arith.addf %171, %177 : vector<4x8x8x8xf32>
    %c2_111 = arith.constant 2 : index
    %c1_112 = arith.constant 1 : index
    %c2_113 = arith.constant 2 : index
    %c0_114 = arith.constant 0 : index
    %179 = vector.load %arg10[%c2_111, %c1_112, %c2_113, %c0_114] : memref<6x10x10x8xf32, #tpu.memory_space<vmem>>, vector<4x8x8x8xf32>
    %180 = vector.extract_strided_slice %16 {offsets = [23, 0], sizes = [1, 8], strides = [1, 1]} : vector<27x8xf32> to vector<1x8xf32>
    %181 = vector.shape_cast %180 : vector<1x8xf32> to vector<8xf32>
    %182 = vector.shape_cast %181 : vector<8xf32> to vector<1x1x1x8xf32>
    %183 = vector.broadcast %182 : vector<1x1x1x8xf32> to vector<4x8x8x8xf32>
    %184 = arith.mulf %179, %183 : vector<4x8x8x8xf32>
    %185 = arith.addf %178, %184 : vector<4x8x8x8xf32>
    %c2_115 = arith.constant 2 : index
    %c2_116 = arith.constant 2 : index
    %c0_117 = arith.constant 0 : index
    %c0_118 = arith.constant 0 : index
    %186 = vector.load %arg10[%c2_115, %c2_116, %c0_117, %c0_118] : memref<6x10x10x8xf32, #tpu.memory_space<vmem>>, vector<4x8x8x8xf32>
    %187 = vector.extract_strided_slice %16 {offsets = [24, 0], sizes = [1, 8], strides = [1, 1]} : vector<27x8xf32> to vector<1x8xf32>
    %188 = vector.shape_cast %187 : vector<1x8xf32> to vector<8xf32>
    %189 = vector.shape_cast %188 : vector<8xf32> to vector<1x1x1x8xf32>
    %190 = vector.broadcast %189 : vector<1x1x1x8xf32> to vector<4x8x8x8xf32>
    %191 = arith.mulf %186, %190 : vector<4x8x8x8xf32>
    %192 = arith.addf %185, %191 : vector<4x8x8x8xf32>
    %c2_119 = arith.constant 2 : index
    %c2_120 = arith.constant 2 : index
    %c1_121 = arith.constant 1 : index
    %c0_122 = arith.constant 0 : index
    %193 = vector.load %arg10[%c2_119, %c2_120, %c1_121, %c0_122] : memref<6x10x10x8xf32, #tpu.memory_space<vmem>>, vector<4x8x8x8xf32>
    %194 = vector.extract_strided_slice %16 {offsets = [25, 0], sizes = [1, 8], strides = [1, 1]} : vector<27x8xf32> to vector<1x8xf32>
    %195 = vector.shape_cast %194 : vector<1x8xf32> to vector<8xf32>
    %196 = vector.shape_cast %195 : vector<8xf32> to vector<1x1x1x8xf32>
    %197 = vector.broadcast %196 : vector<1x1x1x8xf32> to vector<4x8x8x8xf32>
    %198 = arith.mulf %193, %197 : vector<4x8x8x8xf32>
    %199 = arith.addf %192, %198 : vector<4x8x8x8xf32>
    %c2_123 = arith.constant 2 : index
    %c2_124 = arith.constant 2 : index
    %c2_125 = arith.constant 2 : index
    %c0_126 = arith.constant 0 : index
    %200 = vector.load %arg10[%c2_123, %c2_124, %c2_125, %c0_126] : memref<6x10x10x8xf32, #tpu.memory_space<vmem>>, vector<4x8x8x8xf32>
    %201 = vector.extract_strided_slice %16 {offsets = [26, 0], sizes = [1, 8], strides = [1, 1]} : vector<27x8xf32> to vector<1x8xf32>
    %202 = vector.shape_cast %201 : vector<1x8xf32> to vector<8xf32>
    %203 = vector.shape_cast %202 : vector<8xf32> to vector<1x1x1x8xf32>
    %204 = vector.broadcast %203 : vector<1x1x1x8xf32> to vector<4x8x8x8xf32>
    %205 = arith.mulf %200, %204 : vector<4x8x8x8xf32>
    %206 = arith.addf %199, %205 : vector<4x8x8x8xf32>
    %207 = vector.shape_cast %206 : vector<4x8x8x8xf32> to vector<256x8xf32>
    %c0_127 = arith.constant 0 : index
    %c0_128 = arith.constant 0 : index
    %208 = vector.load %arg5[%c0_127, %c0_128] : memref<1x8xf32, #tpu.memory_space<vmem>>, vector<1x8xf32>
    %209 = vector.broadcast %208 : vector<1x8xf32> to vector<256x8xf32>
    %210 = arith.addf %207, %209 : vector<256x8xf32>
    %c0_129 = arith.constant 0 : index
    %c0_130 = arith.constant 0 : index
    %211 = vector.load %arg6[%c0_129, %c0_130] : memref<8x16xf32, #tpu.memory_space<vmem>>, vector<8x16xf32>
    %cst_131 = arith.constant dense<0.000000e+00> : vector<256x16xf32>
    %212 = tpu.matmul %3, %211, %cst_131 {dimension_numbers = #tpu.dot_dimension_numbers<[1], [0], [0], [1], [0, 0, 1, 1], [], []>} : vector<256x8xf32>, vector<8x16xf32>, vector<256x16xf32> -> vector<256x16xf32>
    %c0_132 = arith.constant 0 : index
    %c0_133 = arith.constant 0 : index
    %213 = vector.load %arg7[%c0_132, %c0_133] : memref<8x16xf32, #tpu.memory_space<vmem>>, vector<8x16xf32>
    %cst_134 = arith.constant dense<0.000000e+00> : vector<256x16xf32>
    %214 = tpu.matmul %210, %213, %cst_134 {dimension_numbers = #tpu.dot_dimension_numbers<[1], [0], [0], [1], [0, 0, 1, 1], [], []>} : vector<256x8xf32>, vector<8x16xf32>, vector<256x16xf32> -> vector<256x16xf32>
    %215 = arith.addf %212, %214 : vector<256x16xf32>
    %c0_135 = arith.constant 0 : index
    %c0_136 = arith.constant 0 : index
    %216 = vector.load %arg8[%c0_135, %c0_136] : memref<1x16xf32, #tpu.memory_space<vmem>>, vector<1x16xf32>
    %217 = vector.broadcast %216 : vector<1x16xf32> to vector<256x16xf32>
    %218 = arith.addf %215, %217 : vector<256x16xf32>
    %219 = tpu.iota {dimensions = array<i32: 1>} : vector<1x16xi32>
    %c2_i32 = arith.constant 2 : i32
    %c0_i32 = arith.constant 0 : i32
    %220 = arith.cmpi eq, %c2_i32, %c0_i32 : i32
    %c1_i32 = arith.constant 1 : i32
    %221 = arith.select %220, %c1_i32, %c2_i32 : i32
    %222 = vector.broadcast %221 : i32 to vector<1x16xi32>
    %223 = arith.remsi %219, %222 : vector<1x16xi32>
    %c0_i32_137 = arith.constant 0 : i32
    %224 = vector.broadcast %c0_i32_137 : i32 to vector<1x16xi32>
    %225 = arith.cmpi ne, %223, %224 : vector<1x16xi32>
    %c0_i32_138 = arith.constant 0 : i32
    %226 = vector.broadcast %c0_i32_138 : i32 to vector<1x16xi32>
    %227 = arith.cmpi slt, %223, %226 : vector<1x16xi32>
    %c0_i32_139 = arith.constant 0 : i32
    %228 = arith.cmpi slt, %221, %c0_i32_139 : i32
    %229 = vector.broadcast %228 : i1 to vector<1x16xi1>
    %230 = vector.broadcast %229 : vector<1x16xi1> to vector<1x16xi1>
    %231 = arith.xori %227, %230 : vector<1x16xi1>
    %232 = arith.andi %231, %225 : vector<1x16xi1>
    %233 = vector.broadcast %221 : i32 to vector<1x16xi32>
    %234 = arith.addi %223, %233 : vector<1x16xi32>
    %235 = arith.select %232, %234, %223 : vector<1x16xi1>, vector<1x16xi32>
    %c1_i32_140 = arith.constant 1 : i32
    %236 = vector.broadcast %c1_i32_140 : i32 to vector<1x16xi32>
    %237 = arith.cmpi eq, %235, %236 : vector<1x16xi32>
    %cst_141 = arith.constant 0.000000e+00 : f32
    %238 = vector.broadcast %cst_141 : f32 to vector<256x16xf32>
    %239 = arith.maximumf %218, %238 : vector<256x16xf32>
    %240 = vector.shape_cast %237 : vector<1x16xi1> to vector<1x16xi1>
    %241 = vector.broadcast %240 : vector<1x16xi1> to vector<256x16xi1>
    %242 = arith.select %241, %239, %218 : vector<256x16xi1>, vector<256x16xf32>
    %243 = vector.shape_cast %242 : vector<256x16xf32> to vector<4x8x8x16xf32>
    %c0_142 = arith.constant 0 : index
    %c0_143 = arith.constant 0 : index
    %c0_144 = arith.constant 0 : index
    %c0_145 = arith.constant 0 : index
    %c0_146 = arith.constant 0 : index
    %244 = vector.load %arg9[%c0_142, %c0_143, %c0_144, %c0_145, %c0_146] : memref<1x4x8x8x16xf32, #tpu.memory_space<vmem>>, vector<1x4x8x8x16xf32>
    %245 = vector.shape_cast %244 : vector<1x4x8x8x16xf32> to vector<4x8x8x16xf32>
    %246 = vector.shape_cast %243 : vector<4x8x8x16xf32> to vector<1x4x8x8x16xf32>
    tpu.vector_store %arg9[%c0_142, %c0_143, %c0_144, %c0_145, %c0_146], %246 {strides = array<i32>} : memref<1x4x8x8x16xf32, #tpu.memory_space<vmem>>, vector<1x4x8x8x16xf32>,
    return
  }
  func.func @transform_0(%arg0: i32) -> (i32, i32, i32, i32, i32) {
    %c0_i32 = arith.constant 0 : i32
    %c0_i32_0 = arith.constant 0 : i32
    %c0_i32_1 = arith.constant 0 : i32
    %c0_i32_2 = arith.constant 0 : i32
    %c0_i32_3 = arith.constant 0 : i32
    return %arg0, %c0_i32, %c0_i32_0, %c0_i32_1, %c0_i32_2 : i32, i32, i32, i32, i32
  }
  func.func @transform_1(%arg0: i32) -> (i32, i32) {
    %c0_i32 = arith.constant 0 : i32
    %c0_i32_0 = arith.constant 0 : i32
    %c0_i32_1 = arith.constant 0 : i32
    return %c0_i32, %c0_i32_0 : i32, i32
  }
  func.func @transform_2(%arg0: i32) -> (i32, i32) {
    %c0_i32 = arith.constant 0 : i32
    %c0_i32_0 = arith.constant 0 : i32
    %c0_i32_1 = arith.constant 0 : i32
    return %c0_i32, %c0_i32_0 : i32, i32
  }
  func.func @transform_3(%arg0: i32) -> (i32, i32) {
    %c0_i32 = arith.constant 0 : i32
    %c0_i32_0 = arith.constant 0 : i32
    %c0_i32_1 = arith.constant 0 : i32
    return %c0_i32, %c0_i32_0 : i32, i32
  }
  func.func @transform_4(%arg0: i32) -> (i32, i32) {
    %c0_i32 = arith.constant 0 : i32
    %c0_i32_0 = arith.constant 0 : i32
    %c0_i32_1 = arith.constant 0 : i32
    return %c0_i32, %c0_i32_0 : i32, i32
  }
  func.func @transform_5(%arg0: i32) -> (i32, i32) {
    %c0_i32 = arith.constant 0 : i32
    %c0_i32_0 = arith.constant 0 : i32
    %c0_i32_1 = arith.constant 0 : i32
    return %c0_i32, %c0_i32_0 : i32, i32
  }
  func.func @transform_6(%arg0: i32) -> (i32, i32) {
    %c0_i32 = arith.constant 0 : i32
    %c0_i32_0 = arith.constant 0 : i32
    %c0_i32_1 = arith.constant 0 : i32
    return %c0_i32, %c0_i32_0 : i32, i32
  }
  func.func @transform_7(%arg0: i32) -> (i32, i32) {
    %c0_i32 = arith.constant 0 : i32
    %c0_i32_0 = arith.constant 0 : i32
    %c0_i32_1 = arith.constant 0 : i32
    return %c0_i32, %c0_i32_0 : i32, i32
  }
  func.func @transform_8(%arg0: i32) -> (i32, i32, i32, i32, i32) {
    %c0_i32 = arith.constant 0 : i32
    %c0_i32_0 = arith.constant 0 : i32
    %c0_i32_1 = arith.constant 0 : i32
    %c0_i32_2 = arith.constant 0 : i32
    %c0_i32_3 = arith.constant 0 : i32
    return %arg0, %c0_i32, %c0_i32_0, %c0_i32_1, %c0_i32_2 : i32, i32, i32, i32, i32
  }
}

</mosaic_0001>

<bundles_post_ra>
// kernel: tpu_custom_call.1
= control target key start
LH: loop header
LB: loop body
LE: loop exit
PB: predicated region body
PF: predicated region fallthrough
CT: control target
= control target key end

     0   :  { %13 = vsyncpa [#allocation4], 0  ;;  %s8175_s0 = inlined_call_operand.hbm [shape: f32[2,4,8,8,16], index: 0, kind: input, shape index: {}]   ;;  %s8176_s1 = inlined_call_operand.vmem [shape: f32[8,8], index: 1, kind: input, shape index: {}]   ;;  %s8177_s2 = inlined_call_operand.vmem [shape: f32[1,8], index: 2, kind: input, shape index: {}]   ;;  %s8178_s3 = inlined_call_operand.vmem [shape: f32[27,8], index: 3, kind: input, shape index: {}]   ;;  %s8179_s4 = inlined_call_operand.vmem [shape: f32[1,8], index: 4, kind: input, shape index: {}]   ;;  %s8180_s5 = inlined_call_operand.vmem [shape: f32[8,16], index: 5, kind: input, shape index: {}]   ;;  %s8181_s6 = inlined_call_operand.vmem [shape: f32[8,16], index: 6, kind: input, shape index: {}]   ;;  %s8182_s7 = inlined_call_operand.vmem [shape: f32[1,16], index: 7, kind: input, shape index: {}]   ;;  %s8183_s8 = inlined_call_operand.hbm [shape: f32[2,4,8,8,16], index: 8, kind: output, shape index: {}]  }
   0x1   :  { %15 = vsyncpa [#allocation4 + $0x1], 0 }
   0x2   :  { %16 = vsyncpa [#allocation5], 0 }
   0x3   :  { %18 = vsyncpa [#allocation5 + $0x1], 0  ;;  %s4490_s27 = smov 0   ;;  %s4492_s28 = smov 0  }
   0x4   :  { %s4494_s29 = smov 0   ;;  %s4496_s30 = smov 0  }
   0x5 LB: > { %8482 = sst [smem:[#allocation9_spill]] %s4433_s29  ;;  %s4511_s9 = sadd.s32 4294967295, %s4437_s30   ;;  %s4437_s30 = sphi %s4496_s30, %s9124_s30   ;;  %s4433_s29 = sphi %s4494_s29, %s9121_s29   ;;  %s4429_s28 = sphi %s4492_s28, %s9123_s28   ;;  %s4425_s27 = sphi %s4490_s27, %s9122_s27  }
   0x6   : > { %s4116_s10 = sadd.s32 4294967294, %s4437_s30   ;;  %s4515_s11 = sadd.s32 1, %s4437_s30  }
   0x7   : > { %s31_s12 = sadd.s32 1, %s4433_s29  ;;  %s28_s13 = ssub.s32 %s4437_s30, %s4515_s11 }
   0x8   : > { %p38_p0 = scmp.ne.s32.totalorder %s4433_s29, %s4429_s28  ;;  %p29_p1 = scmp.eq.s32.totalorder %s28_s13, 0 }
   0x9   : > { %p39_p2 = scmp.eq.s32.totalorder %s4437_s30, 0  ;;  %p44_p3 = scmp.ne.s32.totalorder %s4429_s28, %s4425_s27 }
   0xa   : > { %p45_p4 = scmp.eq.s32.totalorder %s4511_s9, 0  ;;  %p215_p7 = scmp.eq.s32.totalorder %s4511_s9, 1 }
   0xb   : > { %s4527_s14 = scalar_select %p29_p1, %s4433_s29, %s31_s12  }
   0xc   : > { %p4529_p5 = por %p39_p2, %p38_p0  ;;  %p4533_p6 = por %p45_p4, %p44_p3 }
   0xd   : > { %8483 = sst [smem:[#allocation10_spill]] %s4527_s14  ;;  %p221_p8 = scmp.eq.s32.totalorder %s4116_s10, 1 }
   0xe   : > { %p4243_p10 = scmp.lt.s32.totalorder %s4437_s30, 2  ;;  %p4540_p11 = por %p215_p7, %p38_p0 }
   0xf   : > { %p4544_p12 = por %p221_p8, %p44_p3  ;;  %s262_s19 = sand.u32 1, %s4433_s29  }
  0x10   : > { %s4226_s20 = sshll.u32 %s4437_s30, 8  ;;  %s4119_s21 = sshll.u32 %s262_s19, 8 }
  0x11   : > { %s271_s24 = scalar_lea.hbm %s8175_s0, %s4226_s20  ;;  %s266_s26 = scalar_lea.vmem [#allocation3], %s4119_s21 }
  0x12   : > { %s272_s25 = sshll.u32 %s271_s24, 4  ;;  %s274_s10 = sshll.u32 %s266_s26, 4  ;;  %s273_s25 = int_to_ptr.hbm [resolvable:$true] %s272_s25  ;;  %s275_s10 = int_to_ptr.vmem [resolvable:$true] %s274_s10 }
  0x13   : > { %p4555_p13 = pnand %p4243_p10, %p4529_p5  ;;  %p4122_p0 = scmp.ge.s32.totalorder %s4437_s30, 1 }
  0x14   : > { %p282_p1 = scmp.lt.s32.totalorder %s4437_s30, 3  ;;  %s263_s13 = scalar_lea.sflag [#allocation4], %s262_s19 }
  0x15   : > { %s4341_s14 = sshra.s32 %s273_s25, 4  ;;  %p4345_p3 = pneg %p4555_p13  ;;  %s4342_s14 = int_to_ptr.hbm [resolvable:$true] %s4341_s14 }
  0x16   : > { %s4343_s29 = scalar_lea.hbm %s4342_s14, 256  ;;  %s4348_s15 = scalar_lea.hbm %s8175_s0, 512 }
  0x17   : > { %p4344_p2 = scmp.ne.s32.totalorder %s4342_s14, %s4343_s29  ;;  %p4349_p5 = scmp.lt.s32.totalorder %s4342_s14, %s8175_s0 }
  0x18   : > { %p4350_p8 = scmp.lt.s32.totalorder %s4348_s15, %s4343_s29 }
  0x19   : > { %p4346_p4 = pnand %p4345_p3, %p4344_p2 }
  0x1a   : > { %p4351_p10 = por %p4350_p8, %p4349_p5 }
  0x1b   : > { %p4347_p7 = pneg %p4346_p4 }
  0x1d   : > { %p4352_p9 = pnand %p4351_p10, %p4347_p7 }
  0x1f   : > { %4355 = shalt.err (!%p4352_p9)
}
  0x20   : > { %s4439_s19 = smov 128   ;;  %s4440_s24 = smov 8  }
  0x21   : > { %4238 = dma.hbm_to_vmem [thread:$0]  (!%p4555_p13), %s273_s25, 4096, %s275_s10, %s263_s13, %s4439_s19, %s4439_s19, %s4440_s24  }
  0x22   : > { %p283_p2 = pnand %p4122_p0, %p282_p1 }
  0x24   : > { %286 = sbr.rel (%p283_p2) target bundleno = 975 (0x3cf), region = 52 }
  0x29   : > { %s4576_s26 = sand.u32 1, %s4429_s28  }
  0x2a   : > { %s4123_s29 = sshll.u32 %s4576_s26, 8  ;;  %s289_s14 = scalar_lea.sflag [#allocation4], %s4576_s26 }
  0x2b   : > { %s4582_s20 = scalar_lea.vmem [#allocation3], %s4123_s29 }
  0x2c   : > { %4416 = dma.done.wait (%p4533_p6), %s289_s14, 4096  }
  0x2d   : > { %4418 = vsyncadd (%p4533_p6), %s289_s14, 4294963200  ;;  %v326_v0 = vld [vmem:[%s4582_s20] sm:$0xff]  ;;  %v328_v1 = vld [vmem:[%s4582_s20 + $0x10] sm:$0xff]  ;;  %s4441_s25 = smov 120   ;;  %vm459_vm0 = vcmask 64512   ;;  %vm670_vm1 = vcmask 58368  }
  0x2e   : > { %395 = vrot.lane.b32.xlu0 %v326_v0, %s4441_s25  ;;  %399 = vrot.lane.b32.xlu1 %v328_v1, %s4441_s25  ;;  %v330_v2 = vld [vmem:[%s4582_s20 + $0x20] sm:$0xff]  ;;  %v327_v4 = vld [vmem:[%s4582_s20 + $0x8] sm:$0xff]  ;;  %v4442_v43 = vmov 0.0   ;;  %vm3994_vm2 = vcmask 130048   ;;  %s7212_s21 = scalar_lea.vmem [#allocation6], %s4123_s29  ;;  %s4391_s15 = scalar_lea.hbm %s8183_s8, 512 }
  0x2f   : > { %403 = vrot.lane.b32.xlu2 %v330_v2, %s4441_s25  ;;  %v358_v3 = vld [vmem:[%s8176_s1] sm:$0xff]  ;;  %v329_v5 = vld [vmem:[%s4582_s20 + $0x18] sm:$0xff]  ;;  %v331_v6 = vld [vmem:[%s4582_s20 + $0x28] sm:$0xff]  ;;  %690 = vst.msk [vmem:[#allocation2 + $0xa0] sm:$0xff] %vm459_vm0, %v4442_v43 }
  0x30   : > { %539 = vmatpush.msra.mxu0 %v358_v3  ;;  %4228 = vmatpush.msra.mxu3 %v358_v3  ;;  %v332_v7 = vld [vmem:[%s4582_s20 + $0x30] sm:$0xff]  ;;  %v333_v8 = vld [vmem:[%s4582_s20 + $0x38] sm:$0xff]  ;;  %v334_v9 = vld [vmem:[%s4582_s20 + $0x40] sm:$0xff]  ;;  %691 = vst.msk [vmem:[#allocation2 + $0xa8] sm:$0x3] %vm670_vm1, %v4442_v43 }
  0x31   : > { %v335_v10 = vld [vmem:[%s4582_s20 + $0x48] sm:$0xff]  ;;  %v336_v11 = vld [vmem:[%s4582_s20 + $0x50] sm:$0xff]  ;;  %v337_v12 = vld [vmem:[%s4582_s20 + $0x58] sm:$0xff]  ;;  %692 = vst.msk [vmem:[#allocation2 + $0xb0] sm:$0xff] %vm459_vm0, %v4442_v43 }
  0x32   : > { %v338_v13 = vld [vmem:[%s4582_s20 + $0x60] sm:$0xff]  ;;  %v339_v14 = vld [vmem:[%s4582_s20 + $0x68] sm:$0xff]  ;;  %v341_v15 = vld [vmem:[%s4582_s20 + $0x78] sm:$0xff]  ;;  %693 = vst.msk [vmem:[#allocation2 + $0xb8] sm:$0x3] %vm670_vm1, %v4442_v43 }
  0x33   : > { %v342_v16 = vld [vmem:[%s4582_s20 + $0x80] sm:$0xff]  ;;  %v340_v17 = vld [vmem:[%s4582_s20 + $0x70] sm:$0xff]  ;;  %v345_v21 = vld [vmem:[%s4582_s20 + $0x98] sm:$0xff]  ;;  %669 = vst.msk [vmem:[#allocation2] sm:$0xff] %vm459_vm0, %v4442_v43 }
  0x34   : > { %v350_v18 = vld [vmem:[%s4582_s20 + $0xc0] sm:$0xff]  ;;  %v344_v19 = vld [vmem:[%s4582_s20 + $0x90] sm:$0xff]  ;;  %v343_v24 = vld [vmem:[%s4582_s20 + $0x88] sm:$0xff]  ;;  %671 = vst.msk [vmem:[#allocation2 + $0x8] sm:$0x3] %vm670_vm1, %v4442_v43 }
  0x35   : > { %v352_v23 = vld [vmem:[%s4582_s20 + $0xd0] sm:$0xff]  ;;  %v353_v26 = vld [vmem:[%s4582_s20 + $0xd8] sm:$0xff]  ;;  %v347_v27 = vld [vmem:[%s4582_s20 + $0xa8] sm:$0xff]  ;;  %672 = vst.msk [vmem:[#allocation2 + $0x10] sm:$0xff] %vm459_vm0, %v4442_v43 }
  0x36   : > { %397 = vrot.lane.b32.xlu0 %v327_v4, %s4441_s25  ;;  %401 = vrot.lane.b32.xlu1 %v329_v5, %s4441_s25  ;;  %v351_v29 = vld [vmem:[%s4582_s20 + $0xc8] sm:$0xff]  ;;  %v348_v30 = vld [vmem:[%s4582_s20 + $0xb0] sm:$0xff]  ;;  %673 = vst.msk [vmem:[#allocation2 + $0x18] sm:$0x3] %vm670_vm1, %v4442_v43  ;;  %v4729_v51 = vld [vmem:[#allocation2 + $0xa0] sm:$0xff] }
  0x37   : > { %405 = vrot.lane.b32.xlu2 %v331_v6, %s4441_s25  ;;  %v355_v32 = vld [vmem:[%s4582_s20 + $0xe8] sm:$0xff]  ;;  %v346_v33 = vld [vmem:[%s4582_s20 + $0xa0] sm:$0xff]  ;;  %v356_v35 = vld [vmem:[%s4582_s20 + $0xf0] sm:$0xff]  ;;  %674 = vst.msk [vmem:[#allocation2 + $0x20] sm:$0xff] %vm459_vm0, %v4442_v43 }
  0x38   : > { %v354_v37 = vld [vmem:[%s4582_s20 + $0xe0] sm:$0xff]  ;;  %v357_v38 = vld [vmem:[%s4582_s20 + $0xf8] sm:$0xff]  ;;  %675 = vst.msk [vmem:[#allocation2 + $0x28] sm:$0x3] %vm670_vm1, %v4442_v43 }
  0x39   : > { %v349_v40 = vld [vmem:[%s4582_s20 + $0xb8] sm:$0xff]  ;;  %676 = vst.msk [vmem:[#allocation2 + $0x30] sm:$0xff] %vm459_vm0, %v4442_v43  ;;  %v4713_v47 = vld [vmem:[%s8178_s3] sm:$0xff] }
  0x3a   : > { %677 = vst.msk [vmem:[#allocation2 + $0x38] sm:$0x3] %vm670_vm1, %v4442_v43  ;;  %v4722_v48 = vperm.slane %v4713_v47, 0  ;;  %v4725_v49 = vperm.slane %v4713_v47, 1  ;;  %v4731_v52 = vld [vmem:[#allocation2 + $0xa1] sm:$0xff]  ;;  %v4740_v55 = vperm.slane %v4713_v47, 2 }
  0x3b   : > { %678 = vst.msk [vmem:[#allocation2 + $0x40] sm:$0xff] %vm459_vm0, %v4442_v43  ;;  %v4744_v56 = vld [vmem:[#allocation2 + $0xa2] sm:$0xff]  ;;  %v4792_v62 = vld [vmem:[%s8177_s2] ss:$0 sm:$0xff]  ;;  %v4824_v3 = vperm.slane %v4713_v47, 3 }
  0x3c   : > { %679 = vst.msk [vmem:[#allocation2 + $0x48] sm:$0x3] %vm670_vm1, %v4442_v43  ;;  %v868_v53 = vmul.f32 %v4722_v48, %v4729_v51  ;;  %v965_v54 = vmul.f32 %v4725_v49, %v4731_v52  ;;  %v1062_v58 = vmul.f32 %v4740_v55, %v4744_v56 }
  0x3d   : > { %680 = vst.msk [vmem:[#allocation2 + $0x50] sm:$0xff] %vm459_vm0, %v4442_v43 }
  0x3e   : > { %407 = vrot.lane.b32.xlu0 %v332_v7, %s4441_s25  ;;  %409 = vrot.lane.b32.xlu1 %v333_v8, %s4441_s25  ;;  %681 = vst.msk [vmem:[#allocation2 + $0x58] sm:$0x3] %vm670_vm1, %v4442_v43  ;;  %v997_v57 = vadd.f32 %v965_v54, %v868_v53 }
  0x3f   : > { %411 = vrot.lane.b32.xlu2 %v334_v9, %s4441_s25  ;;  %682 = vst.msk [vmem:[#allocation2 + $0x60] sm:$0xff] %vm459_vm0, %v4442_v43 }
  0x40   : > { %683 = vst.msk [vmem:[#allocation2 + $0x68] sm:$0x3] %vm670_vm1, %v4442_v43  ;;  %v1094_v59 = vadd.f32 %v1062_v58, %v997_v57 }
  0x41   : > { %684 = vst.msk [vmem:[#allocation2 + $0x70] sm:$0xff] %vm459_vm0, %v4442_v43 }
  0x42   : > { %685 = vst.msk [vmem:[#allocation2 + $0x78] sm:$0x3] %vm670_vm1, %v4442_v43 }
  0x43   : > { %686 = vst.msk [vmem:[#allocation2 + $0x80] sm:$0xff] %vm459_vm0, %v4442_v43 }
  0x44   : > { %687 = vst.msk [vmem:[#allocation2 + $0x88] sm:$0x3] %vm670_vm1, %v4442_v43 }
  0x45   : > { %688 = vst.msk [vmem:[#allocation2 + $0x90] sm:$0xff] %vm459_vm0, %v4442_v43 }
  0x46   : > { %413 = vrot.lane.b32.xlu0 %v335_v10, %s4441_s25  ;;  %415 = vrot.lane.b32.xlu1 %v336_v11, %s4441_s25  ;;  %689 = vst.msk [vmem:[#allocation2 + $0x98] sm:$0x3] %vm670_vm1, %v4442_v43  ;;  %v4843_v10 = vperm.slane %v4713_v47, 4 }
  0x47   : > { %417 = vrot.lane.b32.xlu2 %v337_v12, %s4441_s25  ;;  %8489 = vst [vmem:[#allocation11_spill] sm:$0xff] %v4722_v48 }
  0x48   : > { %8490 = vst [vmem:[#allocation12_spill] sm:$0xff] %v4725_v49 }
  0x49   : > { %694 = vst.msk [vmem:[#allocation2 + $0xc0] sm:$0xff] %vm459_vm0, %v4442_v43 }
  0x4a   : > { %695 = vst.msk [vmem:[#allocation2 + $0xc8] sm:$0x3] %vm670_vm1, %v4442_v43 }
  0x4b   : > { %8491 = vst [vmem:[#allocation13_spill] sm:$0xff] %v4740_v55 }
  0x4c   : > { %696 = vst.msk [vmem:[#allocation2 + $0xd0] sm:$0xff] %vm459_vm0, %v4442_v43 }
  0x4d   : > { %697 = vst.msk [vmem:[#allocation2 + $0xd8] sm:$0x3] %vm670_vm1, %v4442_v43 }
  0x4e   : > { %419 = vrot.lane.b32.xlu0 %v338_v13, %s4441_s25  ;;  %421 = vrot.lane.b32.xlu1 %v339_v14, %s4441_s25  ;;  %698 = vst.msk [vmem:[#allocation2 + $0xe0] sm:$0xff] %vm459_vm0, %v4442_v43 }
  0x4f   : > { %423 = vrot.lane.b32.xlu2 %v340_v17, %s4441_s25  ;;  %699 = vst.msk [vmem:[#allocation2 + $0xe8] sm:$0x3] %vm670_vm1, %v4442_v43  ;;  %v827_v17 = vld [vmem:[#allocation2] sm:$0xff] }
  0x50   : > { %700 = vst.msk [vmem:[#allocation2 + $0xf0] sm:$0xff] %vm459_vm0, %v4442_v43 }
  0x51   : > { %701 = vst.msk [vmem:[#allocation2 + $0xf8] sm:$0x3] %vm670_vm1, %v4442_v43 }
  0x52   : > { %702 = vst.msk [vmem:[#allocation2 + $0x100] sm:$0xff] %vm459_vm0, %v4442_v43 }
  0x53   : > { %703 = vst.msk [vmem:[#allocation2 + $0x108] sm:$0x3] %vm670_vm1, %v4442_v43 }
  0x54   : > { %704 = vst.msk [vmem:[#allocation2 + $0x110] sm:$0xff] %vm459_vm0, %v4442_v43 }
  0x55   : > { %705 = vst.msk [vmem:[#allocation2 + $0x118] sm:$0x3] %vm670_vm1, %v4442_v43 }
  0x56   : > { %425 = vrot.lane.b32.xlu0 %v341_v15, %s4441_s25  ;;  %427 = vrot.lane.b32.xlu1 %v342_v16, %s4441_s25  ;;  %706 = vst.msk [vmem:[#allocation2 + $0x120] sm:$0xff] %vm459_vm0, %v4442_v43 }
  0x57   : > { %429 = vrot.lane.b32.xlu2 %v343_v24, %s4441_s25  ;;  %707 = vst.msk [vmem:[#allocation2 + $0x128] sm:$0x3] %vm670_vm1, %v4442_v43  ;;  %v1119_v24 = vld [vmem:[#allocation2 + $0x10] sm:$0xff] }
  0x58   : > { %708 = vst.msk [vmem:[#allocation2 + $0x130] sm:$0xff] %vm459_vm0, %v4442_v43 }
  0x59   : > { %709 = vst.msk [vmem:[#allocation2 + $0x138] sm:$0x3] %vm670_vm1, %v4442_v43 }
  0x5a   : > { %710 = vst.msk [vmem:[#allocation2 + $0x140] sm:$0xff] %vm459_vm0, %v4442_v43 }
  0x5b   : > { %711 = vst.msk [vmem:[#allocation2 + $0x148] sm:$0x3] %vm670_vm1, %v4442_v43 }
  0x5c   : > { %712 = vst.msk [vmem:[#allocation2 + $0x150] sm:$0xff] %vm459_vm0, %v4442_v43 }
  0x5d   : > { %713 = vst.msk [vmem:[#allocation2 + $0x158] sm:$0x3] %vm670_vm1, %v4442_v43 }
  0x5e   : > { %443 = vrot.lane.b32.xlu0 %v350_v18, %s4441_s25  ;;  %431 = vrot.lane.b32.xlu1 %v344_v19, %s4441_s25  ;;  %714 = vst.msk [vmem:[#allocation2 + $0x160] sm:$0xff] %vm459_vm0, %v4442_v43  ;;  %v924_v18 = vld [vmem:[#allocation2 + $0x1] sm:$0xff]  ;;  %v860_v19 = vmul.f32 %v4722_v48, %v827_v17 }
  0x5f   : > { %445 = vrot.lane.b32.xlu2 %v351_v29, %s4441_s25  ;;  %715 = vst.msk [vmem:[#allocation2 + $0x168] sm:$0x3] %vm670_vm1, %v4442_v43 }
  0x60   : > { %716 = vst.msk [vmem:[#allocation2 + $0x170] sm:$0xff] %vm459_vm0, %v4442_v43 }
  0x61   : > { %717 = vst.msk [vmem:[#allocation2 + $0x178] sm:$0x3] %vm670_vm1, %v4442_v43 }
  0x62   : > { %718 = vst.msk [vmem:[#allocation2 + $0x180] sm:$0xff] %vm459_vm0, %v4442_v43 }
  0x63   : > { %719 = vst.msk [vmem:[#allocation2 + $0x188] sm:$0x3] %vm670_vm1, %v4442_v43 }
  0x64   : > { %720 = vst.msk [vmem:[#allocation2 + $0x190] sm:$0xff] %vm459_vm0, %v4442_v43 }
  0x65   : > { %721 = vst.msk [vmem:[#allocation2 + $0x198] sm:$0x3] %vm670_vm1, %v4442_v43 }
  0x66   : > { %433 = vrot.lane.b32.xlu0 %v345_v21, %s4441_s25  ;;  %447 = vrot.lane.b32.xlu1 %v352_v23, %s4441_s25  ;;  %722 = vst.msk [vmem:[#allocation2 + $0x1a0] sm:$0xff] %vm459_vm0, %v4442_v43  ;;  %v1021_v21 = vld [vmem:[#allocation2 + $0x2] sm:$0xff] }
  0x67   : > { %435 = vrot.lane.b32.xlu2 %v346_v33, %s4441_s25  ;;  %723 = vst.msk [vmem:[#allocation2 + $0x1a8] sm:$0x3] %vm670_vm1, %v4442_v43  ;;  %v1054_v23 = vmul.f32 %v4740_v55, %v1021_v21 }
  0x68   : > { %724 = vst.msk [vmem:[#allocation2 + $0x1b0] sm:$0xff] %vm459_vm0, %v4442_v43 }
  0x69   : > { %725 = vst.msk [vmem:[#allocation2 + $0x1b8] sm:$0x3] %vm670_vm1, %v4442_v43 }
  0x6a   : > { %726 = vst.msk [vmem:[#allocation2 + $0x1c0] sm:$0xff] %vm459_vm0, %v4442_v43 }
  0x6b   : > { %727 = vst.msk [vmem:[#allocation2 + $0x1c8] sm:$0x3] %vm670_vm1, %v4442_v43 }
  0x6c   : > { %728 = vst.msk [vmem:[#allocation2 + $0x1d0] sm:$0xff] %vm459_vm0, %v4442_v43 }
  0x6d   : > { %8492 = vst [vmem:[#allocation14_spill] sm:$0xff] %v4824_v3 }
  0x6e   : > { %449 = vrot.lane.b32.xlu0 %v353_v26, %s4441_s25  ;;  %437 = vrot.lane.b32.xlu1 %v347_v27, %s4441_s25  ;;  %729 = vst.msk [vmem:[#allocation2 + $0x1d8] sm:$0x3] %vm670_vm1, %v4442_v43  ;;  %v1152_v26 = vmul.f32 %v4824_v3, %v1119_v24  ;;  %v1216_v27 = vld [vmem:[#allocation2 + $0x11] sm:$0xff] }
  0x6f   : > { %451 = vrot.lane.b32.xlu2 %v354_v37, %s4441_s25  ;;  %730 = vst.msk [vmem:[#allocation2 + $0x1e0] sm:$0xff] %vm459_vm0, %v4442_v43  ;;  %v1411_v37 = vld [vmem:[#allocation2 + $0x20] sm:$0xff] }
  0x70   : > { %8493 = vst [vmem:[#allocation15_spill] sm:$0xff] %v4843_v10 }
  0x71   : > { %731 = vst.msk [vmem:[#allocation2 + $0x1e8] sm:$0x3] %vm670_vm1, %v4442_v43 }
  0x72   : > { %732 = vst.msk [vmem:[#allocation2 + $0x1f0] sm:$0xff] %vm459_vm0, %v4442_v43 }
  0x73   : > { %733 = vst.msk [vmem:[#allocation2 + $0x1f8] sm:$0x3] %vm670_vm1, %v4442_v43 }
  0x74   : > { %734 = vst.msk [vmem:[#allocation2 + $0x200] sm:$0xff] %vm459_vm0, %v4442_v43 }
  0x75   : > { %735 = vst.msk [vmem:[#allocation2 + $0x208] sm:$0x3] %vm670_vm1, %v4442_v43 }
  0x76   : > { %439 = vrot.lane.b32.xlu0 %v348_v30, %s4441_s25  ;;  %453 = vrot.lane.b32.xlu1 %v355_v32, %s4441_s25  ;;  %736 = vst.msk [vmem:[#allocation2 + $0x210] sm:$0xff] %vm459_vm0, %v4442_v43  ;;  %v1249_v30 = vmul.f32 %v4843_v10, %v1216_v27  ;;  %v1313_v32 = vld [vmem:[#allocation2 + $0x12] sm:$0xff] }
  0x77   : > { %441 = vrot.lane.b32.xlu2 %v349_v40, %s4441_s25  ;;  %737 = vst.msk [vmem:[#allocation2 + $0x218] sm:$0x3] %vm670_vm1, %v4442_v43  ;;  %v1055_v53 = vmul.f32 %v1313_v32, %v4740_v55 }
  0x78   : > { %738 = vst.msk [vmem:[#allocation2 + $0x220] sm:$0xff] %vm459_vm0, %v4442_v43 }
  0x79   : > { %739 = vst.msk [vmem:[#allocation2 + $0x228] sm:$0x3] %vm670_vm1, %v4442_v43 }
  0x7a   : > { %740 = vst.msk [vmem:[#allocation2 + $0x230] sm:$0xff] %vm459_vm0, %v4442_v43 }
  0x7b   : > { %741 = vst.msk [vmem:[#allocation2 + $0x238] sm:$0x3] %vm670_vm1, %v4442_v43 }
  0x7c   : > { %742 = vst.msk [vmem:[#allocation2 + $0x240] sm:$0xff] %vm459_vm0, %v4442_v43 }
  0x7d   : > { %743 = vst.msk [vmem:[#allocation2 + $0x248] sm:$0x3] %vm670_vm1, %v4442_v43 }
  0x7e   : > { %455 = vrot.lane.b32.xlu0 %v356_v35, %s4441_s25  ;;  %457 = vrot.lane.b32.xlu1 %v357_v38, %s4441_s25  ;;  %744 = vst.msk [vmem:[#allocation2 + $0x250] sm:$0xff] %vm459_vm0, %v4442_v43  ;;  %v4917_v35 = vperm.slane %v4713_v47, 6  ;;  %s4040_s25 = sshll.u32 %s7212_s21, 4  ;;  %s4041_s25 = int_to_ptr.vmem [resolvable:$true] %s4040_s25 }
  0x7f   : > { %745 = vst.msk [vmem:[#allocation2 + $0x258] sm:$0x3] %vm670_vm1, %v4442_v43 }
  0x80   : > { %746 = vst.msk [vmem:[#allocation2 + $0x260] sm:$0xff] %vm459_vm0, %v4442_v43  ;;  %v1444_v40 = vmul.f32 %v4917_v35, %v1411_v37 }
  0x81   : > { %747 = vst.msk [vmem:[#allocation2 + $0x268] sm:$0x3] %vm670_vm1, %v4442_v43 }
  0x82   : > { %748 = vst.msk [vmem:[#allocation2 + $0x270] sm:$0xff] %vm459_vm0, %v4442_v43 }
  0x83   : > { %749 = vst.msk [vmem:[#allocation2 + $0x278] sm:$0x3] %vm670_vm1, %v4442_v43 }
  0x84   : > { %750 = vst.msk [vmem:[#allocation2 + $0x280] sm:$0xff] %vm459_vm0, %v4442_v43 }
  0x85   : > { %751 = vst.msk [vmem:[#allocation2 + $0x288] sm:$0x3] %vm670_vm1, %v4442_v43 }
  0x86   : > { %752 = vst.msk [vmem:[#allocation2 + $0x290] sm:$0xff] %vm459_vm0, %v4442_v43 }
  0x87   : > { %753 = vst.msk [vmem:[#allocation2 + $0x298] sm:$0x3] %vm670_vm1, %v4442_v43 }
  0x88   : > { %754 = vst.msk [vmem:[#allocation2 + $0x2a0] sm:$0xff] %vm459_vm0, %v4442_v43 }
  0x89   : > { %v404_v31 = vpop.permute.xlu2 %403  ;;  %755 = vst.msk [vmem:[#allocation2 + $0x2a8] sm:$0x3] %vm670_vm1, %v4442_v43 }
  0x8a   : > { %756 = vst.msk [vmem:[#allocation2 + $0x2b0] sm:$0xff] %vm459_vm0, %v4442_v43 }
  0x8b   : > { %8496 = vst [vmem:[#allocation18_spill] sm:$0xff] %v4917_v35 }
  0x8c   : > { %757 = vst.msk [vmem:[#allocation2 + $0x2b8] sm:$0x3] %vm670_vm1, %v4442_v43 }
  0x8d   : > { %758 = vst.msk [vmem:[#allocation2 + $0x2c0] sm:$0xff] %vm459_vm0, %v4442_v43 }
  0x8e   : > { %759 = vst.msk [vmem:[#allocation2 + $0x2c8] sm:$0x3] %vm670_vm1, %v4442_v43 }
  0x8f   : > { %760 = vst.msk [vmem:[#allocation2 + $0x2d0] sm:$0xff] %vm459_vm0, %v4442_v43 }
  0x90   : > { %761 = vst.msk [vmem:[#allocation2 + $0x2d8] sm:$0x3] %vm670_vm1, %v4442_v43 }
  0x91   : > { %v406_v34 = vpop.permute.xlu2 %405  ;;  %762 = vst.msk [vmem:[#allocation2 + $0x2e0] sm:$0xff] %vm459_vm0, %v4442_v43 }
  0x92   : > { %763 = vst.msk [vmem:[#allocation2 + $0x2e8] sm:$0x3] %vm670_vm1, %v4442_v43 }
  0x93   : > { %764 = vst.msk [vmem:[#allocation2 + $0x2f0] sm:$0xff] %vm459_vm0, %v4442_v43 }
  0x94   : > { %765 = vst.msk [vmem:[#allocation2 + $0x2f8] sm:$0x3] %vm670_vm1, %v4442_v43 }
  0x95   : > { %766 = vst.msk [vmem:[#allocation2 + $0x300] sm:$0xff] %vm459_vm0, %v4442_v43 }
  0x96   : > { %767 = vst.msk [vmem:[#allocation2 + $0x308] sm:$0x3] %vm670_vm1, %v4442_v43 }
  0x97   : > { %768 = vst.msk [vmem:[#allocation2 + $0x310] sm:$0xff] %vm459_vm0, %v4442_v43 }
  0x98   : > { %769 = vst.msk [vmem:[#allocation2 + $0x318] sm:$0x3] %vm670_vm1, %v4442_v43 }
  0x99   : > { %v412_v41 = vpop.permute.xlu2 %411  ;;  %770 = vst.msk [vmem:[#allocation2 + $0x320] sm:$0xff] %vm459_vm0, %v4442_v43 }
  0x9a   : > { %771 = vst.msk [vmem:[#allocation2 + $0x328] sm:$0x3] %vm670_vm1, %v4442_v43 }
  0x9b   : > { %772 = vst.msk [vmem:[#allocation2 + $0x330] sm:$0xff] %vm459_vm0, %v4442_v43 }
  0x9c   : > { %773 = vst.msk [vmem:[#allocation2 + $0x338] sm:$0x3] %vm670_vm1, %v4442_v43 }
  0x9d   : > { %774 = vst.msk [vmem:[#allocation2 + $0x340] sm:$0xff] %vm459_vm0, %v4442_v43 }
  0x9e   : > { %775 = vst.msk [vmem:[#allocation2 + $0x348] sm:$0x3] %vm670_vm1, %v4442_v43 }
  0x9f   : > { %776 = vst.msk [vmem:[#allocation2 + $0x350] sm:$0xff] %vm459_vm0, %v4442_v43 }
  0xa0   : > { %v396_v20 = vpop.permute.xlu0 %395  ;;  %v400_v25 = vpop.permute.xlu1 %399  ;;  %777 = vst.msk [vmem:[#allocation2 + $0x358] sm:$0x3] %vm670_vm1, %v4442_v43 }
  0xa1   : > { %4125 = vmatmul.msk.f32.vlgmr.msra.gmra.mxu0 %vm459_vm0, %v396_v20  ;;  %v418_v45 = vpop.permute.xlu2 %417  ;;  %v957_v20 = vmul.f32 %v4725_v49, %v924_v18  ;;  %v862_v18 = vmul.f32 %v1411_v37, %v4722_v48  ;;  %778 = vst.msk [vmem:[#allocation2 + $0x360] sm:$0xff] %vm459_vm0, %v4442_v43 }
  0xa2   : > { %779 = vst.msk [vmem:[#allocation2 + $0x368] sm:$0x3] %vm670_vm1, %v4442_v43 }
  0xa3   : > { %780 = vst.msk [vmem:[#allocation2 + $0x370] sm:$0xff] %vm459_vm0, %v4442_v43 }
  0xa4   : > { %781 = vst.msk [vmem:[#allocation2 + $0x378] sm:$0x3] %vm670_vm1, %v4442_v43 }
  0xa5   : > { %782 = vst.msk [vmem:[#allocation2 + $0x380] sm:$0xff] %vm459_vm0, %v4442_v43 }
  0xa6   : > { %783 = vst.msk [vmem:[#allocation2 + $0x388] sm:$0x3] %vm670_vm1, %v4442_v43 }
  0xa7   : > { %784 = vst.msk [vmem:[#allocation2 + $0x390] sm:$0xff] %vm459_vm0, %v4442_v43 }
  0xa8   : > { %v398_v22 = vpop.permute.xlu0 %397  ;;  %v402_v28 = vpop.permute.xlu1 %401  ;;  %785 = vst.msk [vmem:[#allocation2 + $0x398] sm:$0x3] %vm670_vm1, %v4442_v43 }
  0xa9   : > { %4126 = vmatmul.msk.f32.gmra.mxu0 %vm459_vm0, %v398_v22  ;;  %v424_v60 = vpop.permute.xlu2 %423  ;;  %v989_v22 = vadd.f32 %v957_v20, %v860_v19  ;;  %786 = vst.msk [vmem:[#allocation2 + $0x3a0] sm:$0xff] %vm459_vm0, %v4442_v43 }
  0xaa   : > { %787 = vst.msk [vmem:[#allocation2 + $0x3a8] sm:$0x3] %vm670_vm1, %v4442_v43 }
  0xab   : > { %788 = vst.msk [vmem:[#allocation2 + $0x3b0] sm:$0xff] %vm459_vm0, %v4442_v43 }
  0xac   : > { %789 = vst.msk [vmem:[#allocation2 + $0x3b8] sm:$0x3] %vm670_vm1, %v4442_v43 }
  0xb0   : > { %v408_v36 = vpop.permute.xlu0 %407  ;;  %v410_v39 = vpop.permute.xlu1 %409 }
  0xb1   : > { %4127 = vmatmul.msk.f32.gmra.mxu0 %vm459_vm0, %v400_v25  ;;  %v1086_v25 = vadd.f32 %v1054_v23, %v989_v22 }
  0xb3   : > { %v1184_v29 = vadd.f32 %v1152_v26, %v1086_v25  ;;  %v5001_v25 = vld [vmem:[#allocation2 + $0x30] sm:$0xff] }
  0xb5   : > { %v1281_v33 = vadd.f32 %v1249_v30, %v1184_v29 }
  0xb8   : > { %v414_v42 = vpop.permute.xlu0 %413  ;;  %v416_v44 = vpop.permute.xlu1 %415 }
  0xb9   : > { %4128 = vmatmul.msk.f32.gmra.mxu0 %vm459_vm0, %v402_v28  ;;  %v4898_v28 = vperm.slane %v4713_v47, 5 }
  0xbb   : > { %8495 = vst [vmem:[#allocation17_spill] sm:$0xff] %v4898_v28 }
  0xc0   : > { %v420_v46 = vpop.permute.xlu0 %419  ;;  %v422_v50 = vpop.permute.xlu1 %421 }
  0xc1   : > { %4129 = vmatmul.msk.f32.gmra.mxu0 %vm459_vm0, %v404_v31 }
  0xc8   : > { %v426_v61 = vpop.permute.xlu0 %425  ;;  %v428_v0 = vpop.permute.xlu1 %427 }
  0xc9   : > { %4130 = vmatmul.msk.f32.gmra.mxu0 %vm459_vm0, %v406_v34  ;;  %v1346_v34 = vmul.f32 %v4898_v28, %v1313_v32  ;;  %v1445_v32 = vmul.f32 %v4917_v35, %v5001_v25 }
  0xcb   : > { %v1378_v38 = vadd.f32 %v1346_v34, %v1281_v33 }
  0xcd   : > { %v1476_v57 = vadd.f32 %v1444_v40, %v1378_v38 }
  0xd0   : > { %v432_v54 = vpop.permute.xlu1 %431 }
  0xd1   : > { %4131 = vmatmul.msk.f32.gmra.mxu0 %vm459_vm0, %v408_v36  ;;  %v430_v36 = vpop.permute.xlu2 %429 }
  0xd8   : > { %v448_v21 = vpop.permute.xlu1 %447 }
  0xd9   : > { %4132 = vmatmul.msk.f32.gmra.mxu0 %vm459_vm0, %v410_v39  ;;  %v444_v39 = vpop.permute.xlu0 %443 }
  0xda   : > { %4149 = vmatmul.msk.f32.vlgmr.msra.gmra.mxu3 %vm459_vm0, %v444_v39  ;;  %v1154_v39 = vmul.f32 %v5001_v25, %v4824_v3 }
  0xe1   : > { %4133 = vmatmul.msk.f32.gmra.mxu0 %vm459_vm0, %v412_v41  ;;  %v4930_v41 = vperm.slane %v4713_v47, 7 }
  0xe3   : > { %8497 = vst [vmem:[#allocation19_spill] sm:$0xff] %v4930_v41 }
  0xe9   : > { %4134 = vmatmul.msk.f32.gmra.mxu0 %vm459_vm0, %v414_v42  ;;  %v861_v42 = vmul.f32 %v1119_v24, %v4722_v48 }
  0xf1   : > { %4135 = vmatmul.msk.f32.gmra.mxu0 %vm459_vm0, %v416_v44  ;;  %v958_v44 = vmul.f32 %v1216_v27, %v4725_v49 }
  0xf9   : > { %4136 = vmatmul.msk.f32.gmra.mxu0 %vm459_vm0, %v418_v45  ;;  %v4940_v45 = vld [vmem:[%s8178_s3 + $0x8] sm:$0xff] }
  0xfa   : > { %v4982_v17 = vperm.slane %v4940_v45, 2  ;;  %v4999_v24 = vperm.slane %v4940_v45, 3 }
  0xfc   : > { %8500 = vst [vmem:[#allocation22_spill] sm:$0xff] %v4982_v17  ;;  %v1833_v23 = vmul.f32 %v4982_v17, %v4731_v52  ;;  %v1930_v34 = vmul.f32 %v4999_v24, %v4744_v56 }
  0xfd   : > { %8501 = vst [vmem:[#allocation23_spill] sm:$0xff] %v4999_v24 }
 0x101   : > { %4137 = vmatmul.msk.f32.gmra.mxu0 %vm459_vm0, %v420_v46  ;;  %v1508_v46 = vld [vmem:[#allocation2 + $0x21] sm:$0xff] }
 0x102   : > { %v1541_v58 = vmul.f32 %v4930_v41, %v1508_v46  ;;  %v959_v19 = vmul.f32 %v1508_v46, %v4725_v49 }
 0x104   : > { %v991_v26 = vadd.f32 %v959_v19, %v862_v18 }
 0x109   : > { %4138 = vmatmul.msk.f32.gmra.mxu0 %vm459_vm0, %v422_v50  ;;  %v990_v50 = vadd.f32 %v958_v44, %v861_v42 }
 0x111   : > { %4139 = vmatmul.msk.f32.gmra.mxu0 %vm459_vm0, %v424_v60  ;;  %v1605_v60 = vld [vmem:[#allocation2 + $0x22] sm:$0xff] }
 0x112   : > { %v1056_v27 = vmul.f32 %v1605_v60, %v4740_v55 }
 0x114   : > { %v1088_v38 = vadd.f32 %v1056_v27, %v991_v26 }
 0x119   : > { %4140 = vmatmul.msk.f32.gmra.mxu0 %vm459_vm0, %v426_v61  ;;  %v1087_v61 = vadd.f32 %v1055_v53, %v990_v50 }
 0x11e   : > { %v541_v63 = vpop.f32.mrf.mxu0 }
 0x11f   : > { %v542_v1 = vadd.f32 %v4792_v62, %v541_v63  ;;  %v1153_v63 = vmul.f32 %v1411_v37, %v4824_v3  ;;  %v5020_v37 = vld [vmem:[#allocation2 + $0x31] sm:$0xff] }
 0x121   : > { %v637_v2 = vmax.f32 %v542_v1, 0.0  ;;  %4141 = vmatmul.msk.f32.gmra.mxu0 %vm459_vm0, %v428_v0  ;;  %v446_v0 = vpop.permute.xlu2 %445  ;;  %v1573_v1 = vadd.f32 %v1541_v58, %v1476_v57  ;;  %v1186_v57 = vadd.f32 %v1154_v39, %v1088_v38  ;;  %v1251_v58 = vmul.f32 %v5020_v37, %v4843_v10 }
 0x122   : > { %4150 = vmatmul.msk.f32.gmra.mxu3 %vm459_vm0, %v446_v0 }
 0x123   : > { %791 = vst.msk [vmem:[#allocation2 + $0xb1] sm:$0xff] %vm459_vm0, %v637_v2 }
 0x126   : > { %v4905_v31 = vpop.f32.mrf.mxu0 }
 0x127   : > { %v545_v56 = vadd.f32 %v4792_v62, %v4905_v31 }
 0x129   : > { %4142 = vmatmul.msk.f32.gmra.mxu0 %vm459_vm0, %v430_v36  ;;  %v436_v52 = vpop.permute.xlu2 %435  ;;  %v5018_v36 = vperm.slane %v4940_v45, 4 }
 0x12a   : > { %v4828_v4 = vld [vmem:[#allocation2 + $0xb0] sm:$0xff]  ;;  %4151 = vmatmul.msk.f32.gmra.mxu3 %vm459_vm0, %v448_v21  ;;  %v5071_v21 = vperm.slane %v4940_v45, 6 }
 0x12b   : > { %v4830_v5 = vld [vmem:[#allocation2 + $0xb1] sm:$0xff]  ;;  %v869_v7 = vmul.f32 %v4722_v48, %v4828_v4  ;;  %v1160_v9 = vmul.f32 %v4824_v3, %v4828_v4  ;;  %8502 = vst [vmem:[#allocation24_spill] sm:$0xff] %v5018_v36  ;;  %v2027_v31 = vmul.f32 %v5018_v36, %v4828_v4  ;;  %v5053_v4 = vperm.slane %v4940_v45, 5 }
 0x12c   : > { %v4832_v6 = vld [vmem:[#allocation2 + $0xb2] sm:$0xff]  ;;  %v966_v8 = vmul.f32 %v4725_v49, %v4830_v5  ;;  %v1257_v14 = vmul.f32 %v4843_v10, %v4830_v5  ;;  %8505 = vst [vmem:[#allocation27_spill] sm:$0xff] %v5071_v21 }
 0x12d   : > { %v1063_v12 = vmul.f32 %v4740_v55, %v4832_v6  ;;  %v1192_v13 = vadd.f32 %v1160_v9, %v1094_v59  ;;  %v4953_v59 = vperm.slane %v4940_v45, 0  ;;  %v1185_v9 = vadd.f32 %v1153_v63, %v1087_v61  ;;  %v438_v63 = vpop.permute.xlu1 %437  ;;  %8504 = vst [vmem:[#allocation26_spill] sm:$0xff] %v5053_v4  ;;  %v1898_v39 = vld [vmem:[#allocation2 + $0xb2] sm:$0xff] }
 0x12e   : > { %v998_v11 = vadd.f32 %v966_v8, %v869_v7  ;;  %v4944_v47 = vpop.f32.mrf.mxu0  ;;  %v4967_v7 = vperm.slane %v4940_v45, 1 }
 0x12f   : > { %v4859_v16 = vadd.f32 %v1257_v14, %v1192_v13  ;;  %8498 = vst [vmem:[#allocation20_spill] sm:$0xff] %v4953_v59  ;;  %v1638_v2 = vmul.f32 %v4953_v59, %v1605_v60  ;;  %v548_v42 = vadd.f32 %v4792_v62, %v4944_v47 }
 0x130   : > { %v4857_v15 = vadd.f32 %v1063_v12, %v998_v11  ;;  %8499 = vst [vmem:[#allocation21_spill] sm:$0xff] %v4967_v7  ;;  %v1250_v11 = vmul.f32 %v1508_v46, %v4843_v10  ;;  %v434_v12 = vpop.permute.xlu0 %433  ;;  %v1736_v14 = vmul.f32 %v4967_v7, %v4729_v51  ;;  %v1347_v51 = vmul.f32 %v1605_v60, %v4898_v28 }
 0x131   : > { %8494 = vst [vmem:[#allocation16_spill] sm:$0xff] %v4859_v16  ;;  %4143 = vmatmul.msk.f32.gmra.mxu0 %vm459_vm0, %v432_v54  ;;  %v1670_v13 = vadd.f32 %v1638_v2, %v1573_v1  ;;  %v1542_v46 = vmul.f32 %v4930_v41, %v5020_v37  ;;  %v5042_v54 = vld [vmem:[#allocation2 + $0x32] sm:$0xff]  ;;  %v638_v60 = vmax.f32 %v545_v56, 0.0  ;;  %v639_v0 = vmax.f32 %v548_v42, 0.0 }
 0x132   : > { %v1282_v20 = vadd.f32 %v1250_v11, %v1185_v9  ;;  %8503 = vst [vmem:[#allocation25_spill] sm:$0xff] %v5042_v54  ;;  %v1348_v18 = vmul.f32 %v5042_v54, %v4898_v28  ;;  %v5090_v56 = vmul.f32 %v4898_v28, %v4832_v6  ;;  %v5095_v42 = vperm.slane %v4940_v45, 7 }
 0x133   : > { %v1768_v22 = vadd.f32 %v1736_v14, %v1670_v13  ;;  %v1283_v14 = vadd.f32 %v1251_v58, %v1186_v57  ;;  %792 = vst.msk [vmem:[#allocation2 + $0xc1] sm:$0xff] %vm459_vm0, %v638_v60 }
 0x134   : > { %v1379_v30 = vadd.f32 %v1347_v51, %v1282_v20  ;;  %v452_v20 = vpop.permute.xlu2 %451  ;;  %v2124_v51 = vmul.f32 %v5053_v4, %v4830_v5  ;;  %793 = vst.msk [vmem:[#allocation2 + $0xd1] sm:$0xff] %vm459_vm0, %v639_v0 }
 0x135   : > { %v1865_v33 = vadd.f32 %v1833_v23, %v1768_v22  ;;  %v5073_v22 = vld [vmem:[#allocation2 + $0x40] sm:$0xff]  ;;  %v1380_v27 = vadd.f32 %v1348_v18, %v1283_v14  ;;  %8508 = vst [vmem:[#allocation30_spill] sm:$0xff] %v5090_v56  ;;  %v454_v0 = vpop.permute.xlu1 %453 }
 0x136   : > { %v550_v8 = vpop.f32.mrf.mxu0  ;;  %v1477_v44 = vadd.f32 %v1445_v32, %v1379_v30  ;;  %8506 = vst [vmem:[#allocation28_spill] sm:$0xff] %v5073_v22  ;;  %v1446_v5 = vmul.f32 %v4917_v35, %v5073_v22  ;;  %v2221_v30 = vmul.f32 %v5071_v21, %v4832_v6  ;;  %v1801_v32 = vld [vmem:[#allocation2 + $0xb1] sm:$0xff] }
 0x137   : > { %v551_v50 = vadd.f32 %v4792_v62, %v550_v8  ;;  %v1962_v53 = vadd.f32 %v1930_v34, %v1865_v33  ;;  %v1639_v8 = vmul.f32 %v4953_v59, %v5042_v54  ;;  %v5085_v33 = vld [vmem:[#allocation2 + $0x41] sm:$0xff]  ;;  %8509 = vst [vmem:[#allocation31_spill] sm:$0xff] %v5095_v42 }
 0x138   : > { %v450_v40 = vpop.permute.xlu0 %449  ;;  %v1574_v2 = vadd.f32 %v1542_v46, %v1477_v44  ;;  %8507 = vst [vmem:[#allocation29_spill] sm:$0xff] %v5085_v33  ;;  %v5097_v44 = vld [vmem:[#allocation2 + $0x42] sm:$0xff]  ;;  %v1478_v6 = vadd.f32 %v1446_v5, %v1380_v27  ;;  %v1543_v57 = vmul.f32 %v4930_v41, %v5085_v33 }
 0x139   : > { %4144 = vmatmul.msk.f32.gmra.mxu0 %vm459_vm0, %v434_v12  ;;  %4152 = vmatmul.msk.f32.gmra.mxu3 %vm459_vm0, %v450_v40  ;;  %v640_v9 = vmax.f32 %v551_v50, 0.0  ;;  %v2059_v11 = vadd.f32 %v2027_v31, %v1962_v53  ;;  %v1704_v12 = vld [vmem:[#allocation2 + $0xb0] sm:$0xff]  ;;  %8510 = vst [vmem:[#allocation32_spill] sm:$0xff] %v5097_v44  ;;  %v1640_v14 = vmul.f32 %v4953_v59, %v5097_v44 }
 0x13a   : > { %v1671_v43 = vadd.f32 %v1639_v8, %v1574_v2  ;;  %v1737_v23 = vmul.f32 %v4967_v7, %v1704_v12  ;;  %v5099_v46 = vld [vmem:[#allocation2 + $0xc0] sm:$0xff]  ;;  %v1931_v2 = vmul.f32 %v4999_v24, %v1898_v39 }
 0x13b   : > { %794 = vst.msk [vmem:[#allocation2 + $0xe1] sm:$0xff] %vm459_vm0, %v640_v9  ;;  %v2156_v26 = vadd.f32 %v2124_v51, %v2059_v11  ;;  %v5101_v50 = vld [vmem:[#allocation2 + $0xc1] sm:$0xff]  ;;  %v870_v45 = vmul.f32 %v4722_v48, %v5099_v46  ;;  %v1161_v60 = vmul.f32 %v4824_v3, %v5099_v46  ;;  %v5127_v9 = vld [vmem:[#allocation2 + $0xd2] sm:$0xff] }
 0x13c   : > { %v1769_v38 = vadd.f32 %v1737_v23, %v1671_v43  ;;  %v5103_v53 = vld [vmem:[#allocation2 + $0xc2] sm:$0xff]  ;;  %v967_v58 = vmul.f32 %v4725_v49, %v5101_v50  ;;  %v442_v39 = vpop.permute.xlu2 %441 }
 0x13d   : > { %v5092_v40 = vadd.f32 %v2221_v30, %v2156_v26  ;;  %v843_v26 = vld [vmem:[#allocation2 + $0x140] sm:$0xff]  ;;  %v1065_v30 = vmul.f32 %v4740_v55, %v5127_v9 }
 0x13e   : > { %v553_v29 = vpop.f32.mrf.mxu0  ;;  %v999_v18 = vadd.f32 %v967_v58, %v870_v45 }
 0x13f   : > { %v554_v47 = vadd.f32 %v4792_v62, %v553_v29 }
 0x141   : > { %4145 = vmatmul.msk.f32.gmra.mxu0 %vm459_vm0, %v436_v52  ;;  %v641_v13 = vmax.f32 %v554_v47, 0.0  ;;  %4153 = vmatmul.msk.f32.gmra.mxu3 %vm459_vm0, %v452_v20  ;;  %v440_v52 = vpop.permute.xlu0 %439  ;;  %v1834_v47 = vmul.f32 %v4982_v17, %v1801_v32  ;;  %v1193_v20 = vadd.f32 %v1161_v60, %v4857_v15 }
 0x142   : > { %v5129_v11 = vld [vmem:[#allocation2 + $0xe0] sm:$0xff] }
 0x143   : > { %795 = vst.msk [vmem:[#allocation2 + $0xf1] sm:$0xff] %vm459_vm0, %v641_v13  ;;  %v1866_v13 = vadd.f32 %v1834_v47, %v1769_v38  ;;  %v5142_v43 = vld [vmem:[#allocation2 + $0xe1] sm:$0xff]  ;;  %v872_v32 = vmul.f32 %v4722_v48, %v5129_v11  ;;  %v1163_v45 = vmul.f32 %v4824_v3, %v5129_v11 }
 0x144   : > { %8511 = vst [vmem:[#allocation33_spill] sm:$0xff] %v5129_v11  ;;  %v969_v47 = vmul.f32 %v4725_v49, %v5142_v43  ;;  %v1260_v44 = vmul.f32 %v4843_v10, %v5142_v43 }
 0x145   : > { %8513 = vst [vmem:[#allocation35_spill] sm:$0xff] %v5142_v43 }
 0x146   : > { %v556_v61 = vpop.f32.mrf.mxu0 }
 0x147   : > { %v557_v1 = vadd.f32 %v4792_v62, %v556_v61  ;;  %v5115_v61 = vld [vmem:[#allocation2 + $0xd0] sm:$0xff] }
 0x148   : > { %v871_v8 = vmul.f32 %v4722_v48, %v5115_v61  ;;  %v1162_v23 = vmul.f32 %v4824_v3, %v5115_v61 }
 0x149   : > { %4146 = vmatmul.msk.f32.gmra.mxu0 %vm459_vm0, %v438_v63  ;;  %v642_v19 = vmax.f32 %v557_v1, 0.0  ;;  %v5117_v63 = vld [vmem:[#allocation2 + $0xd1] sm:$0xff]  ;;  %4154 = vmatmul.msk.f32.gmra.mxu3 %vm459_vm0, %v454_v0 }
 0x14a   : > { %v5122_v1 = vld [vmem:[%s8178_s3 + $0x10] sm:$0xff]  ;;  %v968_v51 = vmul.f32 %v4725_v49, %v5117_v63 }
 0x14b   : > { %796 = vst.msk [vmem:[#allocation2 + $0x101] sm:$0xff] %vm459_vm0, %v642_v19  ;;  %v5133_v12 = vperm.slane %v5122_v1, 2  ;;  %v1064_v19 = vmul.f32 %v4740_v55, %v5103_v53  ;;  %v5148_v27 = vperm.slane %v5122_v1, 3  ;;  %v5151_v5 = vperm.slane %v5122_v1, 4  ;;  %v840_v56 = vld [vmem:[#allocation2 + $0xf0] sm:$0xff] }
 0x14c   : > { %v1000_v15 = vadd.f32 %v968_v51, %v871_v8  ;;  %v5167_v58 = vperm.slane %v5122_v1, 1  ;;  %v937_v16 = vld [vmem:[#allocation2 + $0xf1] sm:$0xff] }
 0x14d   : > { %8512 = vst [vmem:[#allocation34_spill] sm:$0xff] %v5133_v12  ;;  %v5170_v8 = vmul.f32 %v5133_v12, %v843_v26 }
 0x14e   : > { %v559_v29 = vpop.f32.mrf.mxu0  ;;  %8514 = vst [vmem:[#allocation36_spill] sm:$0xff] %v5148_v27  ;;  %v1097_v60 = vadd.f32 %v1065_v30, %v1000_v15 }
 0x14f   : > { %v560_v34 = vadd.f32 %v4792_v62, %v559_v29  ;;  %8515 = vst [vmem:[#allocation37_spill] sm:$0xff] %v5151_v5  ;;  %v1575_v29 = vadd.f32 %v1543_v57, %v1478_v6  ;;  %v1037_v6 = vld [vmem:[#allocation2 + $0x142] sm:$0xff]  ;;  %v5164_v57 = vperm.slane %v5122_v1, 0 }
 0x150   : > { %8518 = vst [vmem:[#allocation40_spill] sm:$0xff] %v5167_v58  ;;  %v1195_v15 = vadd.f32 %v1163_v45, %v1097_v60  ;;  %v1258_v45 = vmul.f32 %v4843_v10, %v5101_v50  ;;  %v970_v60 = vmul.f32 %v4725_v49, %v937_v16 }
 0x151   : > { %v643_v31 = vmax.f32 %v560_v34, 0.0  ;;  %4147 = vmatmul.msk.f32.gmra.mxu0 %vm459_vm0, %v440_v52  ;;  %v1096_v52 = vadd.f32 %v1064_v19, %v999_v18  ;;  %v5157_v34 = vld [vmem:[#allocation2 + $0xe2] sm:$0xff]  ;;  %8517 = vst [vmem:[#allocation39_spill] sm:$0xff] %v5164_v57  ;;  %v5172_v18 = vadd.f32 %v1931_v2, %v1866_v13  ;;  %v1001_v19 = vadd.f32 %v969_v47, %v872_v32 }
 0x152   : > { %8516 = vst [vmem:[#allocation38_spill] sm:$0xff] %v5157_v34  ;;  %v1066_v51 = vmul.f32 %v4740_v55, %v5157_v34  ;;  %v5180_v41 = vadd.f32 %v1640_v14, %v1575_v29  ;;  %v5187_v2 = vmul.f32 %v5001_v25, %v4722_v48  ;;  %v5191_v13 = vmul.f32 %v5020_v37, %v4725_v49  ;;  %v5193_v32 = vld [vmem:[#allocation2 + $0x100] sm:$0xff] }
 0x153   : > { %797 = vst.msk [vmem:[#allocation2 + $0x111] sm:$0xff] %vm459_vm0, %v643_v31  ;;  %v940_v31 = vld [vmem:[#allocation2 + $0x141] sm:$0xff]  ;;  %v1194_v0 = vadd.f32 %v1162_v23, %v1096_v52  ;;  %v456_v23 = vpop.permute.xlu0 %455  ;;  %v5183_v52 = vmul.f32 %v5151_v5, %v1037_v6  ;;  %v876_v14 = vmul.f32 %v4722_v48, %v843_v26  ;;  %v1070_v47 = vmul.f32 %v4740_v55, %v1037_v6 }
 0x154   : > { %v5178_v59 = vmul.f32 %v5148_v27, %v940_v31  ;;  %8519 = vst [vmem:[#allocation41_spill] sm:$0xff] %v5187_v2  ;;  %v1098_v30 = vadd.f32 %v1066_v51, %v1001_v19  ;;  %v973_v29 = vmul.f32 %v4725_v49, %v940_v31  ;;  %v5202_v25 = vmul.f32 %v4898_v28, %v5103_v53  ;;  %v1034_v19 = vld [vmem:[#allocation2 + $0xf2] sm:$0xff]  ;;  %v1035_v22 = vld [vmem:[#allocation2 + $0x102] sm:$0xff] }
 0x155   : > { %8520 = vst [vmem:[#allocation42_spill] sm:$0xff] %v5191_v13  ;;  %v873_v37 = vmul.f32 %v4722_v48, %v840_v56  ;;  %v5208_v51 = vmul.f32 %v4917_v35, %v5099_v46  ;;  %v1259_v26 = vmul.f32 %v4843_v10, %v5117_v63  ;;  %v5214_v31 = vmul.f32 %v4898_v28, %v5127_v9 }
 0x156   : > { %v562_v38 = vpop.f32.mrf.mxu0  ;;  %8521 = vst [vmem:[#allocation43_spill] sm:$0xff] %v5202_v25  ;;  %v5218_v6 = vmul.f32 %v4917_v35, %v5115_v61  ;;  %4155 = vmatmul.msk.f32.gmra.mxu3 %vm459_vm0, %v456_v23  ;;  %v5221_v25 = vadd.f32 %v1258_v45, %v1193_v20  ;;  %v5236_v20 = vmul.f32 %v4917_v35, %v5129_v11 }
 0x157   : > { %8522 = vst [vmem:[#allocation44_spill] sm:$0xff] %v5208_v51  ;;  %v874_v51 = vmul.f32 %v4722_v48, %v5193_v32  ;;  %v5228_v13 = vadd.f32 %v1259_v26, %v1194_v0  ;;  %v1067_v23 = vmul.f32 %v4740_v55, %v1034_v19  ;;  %v1002_v45 = vadd.f32 %v970_v60, %v873_v37 }
 0x158   : > { %8523 = vst [vmem:[#allocation45_spill] sm:$0xff] %v5214_v31  ;;  %v5232_v31 = vmul.f32 %v4898_v28, %v5157_v34  ;;  %v5242_v2 = vmul.f32 %v4898_v28, %v1034_v19  ;;  %v563_v34 = vadd.f32 %v4792_v62, %v562_v38  ;;  %v1005_v43 = vadd.f32 %v973_v29, %v876_v14 }
 0x159   : > { %4148 = vmatmul.msk.f32.gmra.mxu0 %vm459_vm0, %v442_v39  ;;  %v938_v39 = vld [vmem:[#allocation2 + $0x101] sm:$0xff]  ;;  %8524 = vst [vmem:[#allocation46_spill] sm:$0xff] %v5218_v6  ;;  %v1164_v6 = vmul.f32 %v4824_v3, %v840_v56  ;;  %v2319_v19 = vmul.f32 %v5095_v42, %v5099_v46  ;;  %v1099_v14 = vadd.f32 %v1067_v23, %v1002_v45 }
 0x15a   : > { %8525 = vst [vmem:[#allocation47_spill] sm:$0xff] %v5221_v25  ;;  %v971_v33 = vmul.f32 %v4725_v49, %v938_v39  ;;  %v1261_v25 = vmul.f32 %v4843_v10, %v937_v16  ;;  %v842_v0 = vld [vmem:[#allocation2 + $0x110] sm:$0xff]  ;;  %v458_v16 = vpop.permute.xlu1 %457  ;;  %v644_v11 = vmax.f32 %v563_v34, 0.0  ;;  %v5257_v27 = vadd.f32 %v1070_v47, %v1005_v43 }
 0x15b   : > { %8526 = vst [vmem:[#allocation48_spill] sm:$0xff] %v5228_v13  ;;  %v939_v26 = vld [vmem:[#allocation2 + $0x111] sm:$0xff]  ;;  %v5245_v13 = vmul.f32 %v4917_v35, %v840_v56  ;;  %v2351_v38 = vadd.f32 %v2319_v19, %v5092_v40  ;;  %v2028_v29 = vmul.f32 %v5018_v36, %v5099_v46  ;;  %v2513_v40 = vmul.f32 %v5167_v58, %v5103_v53  ;;  %v3489_v46 = vld [vmem:[%s8180_s5] sm:$0xff] }
 0x15c   : > { %8527 = vst [vmem:[#allocation49_spill] sm:$0xff] %v5232_v31  ;;  %v1068_v31 = vmul.f32 %v4740_v55, %v1035_v22  ;;  %v1003_v37 = vadd.f32 %v971_v33, %v874_v51  ;;  %v972_v56 = vmul.f32 %v4725_v49, %v939_v26  ;;  %v5262_v33 = vadd.f32 %v1260_v44, %v1195_v15  ;;  %v1036_v23 = vld [vmem:[#allocation2 + $0x112] sm:$0xff] }
 0x15d   : > { %8528 = vst [vmem:[#allocation50_spill] sm:$0xff] %v5236_v20  ;;  %v1165_v20 = vmul.f32 %v4824_v3, %v5193_v32  ;;  %v1196_v51 = vadd.f32 %v1164_v6, %v1098_v30  ;;  %v1262_v15 = vmul.f32 %v4843_v10, %v938_v39  ;;  %v2060_v30 = vadd.f32 %v2028_v29, %v5172_v18 }
 0x15e   : > { %v565_v54 = vpop.f32.mrf.mxu0  ;;  %8529 = vst [vmem:[#allocation51_spill] sm:$0xff] %v5242_v2  ;;  %v875_v2 = vmul.f32 %v4722_v48, %v842_v0  ;;  %4156 = vmatmul.msk.f32.gmra.mxu3 %vm459_vm0, %v458_v16  ;;  %v1100_v34 = vadd.f32 %v1068_v31, %v1003_v37  ;;  %3779 = vmatpush.msra.mxu2 %v3489_v46 }
 0x15f   : > { %8530 = vst [vmem:[#allocation52_spill] sm:$0xff] %v5245_v13  ;;  %v566_v60 = vadd.f32 %v4792_v62, %v565_v54  ;;  %v1166_v13 = vmul.f32 %v4824_v3, %v842_v0  ;;  %v2416_v54 = vmul.f32 %v5164_v57, %v5101_v50  ;;  %v1197_v44 = vadd.f32 %v1165_v20, %v1099_v14 }
 0x160   : > { %8531 = vst [vmem:[#allocation53_spill] sm:$0xff] %v5262_v33  ;;  %v1004_v31 = vadd.f32 %v972_v56, %v875_v2  ;;  %v5281_v39 = vmul.f32 %v4898_v28, %v1035_v22  ;;  %v5285_v45 = vmul.f32 %v4917_v35, %v5193_v32  ;;  %v2125_v16 = vmul.f32 %v5053_v4, %v5101_v50 }
 0x161   : > { %v645_v5 = vmax.f32 %v566_v60, 0.0  ;;  %798 = vst.msk [vmem:[#allocation2 + $0x121] sm:$0xff] %vm459_vm0, %v644_v11  ;;  %v2448_v47 = vadd.f32 %v2416_v54, %v2351_v38  ;;  %v1198_v6 = vadd.f32 %v1166_v13, %v1100_v34  ;;  %v4286_v60 = vld [vmem:[%s4582_s20] sm:$0xff]  ;;  %v5291_v18 = vadd.f32 %v1261_v25, %v1196_v51 }
 0x162   : > { %8532 = vst [vmem:[#allocation54_spill] sm:$0xff] %v5281_v39  ;;  %4189 = vmatmul.msk.f32.vlgmr.msra.gmra.mxu2 %vm459_vm0, %v4286_v60  ;;  %v1069_v2 = vmul.f32 %v4740_v55, %v1036_v23  ;;  %v1263_v13 = vmul.f32 %v4843_v10, %v939_v26  ;;  %v5296_v19 = vadd.f32 %v1262_v15, %v1197_v44  ;;  %v826_v15 = vld [vmem:[%s8178_s3 + $0x18] sm:$0x7]  ;;  %v4287_v60 = vld [vmem:[%s4582_s20 + $0x8] sm:$0xff] }
 0x163   : > { %799 = vst.msk [vmem:[#allocation2 + $0x151] sm:$0xff] %vm459_vm0, %v645_v5  ;;  %v3490_v5 = vld [vmem:[%s8181_s6] sm:$0xff]  ;;  %v2545_v20 = vadd.f32 %v2513_v40, %v2448_v47  ;;  %v5299_v32 = vmul.f32 %v4898_v28, %v1036_v23  ;;  %v5302_v56 = vmul.f32 %v4917_v35, %v842_v0  ;;  %v2157_v50 = vadd.f32 %v2125_v16, %v2060_v30  ;;  %v8547_v39 = vld [vmem:[#allocation36_spill] sm:$0xff] }
 0x164   : > { %3602 = vmatpush.msra.mxu1 %v3490_v5  ;;  %8533 = vst [vmem:[#allocation55_spill] sm:$0xff] %v5285_v45  ;;  %4229 = vmatpush.msrb.mxu3 %v3490_v5  ;;  %v5305_v25 = vadd.f32 %v1069_v2, %v1004_v31  ;;  %v5307_v38 = vadd.f32 %v1263_v13, %v1198_v6  ;;  %v5318_v0 = vperm.slane %v5122_v1, 6 }
 0x165   : > { %8534 = vst [vmem:[#allocation56_spill] sm:$0xff] %v5291_v18  ;;  %v2643_v22 = vadd.f32 %v5170_v8, %v2545_v20  ;;  %v5311_v8 = vperm.slane %v5122_v1, 5  ;;  %v2222_v51 = vmul.f32 %v5071_v21, %v5103_v53  ;;  %v2320_v34 = vmul.f32 %v5095_v42, %v5115_v61  ;;  %v1705_v61 = vld [vmem:[#allocation2 + $0xc0] sm:$0xff] }
 0x166   : > { %v568_v43 = vpop.f32.mrf.mxu0  ;;  %4230 = vmatpush.msra.mxu3 %v3489_v46  ;;  %8535 = vst [vmem:[#allocation57_spill] sm:$0xff] %v5296_v19  ;;  %v5334_v53 = vperm.slane %v5122_v1, 7  ;;  %v1738_v16 = vmul.f32 %v4967_v7, %v1705_v61 }
 0x167   : > { %v569_v11 = vadd.f32 %v4792_v62, %v568_v43  ;;  %8536 = vst [vmem:[#allocation58_spill] sm:$0xff] %v5299_v32  ;;  %v2740_v26 = vadd.f32 %v5178_v59, %v2643_v22  ;;  %v2417_v59 = vmul.f32 %v5164_v57, %v5117_v63  ;;  %v2254_v46 = vadd.f32 %v2222_v51, %v2157_v50 }
 0x168   : > { %8537 = vst [vmem:[#allocation59_spill] sm:$0xff] %v5302_v56 }
 0x169   : > { %v646_v37 = vmax.f32 %v569_v11, 0.0  ;;  %8538 = vst [vmem:[#allocation60_spill] sm:$0xff] %v5307_v38  ;;  %v2837_v31 = vadd.f32 %v5183_v52, %v2740_v26  ;;  %v2352_v26 = vadd.f32 %v2320_v34, %v2254_v46  ;;  %v5372_v34 = vperm.slane %v826_v15, 2  ;;  %v1134_v46 = vld [vmem:[#allocation2 + $0x120] sm:$0xff] }
 0x16a   : > { %v844_v54 = vld [vmem:[#allocation2 + $0x150] sm:$0xff]  ;;  %8539 = vst [vmem:[#allocation61_spill] sm:$0xff] %v5318_v0  ;;  %4190 = vmatmul.msk.f32.gmra.mxu2 %vm459_vm0, %v4287_v60 }
 0x16b   : > { %800 = vst.msk [vmem:[#allocation2 + $0x161] sm:$0xff] %vm459_vm0, %v646_v37  ;;  %v5313_v14 = vld [vmem:[#allocation2 + $0x151] sm:$0xff]  ;;  %v877_v43 = vmul.f32 %v4722_v48, %v844_v54  ;;  %v1168_v40 = vmul.f32 %v4824_v3, %v844_v54  ;;  %v2903_v6 = vmul.f32 %v5311_v8, %v844_v54  ;;  %v5346_v37 = vperm.slane %v826_v15, 0 }
 0x16c   : > { %v5315_v29 = vld [vmem:[#allocation2 + $0x152] sm:$0xff]  ;;  %v974_v47 = vmul.f32 %v4725_v49, %v5313_v14  ;;  %8540 = vst [vmem:[#allocation62_spill] sm:$0xff] %v5334_v53  ;;  %v1265_v23 = vmul.f32 %v4843_v10, %v5313_v14  ;;  %v3000_v1 = vmul.f32 %v5318_v0, %v5313_v14  ;;  %v2612_v60 = vmul.f32 %v5133_v12, %v844_v54 }
 0x16d   : > { %v1071_v63 = vmul.f32 %v4740_v55, %v5315_v29  ;;  %v1200_v30 = vadd.f32 %v1168_v40, %v5257_v27  ;;  %8541 = vst [vmem:[#allocation63_spill] sm:$0xff] %v5346_v37  ;;  %v2935_v50 = vadd.f32 %v2903_v6, %v2837_v31  ;;  %v2514_v40 = vmul.f32 %v5167_v58, %v5127_v9 }
 0x16e   : > { %v571_v44 = vpop.f32.mrf.mxu0  ;;  %v1006_v5 = vadd.f32 %v974_v47, %v877_v43  ;;  %v3097_v61 = vmul.f32 %v5334_v53, %v5315_v29  ;;  %8544 = vst [vmem:[#allocation66_spill] sm:$0xff] %v5372_v34  ;;  %v2709_v19 = vmul.f32 %v8547_v39, %v5313_v14 }
 0x16f   : > { %v572_v11 = vadd.f32 %v4792_v62, %v571_v44  ;;  %v5351_v13 = vadd.f32 %v1265_v23, %v1200_v30  ;;  %v3032_v44 = vadd.f32 %v3000_v1, %v2935_v50  ;;  %v1802_v23 = vld [vmem:[#allocation2 + $0xc1] sm:$0xff]  ;;  %v2449_v1 = vadd.f32 %v2417_v59, %v2352_v26  ;;  %v5382_v50 = vld [vmem:[#allocation2 + $0xd0] sm:$0xff] }
 0x170   : > { %v1103_v2 = vadd.f32 %v1071_v63, %v1006_v5  ;;  %v5370_v63 = vperm.slane %v826_v15, 1  ;;  %v1770_v15 = vadd.f32 %v1738_v16, %v5180_v41  ;;  %v1167_v59 = vmul.f32 %v4824_v3, %v1134_v46 }
 0x171   : > { %v647_v20 = vmax.f32 %v572_v11, 0.0  ;;  %8542 = vst [vmem:[#allocation64_spill] sm:$0xff] %v5351_v13  ;;  %v1899_v11 = vld [vmem:[#allocation2 + $0xc2] sm:$0xff]  ;;  %v5384_v13 = vld [vmem:[#allocation2 + $0xd1] sm:$0xff]  ;;  %v2546_v41 = vadd.f32 %v2514_v40, %v2449_v1 }
 0x172   : > { %v5353_v22 = vld [vmem:[#allocation2 + $0x160] sm:$0xff]  ;;  %8543 = vst [vmem:[#allocation65_spill] sm:$0xff] %v5370_v63  ;;  %v1932_v32 = vmul.f32 %v4999_v24, %v1899_v11  ;;  %v2126_v11 = vmul.f32 %v5053_v4, %v5384_v13 }
 0x173   : > { %v5355_v27 = vld [vmem:[#allocation2 + $0x161] sm:$0xff]  ;;  %v878_v51 = vmul.f32 %v4722_v48, %v5353_v22  ;;  %v1169_v47 = vmul.f32 %v4824_v3, %v5353_v22  ;;  %801 = vst.msk [vmem:[#allocation2 + $0x171] sm:$0xff] %vm459_vm0, %v647_v20  ;;  %v3195_v9 = vmul.f32 %v5346_v37, %v5353_v22  ;;  %v3129_v20 = vadd.f32 %v3097_v61, %v3032_v44  ;;  %v5397_v44 = vld [vmem:[%s8179_s4] ss:$0 sm:$0xff]  ;;  %v4288_v61 = vld [vmem:[%s4582_s20 + $0x10] sm:$0xff] }
 0x174   : > { %v5357_v52 = vld [vmem:[#allocation2 + $0x162] sm:$0xff]  ;;  %v975_v43 = vmul.f32 %v4725_v49, %v5355_v27  ;;  %v3292_v54 = vmul.f32 %v5370_v63, %v5355_v27  ;;  %8546 = vst [vmem:[#allocation68_spill] sm:$0xff] %v5397_v44  ;;  %4191 = vmatmul.msk.f32.gmra.mxu2 %vm459_vm0, %v4288_v61  ;;  %v2644_v1 = vadd.f32 %v2612_v60, %v2546_v41  ;;  %v8548_v60 = vld [vmem:[#allocation37_spill] sm:$0xff] }
 0x175   : > { %v1072_v30 = vmul.f32 %v4740_v55, %v5357_v52  ;;  %v5376_v31 = vadd.f32 %v1169_v47, %v1103_v2  ;;  %v1835_v47 = vmul.f32 %v4982_v17, %v1802_v23  ;;  %v3227_v26 = vadd.f32 %v3195_v9, %v3129_v20  ;;  %v1328_v41 = vld [vmem:[#allocation2 + $0x122] sm:$0xff] }
 0x176   : > { %v1007_v5 = vadd.f32 %v975_v43, %v878_v51  ;;  %v574_v6 = vpop.f32.mrf.mxu0  ;;  %v5386_v51 = vld [vmem:[#allocation2 + $0xd2] sm:$0xff]  ;;  %v2029_v23 = vmul.f32 %v5018_v36, %v5382_v50  ;;  %v3389_v20 = vmul.f32 %v5372_v34, %v5357_v52 }
 0x177   : > { %8545 = vst [vmem:[#allocation67_spill] sm:$0xff] %v5386_v51  ;;  %v575_v2 = vadd.f32 %v4792_v62, %v574_v6  ;;  %v3324_v6 = vadd.f32 %v3292_v54, %v3227_v26  ;;  %v1199_v26 = vadd.f32 %v1167_v59, %v5305_v25  ;;  %v1231_v54 = vld [vmem:[#allocation2 + $0x121] sm:$0xff]  ;;  %v8549_v59 = vld [vmem:[#allocation33_spill] sm:$0xff] }
 0x178   : > { %v1104_v43 = vadd.f32 %v1072_v30, %v1007_v5  ;;  %v2223_v5 = vmul.f32 %v5071_v21, %v5386_v51  ;;  %v1264_v51 = vmul.f32 %v4843_v10, %v1231_v54  ;;  %v3001_v54 = vmul.f32 %v5318_v0, %v5355_v27 }
 0x179   : > { %v648_v16 = vmax.f32 %v575_v2, 0.0  ;;  %v1867_v2 = vadd.f32 %v1835_v47, %v1770_v15  ;;  %v3421_v45 = vadd.f32 %v3389_v20, %v3324_v6  ;;  %v2806_v15 = vmul.f32 %v8548_v60, %v5315_v29  ;;  %v8550_v20 = vld [vmem:[#allocation35_spill] sm:$0xff] }
 0x17a   : > { %v5407_v30 = vld [vmem:[#allocation2 + $0x170] sm:$0xff]  ;;  %v2904_v47 = vmul.f32 %v5311_v8, %v5353_v22  ;;  %v2321_v6 = vmul.f32 %v5095_v42, %v8549_v59  ;;  %v2418_v36 = vmul.f32 %v5164_v57, %v8550_v20  ;;  %v3098_v59 = vmul.f32 %v5334_v53, %v5357_v52 }
 0x17b   : > { %v5409_v40 = vld [vmem:[#allocation2 + $0x171] sm:$0xff]  ;;  %v879_v61 = vmul.f32 %v4722_v48, %v5407_v30  ;;  %v1170_v56 = vmul.f32 %v4824_v3, %v5407_v30  ;;  %802 = vst.msk [vmem:[#allocation2 + $0x181] sm:$0xff] %vm459_vm0, %v648_v16  ;;  %v2741_v16 = vadd.f32 %v2709_v19, %v2644_v1  ;;  %v3457_v14 = vadd.f32 %v5397_v44, %v3421_v45 }
 0x17c   : > { %v5411_v9 = vld [vmem:[#allocation2 + $0x172] sm:$0xff]  ;;  %v976_v38 = vmul.f32 %v4725_v49, %v5409_v40  ;;  %v1964_v25 = vadd.f32 %v1932_v32, %v1867_v2  ;;  %v5444_v45 = vmul.f32 %v4917_v35, %v1134_v46  ;;  %v5451_v1 = vadd.f32 %v1264_v51, %v1199_v26 }
 0x17d   : > { %v1073_v33 = vmul.f32 %v4740_v55, %v5411_v9  ;;  %v5431_v21 = vadd.f32 %v1170_v56, %v1104_v43  ;;  %v2838_v24 = vadd.f32 %v2806_v15, %v2741_v16  ;;  %v5441_v56 = vmul.f32 %v4898_v28, %v1328_v41  ;;  %4157 = vmatmul.msk.f32.vlgmr.msra.gmra.mxu1 %vm459_vm0, %v3457_v14  ;;  %v8553_v32 = vld [vmem:[#allocation38_spill] sm:$0xff]  ;;  %v8556_v26 = vld [vmem:[#allocation41_spill] sm:$0xff] }
 0x17e   : > { %v1008_v18 = vadd.f32 %v976_v38, %v879_v61  ;;  %v577_v4 = vpop.f32.mrf.mxu0  ;;  %8552 = vst [vmem:[#allocation35_spill] sm:$0xff] %v5444_v45  ;;  %v2061_v19 = vadd.f32 %v2029_v23, %v1964_v25  ;;  %v5449_v43 = vmul.f32 %v5167_v58, %v8553_v32  ;;  %v8557_v15 = vld [vmem:[#allocation42_spill] sm:$0xff]  ;;  %v3196_v20 = vmul.f32 %v5346_v37, %v5407_v30 }
 0x17f   : > { %v578_v61 = vadd.f32 %v4792_v62, %v577_v4  ;;  %8551 = vst [vmem:[#allocation33_spill] sm:$0xff] %v5441_v56  ;;  %v2936_v4 = vadd.f32 %v2904_v47, %v2838_v24  ;;  %v992_v41 = vadd.f32 %v8557_v15, %v8556_v26  ;;  %v1266_v24 = vmul.f32 %v4843_v10, %v5355_v27  ;;  %v5559_v58 = vld [vmem:[#allocation2 + $0x52] sm:$0xff] }
 0x180   : > { %v1105_v38 = vadd.f32 %v1073_v33, %v1008_v18  ;;  %8554 = vst [vmem:[#allocation38_spill] sm:$0xff] %v5451_v1  ;;  %v5455_v33 = vmul.f32 %v4898_v28, %v5315_v29  ;;  %v4289_v18 = vld [vmem:[%s4582_s20 + $0x18] sm:$0xff]  ;;  %v2158_v51 = vadd.f32 %v2126_v11, %v2061_v19  ;;  %v8558_v29 = vld [vmem:[#allocation25_spill] sm:$0xff] }
 0x181   : > { %v649_v62 = vmax.f32 %v578_v61, 0.0  ;;  %4192 = vmatmul.msk.f32.gmra.mxu2 %vm459_vm0, %v4289_v18  ;;  %v1057_v16 = vmul.f32 %v8558_v29, %v4740_v55  ;;  %v3033_v11 = vadd.f32 %v3001_v54, %v2936_v4  ;;  %v8559_v61 = vld [vmem:[#allocation28_spill] sm:$0xff]  ;;  %v5515_v1 = vld [vmem:[#allocation2 + $0x50] sm:$0xff] }
 0x182   : > { %8555 = vst [vmem:[#allocation69_spill] sm:$0xff] %v5455_v33  ;;  %v5459_v46 = vld [vmem:[#allocation2 + $0x180] sm:$0xff]  ;;  %v1155_v19 = vmul.f32 %v8559_v61, %v4824_v3  ;;  %v2255_v15 = vadd.f32 %v2223_v5, %v2158_v51  ;;  %v8561_v33 = vld [vmem:[#allocation29_spill] sm:$0xff] }
 0x183   : > { %v5461_v2 = vld [vmem:[#allocation2 + $0x181] sm:$0xff]  ;;  %v880_v47 = vmul.f32 %v4722_v48, %v5459_v46  ;;  %v1171_v25 = vmul.f32 %v4824_v3, %v5459_v46  ;;  %803 = vst.msk [vmem:[#allocation2 + $0x191] sm:$0xff] %vm459_vm0, %v649_v62  ;;  %v5492_v62 = vmul.f32 %v4898_v28, %v5357_v52  ;;  %v3130_v4 = vadd.f32 %v3098_v59, %v3033_v11  ;;  %v5503_v5 = vld [vmem:[%s8177_s2] ss:$0 sm:$0xff] }
 0x184   : > { %v5463_v23 = vld [vmem:[#allocation2 + $0x182] sm:$0xff]  ;;  %v977_v14 = vmul.f32 %v4725_v49, %v5461_v2  ;;  %v1089_v29 = vadd.f32 %v1057_v16, %v992_v41  ;;  %v1252_v56 = vmul.f32 %v8561_v33, %v4843_v10  ;;  %v2353_v51 = vadd.f32 %v2321_v6, %v2255_v15 }
 0x185   : > { %v1074_v18 = vmul.f32 %v4740_v55, %v5463_v23  ;;  %v5488_v26 = vadd.f32 %v1171_v25, %v1105_v38  ;;  %8560 = vst [vmem:[#allocation41_spill] sm:$0xff] %v5492_v62  ;;  %v5507_v25 = vadd.f32 %v1266_v24, %v5376_v31  ;;  %v3228_v41 = vadd.f32 %v3196_v20, %v3130_v4 }
 0x186   : > { %v1009_v32 = vadd.f32 %v977_v14, %v880_v47  ;;  %v580_v54 = vpop.f32.mrf.mxu0  ;;  %v5498_v47 = vmul.f32 %v4917_v35, %v5353_v22  ;;  %v3293_v16 = vmul.f32 %v5370_v63, %v5409_v40  ;;  %v1187_v11 = vadd.f32 %v1155_v19, %v1089_v29 }
 0x187   : > { %v581_v38 = vadd.f32 %v5503_v5, %v580_v54  ;;  %8563 = vst [vmem:[#allocation25_spill] sm:$0xff] %v5507_v25  ;;  %v2450_v62 = vadd.f32 %v2418_v36, %v2353_v51  ;;  %v4291_v54 = vld [vmem:[%s4582_s20 + $0x20] sm:$0xff]  ;;  %v3390_v36 = vmul.f32 %v5372_v34, %v5411_v9  ;;  %v1267_v15 = vmul.f32 %v4843_v10, %v5409_v40  ;;  %v5538_v51 = vld [vmem:[#allocation2 + $0x51] sm:$0xff] }
 0x188   : > { %8562 = vst [vmem:[#allocation42_spill] sm:$0xff] %v5498_v47  ;;  %v1106_v14 = vadd.f32 %v1074_v18, %v1009_v32  ;;  %v2613_v32 = vmul.f32 %v5133_v12, %v5353_v22  ;;  %v8564_v18 = vld [vmem:[#allocation32_spill] sm:$0xff]  ;;  %v3325_v20 = vadd.f32 %v3293_v16, %v3228_v41  ;;  %v2710_v22 = vmul.f32 %v8547_v39, %v5355_v27 }
 0x189   : > { %v650_v59 = vmax.f32 %v581_v38, 0.0  ;;  %v1349_v47 = vmul.f32 %v8564_v18, %v4898_v28  ;;  %4193 = vmatmul.msk.f32.gmra.mxu2 %vm459_vm0, %v4291_v54  ;;  %v1284_v19 = vadd.f32 %v1252_v56, %v1187_v11  ;;  %v5542_v27 = vmul.f32 %v4898_v28, %v5411_v9 }
 0x18a   : > { %v5519_v31 = vld [vmem:[#allocation2 + $0x190] sm:$0xff]  ;;  %v3422_v41 = vadd.f32 %v3390_v36, %v3325_v20  ;;  %v1447_v16 = vmul.f32 %v4917_v35, %v5515_v1  ;;  %v2547_v25 = vadd.f32 %v5449_v43, %v2450_v62  ;;  %v5554_v39 = vmul.f32 %v4917_v35, %v5407_v30  ;;  %v8568_v20 = vld [vmem:[#allocation19_spill] sm:$0xff] }
 0x18b   : > { %v5521_v6 = vld [vmem:[#allocation2 + $0x191] sm:$0xff]  ;;  %v881_v4 = vmul.f32 %v4722_v48, %v5519_v31  ;;  %v1172_v38 = vmul.f32 %v4824_v3, %v5519_v31  ;;  %804 = vst.msk [vmem:[#allocation2 + $0x1a1] sm:$0xff] %vm459_vm0, %v650_v59  ;;  %v1381_v45 = vadd.f32 %v1349_v47, %v1284_v19  ;;  %v5550_v59 = vadd.f32 %v1267_v15, %v5431_v21 }
 0x18c   : > { %v5523_v24 = vld [vmem:[#allocation2 + $0x192] sm:$0xff]  ;;  %v978_v29 = vmul.f32 %v4725_v49, %v5521_v6  ;;  %8565 = vst [vmem:[#allocation28_spill] sm:$0xff] %v5542_v27  ;;  %v3458_v27 = vadd.f32 %v5397_v44, %v3422_v41  ;;  %v1544_v36 = vmul.f32 %v8568_v20, %v5538_v51  ;;  %v2807_v43 = vmul.f32 %v8548_v60, %v5357_v52  ;;  %v8569_v52 = vld [vmem:[#allocation20_spill] sm:$0xff] }
 0x18d   : > { %v1075_v56 = vmul.f32 %v4740_v55, %v5523_v24  ;;  %v1204_v54 = vadd.f32 %v1172_v38, %v1106_v14  ;;  %8566 = vst [vmem:[#allocation29_spill] sm:$0xff] %v5550_v59  ;;  %v2905_v62 = vmul.f32 %v5311_v8, %v5407_v30  ;;  %v3002_v47 = vmul.f32 %v5318_v0, %v5409_v40  ;;  %v4292_v38 = vld [vmem:[%s4582_s20 + $0x28] sm:$0xff] }
 0x18e   : > { %v1010_v11 = vadd.f32 %v978_v29, %v881_v4  ;;  %8567 = vst [vmem:[#allocation32_spill] sm:$0xff] %v5554_v39  ;;  %v583_v12 = vpop.f32.mrf.mxu0  ;;  %v2645_v4 = vadd.f32 %v2613_v32, %v2547_v25  ;;  %4158 = vmatmul.msk.f32.gmra.mxu1 %vm459_vm0, %v3458_v27  ;;  %v3099_v19 = vmul.f32 %v5334_v53, %v5411_v9  ;;  %v5613_v53 = vld [vmem:[#allocation2 + $0xe0] sm:$0xff] }
 0x18f   : > { %v584_v21 = vadd.f32 %v5503_v5, %v583_v12  ;;  %v1479_v15 = vadd.f32 %v1447_v16, %v1381_v45  ;;  %v1268_v25 = vmul.f32 %v4843_v10, %v5461_v2  ;;  %v1641_v12 = vmul.f32 %v8569_v52, %v5559_v58 }
 0x190   : > { %v1107_v14 = vadd.f32 %v1075_v56, %v1010_v11  ;;  %v2742_v32 = vadd.f32 %v2710_v22, %v2645_v4  ;;  %v5579_v27 = vmul.f32 %v4898_v28, %v5463_v23  ;;  %v5583_v56 = vmul.f32 %v4917_v35, %v5459_v46 }
 0x191   : > { %v651_v29 = vmax.f32 %v584_v21, 0.0  ;;  %4194 = vmatmul.msk.f32.gmra.mxu2 %vm459_vm0, %v4292_v38  ;;  %v3197_v16 = vmul.f32 %v5346_v37, %v5459_v46  ;;  %v1576_v11 = vadd.f32 %v1544_v36, %v1479_v15  ;;  %v3294_v36 = vmul.f32 %v5370_v63, %v5461_v2 }
 0x192   : > { %8570 = vst [vmem:[#allocation70_spill] sm:$0xff] %v5579_v27  ;;  %v5585_v45 = vld [vmem:[#allocation2 + $0x1a0] sm:$0xff]  ;;  %v1739_v27 = vmul.f32 %v5382_v50, %v4967_v7  ;;  %v2839_v59 = vadd.f32 %v2807_v43, %v2742_v32  ;;  %v3391_v15 = vmul.f32 %v5372_v34, %v5463_v23  ;;  %v1269_v50 = vmul.f32 %v4843_v10, %v5521_v6 }
 0x193   : > { %8571 = vst [vmem:[#allocation71_spill] sm:$0xff] %v5583_v56  ;;  %v5587_v41 = vld [vmem:[#allocation2 + $0x1a1] sm:$0xff]  ;;  %v882_v4 = vmul.f32 %v4722_v48, %v5585_v45  ;;  %v1173_v38 = vmul.f32 %v4824_v3, %v5585_v45  ;;  %v5603_v56 = vadd.f32 %v1268_v25, %v5488_v26  ;;  %v1836_v43 = vmul.f32 %v5384_v13, %v4982_v17 }
 0x194   : > { %v5589_v22 = vld [vmem:[#allocation2 + $0x1a2] sm:$0xff]  ;;  %v979_v21 = vmul.f32 %v4725_v49, %v5587_v41  ;;  %805 = vst.msk [vmem:[#allocation2 + $0x1b1] sm:$0xff] %vm459_vm0, %v651_v29  ;;  %v1673_v29 = vadd.f32 %v1641_v12, %v1576_v11  ;;  %v2937_v26 = vadd.f32 %v2905_v62, %v2839_v59  ;;  %v864_v32 = vmul.f32 %v8559_v61, %v4722_v48  ;;  %v5633_v62 = vld [vmem:[#allocation2 + $0xf0] sm:$0xff] }
 0x195   : > { %8572 = vst [vmem:[#allocation72_spill] sm:$0xff] %v5589_v22  ;;  %v1076_v52 = vmul.f32 %v4740_v55, %v5589_v22  ;;  %v5611_v37 = vadd.f32 %v1173_v38, %v1107_v14  ;;  %v5619_v25 = vld [vmem:[#allocation2 + $0xe1] sm:$0xff]  ;;  %v5625_v14 = vmul.f32 %v4898_v28, %v5523_v24  ;;  %v5629_v12 = vmul.f32 %v4917_v35, %v5519_v31 }
 0x196   : > { %8573 = vst [vmem:[#allocation73_spill] sm:$0xff] %v5603_v56  ;;  %v1011_v39 = vadd.f32 %v979_v21, %v882_v4  ;;  %v1771_v4 = vadd.f32 %v1739_v27, %v1673_v29  ;;  %v5631_v59 = vld [vmem:[#allocation2 + $0xe2] sm:$0xff]  ;;  %v3034_v13 = vadd.f32 %v3002_v47, %v2937_v26  ;;  %v5641_v7 = vadd.f32 %v1269_v50, %v1204_v54  ;;  %v5645_v27 = vld [vmem:[#allocation2 + $0xf1] sm:$0xff] }
 0x197   : > { %8574 = vst [vmem:[#allocation74_spill] sm:$0xff] %v5619_v25  ;;  %v8579_v21 = vld [vmem:[#allocation23_spill] sm:$0xff]  ;;  %v8581_v61 = vld [vmem:[#allocation24_spill] sm:$0xff]  ;;  %v1058_v47 = vmul.f32 %v8564_v18, %v4740_v55  ;;  %v4293_v29 = vld [vmem:[%s4582_s20 + $0x30] sm:$0xff] }
 0x198   : > { %8575 = vst [vmem:[#allocation75_spill] sm:$0xff] %v5625_v14  ;;  %v1108_v11 = vadd.f32 %v1076_v52, %v1011_v39  ;;  %v8580_v38 = vld [vmem:[#allocation67_spill] sm:$0xff]  ;;  %v2030_v17 = vmul.f32 %v8581_v61, %v5613_v53  ;;  %v961_v14 = vmul.f32 %v8561_v33, %v4725_v49  ;;  %v1868_v34 = vadd.f32 %v1836_v43, %v1771_v4  ;;  %v8583_v39 = vld [vmem:[#allocation26_spill] sm:$0xff] }
 0x199   : > { %8576 = vst [vmem:[#allocation76_spill] sm:$0xff] %v5629_v12  ;;  %v1933_v56 = vmul.f32 %v8580_v38, %v8579_v21  ;;  %v2127_v52 = vmul.f32 %v8583_v39, %v5619_v25  ;;  %4195 = vmatmul.msk.f32.gmra.mxu2 %vm459_vm0, %v4293_v29  ;;  %v3131_v26 = vadd.f32 %v3099_v19, %v3034_v13  ;;  %v8588_v54 = vld [vmem:[#allocation27_spill] sm:$0xff]  ;;  %v5667_v13 = vld [vmem:[#allocation2 + $0xf2] sm:$0xff]  ;;  %v8589_v25 = vld [vmem:[#allocation40_spill] sm:$0xff] }
 0x19a   : > { %8577 = vst [vmem:[#allocation77_spill] sm:$0xff] %v5631_v59  ;;  %v2224_v50 = vmul.f32 %v8588_v54, %v5631_v59  ;;  %v2322_v43 = vmul.f32 %v5095_v42, %v5633_v62  ;;  %v993_v4 = vadd.f32 %v961_v14, %v864_v32  ;;  %v2419_v32 = vmul.f32 %v5164_v57, %v5645_v27  ;;  %v5687_v57 = vld [vmem:[#allocation2 + $0x60] sm:$0xff] }
 0x19b   : > { %8578 = vst [vmem:[#allocation78_spill] sm:$0xff] %v5633_v62  ;;  %v5651_v38 = vld [vmem:[#allocation2 + $0x1b0] sm:$0xff]  ;;  %v3229_v39 = vadd.f32 %v3197_v16, %v3131_v26  ;;  %v1253_v14 = vmul.f32 %v5538_v51, %v4843_v10  ;;  %v1965_v61 = vadd.f32 %v1933_v56, %v1868_v34  ;;  %v8591_v26 = vld [vmem:[#allocation36_spill] sm:$0xff]  ;;  %v586_v34 = vpop.f32.mrf.mxu0 }
 0x19c   : > { %8582 = vst [vmem:[#allocation67_spill] sm:$0xff] %v5641_v7  ;;  %v5653_v12 = vld [vmem:[#allocation2 + $0x1b1] sm:$0xff]  ;;  %v883_v18 = vmul.f32 %v4722_v48, %v5651_v38  ;;  %v1174_v19 = vmul.f32 %v4824_v3, %v5651_v38  ;;  %v1156_v7 = vmul.f32 %v5515_v1, %v4824_v3  ;;  %v1090_v59 = vadd.f32 %v1058_v47, %v993_v4  ;;  %v5702_v4 = vld [vmem:[#allocation2 + $0x61] sm:$0xff] }
 0x19d   : > { %8584 = vst [vmem:[#allocation79_spill] sm:$0xff] %v5645_v27  ;;  %v5655_v33 = vld [vmem:[#allocation2 + $0x1b2] sm:$0xff]  ;;  %v980_v29 = vmul.f32 %v4725_v49, %v5653_v12  ;;  %v3326_v21 = vadd.f32 %v3294_v36, %v3229_v39  ;;  %v1350_v36 = vmul.f32 %v5559_v58, %v4898_v28  ;;  %v587_v47 = vadd.f32 %v5503_v5, %v586_v34 }
 0x19e   : > { %8585 = vst [vmem:[#allocation80_spill] sm:$0xff] %v5651_v38  ;;  %v1077_v54 = vmul.f32 %v4740_v55, %v5655_v33  ;;  %v1206_v62 = vadd.f32 %v1174_v19, %v1108_v11  ;;  %v2516_v38 = vmul.f32 %v8589_v25, %v5667_v13  ;;  %v8590_v3 = vld [vmem:[#allocation34_spill] sm:$0xff]  ;;  %v2062_v11 = vadd.f32 %v2030_v17, %v1965_v61 }
 0x19f   : > { %8586 = vst [vmem:[#allocation81_spill] sm:$0xff] %v5653_v12  ;;  %v1012_v42 = vadd.f32 %v980_v29, %v883_v18  ;;  %v5681_v16 = vmul.f32 %v8590_v3, %v5407_v30  ;;  %v1188_v56 = vadd.f32 %v1156_v7, %v1090_v59  ;;  %v3423_v39 = vadd.f32 %v3391_v15, %v3326_v21  ;;  %v4294_v59 = vld [vmem:[%s4582_s20 + $0x38] sm:$0xff] }
 0x1a0   : > { %8587 = vst [vmem:[#allocation82_spill] sm:$0xff] %v5655_v33  ;;  %v5685_v33 = vmul.f32 %v8591_v26, %v5409_v40  ;;  %v5695_v30 = vmul.f32 %v8548_v60, %v5411_v9  ;;  %v5699_v40 = vmul.f32 %v5311_v8, %v5459_v46  ;;  %v1270_v17 = vmul.f32 %v4843_v10, %v5587_v41 }
 0x1a1   : > { %v5689_v27 = vadd.f32 %v1077_v54, %v1012_v42  ;;  %v2159_v7 = vadd.f32 %v2127_v52, %v2062_v11  ;;  %v1285_v42 = vadd.f32 %v1253_v14, %v1188_v56  ;;  %v1448_v15 = vmul.f32 %v4917_v35, %v5687_v57  ;;  %4196 = vmatmul.msk.f32.gmra.mxu2 %vm459_vm0, %v4294_v59  ;;  %v5719_v54 = vld [vmem:[#allocation2 + $0x62] sm:$0xff]  ;;  %v8595_v11 = vld [vmem:[#allocation62_spill] sm:$0xff] }
 0x1a2   : > { %v5712_v9 = vmul.f32 %v4898_v28, %v5589_v22  ;;  %v5716_v46 = vmul.f32 %v4917_v35, %v5585_v45  ;;  %v3459_v21 = vadd.f32 %v5397_v44, %v3423_v39  ;;  %v652_v61 = vmax.f32 %v587_v47, 0.0  ;;  %v8597_v56 = vld [vmem:[#allocation63_spill] sm:$0xff] }
 0x1a3   : > { %v2256_v52 = vadd.f32 %v2224_v50, %v2159_v7  ;;  %v5723_v18 = vmul.f32 %v5318_v0, %v5461_v2  ;;  %v1382_v29 = vadd.f32 %v1350_v36, %v1285_v42  ;;  %v1545_v19 = vmul.f32 %v8568_v20, %v5702_v4 }
 0x1a4   : > { %8592 = vst [vmem:[#allocation34_spill] sm:$0xff] %v5712_v9  ;;  %v5728_v14 = vadd.f32 %v1270_v17, %v5611_v37  ;;  %4159 = vmatmul.msk.f32.gmra.mxu1 %vm459_vm0, %v3459_v21  ;;  %v5733_v34 = vmul.f32 %v8595_v11, %v5463_v23  ;;  %v5737_v50 = vmul.f32 %v8597_v56, %v5519_v31  ;;  %v8600_v37 = vld [vmem:[#allocation20_spill] sm:$0xff]  ;;  %v8601_v17 = vld [vmem:[#allocation66_spill] sm:$0xff] }
 0x1a5   : > { %8593 = vst [vmem:[#allocation36_spill] sm:$0xff] %v5716_v46  ;;  %v2354_v2 = vadd.f32 %v2322_v43, %v2256_v52  ;;  %v5742_v36 = vmul.f32 %v5370_v63, %v5521_v6  ;;  %v1480_v39 = vadd.f32 %v1448_v15, %v1382_v29  ;;  %v1642_v47 = vmul.f32 %v8600_v37, %v5719_v54  ;;  %v8609_v46 = vld [vmem:[#allocation74_spill] sm:$0xff] }
 0x1a6   : > { %8594 = vst [vmem:[#allocation83_spill] sm:$0xff] %v5728_v14  ;;  %v5748_v7 = vmul.f32 %v8601_v17, %v5523_v24  ;;  %v865_v23 = vmul.f32 %v5515_v1, %v4722_v48  ;;  %v962_v42 = vmul.f32 %v5538_v51, %v4725_v49  ;;  %v1059_v43 = vmul.f32 %v5559_v58, %v4740_v55  ;;  %v8606_v1 = vld [vmem:[#allocation80_spill] sm:$0xff]  ;;  %v8608_v51 = vld [vmem:[#allocation22_spill] sm:$0xff]  ;;  %v8619_v17 = vld [vmem:[#allocation27_spill] sm:$0xff] }
 0x1a7   : > { %8596 = vst [vmem:[#allocation84_spill] sm:$0xff] %v5733_v34  ;;  %v1271_v15 = vmul.f32 %v4843_v10, %v5653_v12  ;;  %v2451_v59 = vadd.f32 %v2419_v32, %v2354_v2  ;;  %v1577_v21 = vadd.f32 %v1545_v19, %v1480_v39  ;;  %v8604_v29 = vld [vmem:[#allocation82_spill] sm:$0xff]  ;;  %v5766_v14 = vmul.f32 %v4917_v35, %v8606_v1  ;;  %v5772_v19 = vld [vmem:[#allocation2 + $0x100] sm:$0xff]  ;;  %v8613_v1 = vld [vmem:[#allocation77_spill] sm:$0xff] }
 0x1a8   : > { %8598 = vst [vmem:[#allocation85_spill] sm:$0xff] %v5737_v50  ;;  %v5762_v9 = vmul.f32 %v4898_v28, %v8604_v29  ;;  %v1837_v58 = vmul.f32 %v8609_v46, %v8608_v51  ;;  %v994_v44 = vadd.f32 %v962_v42, %v865_v23  ;;  %v5774_v2 = vld [vmem:[#allocation2 + $0x101] sm:$0xff]  ;;  %v8611_v39 = vld [vmem:[#allocation14_spill] sm:$0xff]  ;;  %v2225_v22 = vmul.f32 %v5667_v13, %v8619_v17 }
 0x1a9   : > { %806 = vst.msk [vmem:[#allocation2 + $0x1c1] sm:$0xff] %vm459_vm0, %v652_v61  ;;  %v8603_v61 = vld [vmem:[#allocation21_spill] sm:$0xff]  ;;  %v2548_v12 = vadd.f32 %v2516_v38, %v2451_v59  ;;  %v1674_v32 = vadd.f32 %v1642_v47, %v1577_v21  ;;  %v4295_v29 = vld [vmem:[%s4582_s20 + $0x40] sm:$0xff]  ;;  %v8614_v23 = vld [vmem:[#allocation24_spill] sm:$0xff] }
 0x1aa   : > { %8599 = vst [vmem:[#allocation86_spill] sm:$0xff] %v5742_v36  ;;  %v1740_v52 = vmul.f32 %v5613_v53, %v8603_v61  ;;  %v5776_v53 = vld [vmem:[#allocation2 + $0x102] sm:$0xff]  ;;  %4197 = vmatmul.msk.f32.gmra.mxu2 %vm459_vm0, %v4295_v29  ;;  %v8616_v38 = vld [vmem:[#allocation26_spill] sm:$0xff]  ;;  %v1091_v21 = vadd.f32 %v1059_v43, %v994_v44  ;;  %v5807_v43 = vld [vmem:[#allocation2 + $0x70] sm:$0xff] }
 0x1ab   : > { %8602 = vst [vmem:[#allocation87_spill] sm:$0xff] %v5748_v7  ;;  %v5770_v7 = vadd.f32 %v1271_v15, %v1206_v62  ;;  %v8615_v62 = vld [vmem:[#allocation78_spill] sm:$0xff]  ;;  %v8617_v47 = vld [vmem:[#allocation79_spill] sm:$0xff] }
 0x1ac   : > { %8605 = vst [vmem:[#allocation88_spill] sm:$0xff] %v5762_v9  ;;  %v1157_v9 = vmul.f32 %v5687_v57, %v8611_v39  ;;  %v2031_v42 = vmul.f32 %v8615_v62, %v8614_v23  ;;  %v2128_v15 = vmul.f32 %v8617_v47, %v8616_v38  ;;  %v2582_v59 = vld [vmem:[#allocation2 + $0x180] sm:$0xff]  ;;  %v1772_v50 = vadd.f32 %v1740_v52, %v1674_v32 }
 0x1ad   : > { %8607 = vst [vmem:[#allocation89_spill] sm:$0xff] %v5766_v14  ;;  %v8612_v14 = vld [vmem:[#allocation23_spill] sm:$0xff] }
 0x1ae   : > { %8610 = vst [vmem:[#allocation74_spill] sm:$0xff] %v5770_v7  ;;  %v1934_v46 = vmul.f32 %v8613_v1, %v8612_v14  ;;  %v2646_v7 = vadd.f32 %v5681_v16, %v2548_v12  ;;  %v2679_v29 = vld [vmem:[#allocation2 + $0x181] sm:$0xff]  ;;  %v1254_v1 = vmul.f32 %v5702_v4, %v4843_v10  ;;  %v5805_v16 = vmul.f32 %v8589_v25, %v5776_v53 }
 0x1af   : > { %v2776_v34 = vld [vmem:[#allocation2 + $0x182] sm:$0xff]  ;;  %8623 = vst [vmem:[#allocation79_spill] sm:$0xff] %v5807_v43  ;;  %v1869_v32 = vadd.f32 %v1837_v58, %v1772_v50  ;;  %v1189_v17 = vadd.f32 %v1157_v9, %v1091_v21  ;;  %v5835_v58 = vmul.f32 %v5318_v0, %v5521_v6 }
 0x1b0   : > { %v5789_v36 = vld [vmem:[#allocation2 + $0x1c0] sm:$0xff]  ;;  %8622 = vst [vmem:[#allocation78_spill] sm:$0xff] %v5805_v16  ;;  %v2743_v52 = vadd.f32 %v5685_v33, %v2646_v7  ;;  %v5822_v25 = vmul.f32 %v8548_v60, %v2776_v34  ;;  %v5824_v16 = vld [vmem:[#allocation2 + $0x71] sm:$0xff]  ;;  %v5831_v7 = vmul.f32 %v5311_v8, %v5519_v31  ;;  %v5839_v34 = vmul.f32 %v8595_v11, %v5523_v24 }
 0x1b1   : > { %8618 = vst [vmem:[#allocation77_spill] sm:$0xff] %v5789_v36  ;;  %v1175_v23 = vmul.f32 %v8611_v39, %v5789_v36  ;;  %v8620_v38 = vld [vmem:[#allocation31_spill] sm:$0xff]  ;;  %v1351_v36 = vmul.f32 %v5719_v54, %v4898_v28  ;;  %v1966_v9 = vadd.f32 %v1934_v46, %v1869_v32  ;;  %v1286_v50 = vadd.f32 %v1254_v1, %v1189_v17  ;;  %v5845_v17 = vld [vmem:[#allocation2 + $0x72] sm:$0xff]  ;;  %v4296_v1 = vld [vmem:[%s4582_s20 + $0x48] sm:$0xff] }
 0x1b2   : > { %v2323_v14 = vmul.f32 %v8620_v38, %v5772_v19  ;;  %v8621_v44 = vld [vmem:[#allocation39_spill] sm:$0xff]  ;;  %v5816_v38 = vmul.f32 %v8590_v3, %v2582_v59  ;;  %8624 = vst [vmem:[#allocation90_spill] sm:$0xff] %v5824_v16  ;;  %v2840_v33 = vadd.f32 %v5695_v30, %v2743_v52  ;;  %v5843_v30 = vmul.f32 %v8597_v56, %v5585_v45  ;;  %v589_v59 = vpop.f32.mrf.mxu0 }
 0x1b3   : > { %v5801_v12 = vmul.f32 %v8621_v44, %v5774_v2  ;;  %v5813_v39 = vadd.f32 %v1175_v23, %v5689_v27  ;;  %v5819_v44 = vmul.f32 %v8591_v26, %v2679_v29  ;;  %v1449_v27 = vmul.f32 %v4917_v35, %v5807_v43  ;;  %8625 = vst [vmem:[#allocation91_spill] sm:$0xff] %v5835_v58  ;;  %v8634_v58 = vld [vmem:[#allocation66_spill] sm:$0xff] }
 0x1b4   : > { %8626 = vst [vmem:[#allocation92_spill] sm:$0xff] %v5839_v34  ;;  %v2938_v46 = vadd.f32 %v5699_v40, %v2840_v33  ;;  %v2063_v23 = vadd.f32 %v2031_v42, %v1966_v9  ;;  %v1383_v21 = vadd.f32 %v1351_v36, %v1286_v50  ;;  %v1546_v29 = vmul.f32 %v8568_v20, %v5824_v16  ;;  %v5862_v42 = vld [vmem:[#allocation2 + $0x1c1] sm:$0xff] }
 0x1b5   : > { %8627 = vst [vmem:[#allocation93_spill] sm:$0xff] %v5843_v30  ;;  %4198 = vmatmul.msk.f32.gmra.mxu2 %vm459_vm0, %v4296_v1  ;;  %v5854_v52 = vmul.f32 %v5370_v63, %v5587_v41  ;;  %v590_v32 = vadd.f32 %v5503_v5, %v589_v59  ;;  %v866_v30 = vmul.f32 %v5687_v57, %v4722_v48  ;;  %v5866_v1 = vld [vmem:[#allocation2 + $0x1c2] sm:$0xff] }
 0x1b6   : > { %v963_v40 = vmul.f32 %v5702_v4, %v4725_v49  ;;  %v3035_v36 = vadd.f32 %v5723_v18, %v2938_v46  ;;  %8629 = vst [vmem:[#allocation95_spill] sm:$0xff] %v5862_v42  ;;  %v2160_v33 = vadd.f32 %v2128_v15, %v2063_v23  ;;  %v1481_v9 = vadd.f32 %v1449_v27, %v1383_v21  ;;  %v8631_v18 = vld [vmem:[#allocation84_spill] sm:$0xff]  ;;  %v8632_v27 = vld [vmem:[#allocation23_spill] sm:$0xff] }
 0x1b7   : > { %8628 = vst [vmem:[#allocation94_spill] sm:$0xff] %v5854_v52  ;;  %v1643_v50 = vmul.f32 %v8600_v37, %v5845_v17  ;;  %v653_v52 = vmax.f32 %v590_v32, 0.0  ;;  %v1741_v59 = vmul.f32 %v8615_v62, %v8603_v61  ;;  %v1838_v57 = vmul.f32 %v8617_v47, %v8608_v51  ;;  %v8633_v32 = vld [vmem:[#allocation72_spill] sm:$0xff]  ;;  %v8637_v51 = vld [vmem:[#allocation85_spill] sm:$0xff] }
 0x1b8   : > { %8630 = vst [vmem:[#allocation96_spill] sm:$0xff] %v5866_v1  ;;  %v1060_v4 = vmul.f32 %v5719_v54, %v4740_v55  ;;  %v3132_v46 = vadd.f32 %v8631_v18, %v3035_v36  ;;  %v2257_v34 = vadd.f32 %v2225_v22, %v2160_v33  ;;  %v1578_v15 = vadd.f32 %v1546_v29, %v1481_v9  ;;  %v8636_v62 = vld [vmem:[#allocation24_spill] sm:$0xff]  ;;  %v5891_v29 = vld [vmem:[#allocation2 + $0x1e0] sm:$0xff] }
 0x1b9   : > { %v1935_v23 = vmul.f32 %v5667_v13, %v8632_v27  ;;  %v1272_v21 = vmul.f32 %v4843_v10, %v5862_v42  ;;  %v5881_v63 = vmul.f32 %v8634_v58, %v8633_v32  ;;  %807 = vst.msk [vmem:[#allocation2 + $0x1f1] sm:$0xff] %vm459_vm0, %v653_v52  ;;  %v2032_v47 = vmul.f32 %v5772_v19, %v8636_v62  ;;  %v5895_v18 = vld [vmem:[#allocation2 + $0x1e1] sm:$0xff]  ;;  %v5897_v52 = vld [vmem:[#allocation2 + $0x110] sm:$0xff] }
 0x1ba   : > { %v995_v54 = vadd.f32 %v963_v40, %v866_v30  ;;  %v3230_v36 = vadd.f32 %v8637_v51, %v3132_v46  ;;  %v5889_v22 = vmul.f32 %v4898_v28, %v5866_v1  ;;  %v2355_v13 = vadd.f32 %v2323_v14, %v2257_v34  ;;  %8639 = vst [vmem:[#allocation85_spill] sm:$0xff] %v5891_v29  ;;  %v8641_v30 = vld [vmem:[#allocation14_spill] sm:$0xff]  ;;  %v8646_v62 = vld [vmem:[#allocation27_spill] sm:$0xff] }
 0x1bb   : > { %8635 = vst [vmem:[#allocation84_spill] sm:$0xff] %v5881_v63  ;;  %v1675_v33 = vadd.f32 %v1643_v50, %v1578_v15  ;;  %v884_v9 = vmul.f32 %v4722_v48, %v5891_v29  ;;  %v1158_v51 = vmul.f32 %v5807_v43, %v8641_v30  ;;  %v1255_v40 = vmul.f32 %v5824_v16, %v4843_v10  ;;  %v8642_v46 = vld [vmem:[#allocation86_spill] sm:$0xff]  ;;  %v4297_v29 = vld [vmem:[%s4582_s20 + $0x50] sm:$0xff] }
 0x1bc   : > { %8638 = vst [vmem:[#allocation72_spill] sm:$0xff] %v5889_v22  ;;  %v1092_v42 = vadd.f32 %v1060_v4, %v995_v54  ;;  %v3327_v22 = vadd.f32 %v8642_v46, %v3230_v36  ;;  %v2452_v14 = vadd.f32 %v5801_v12, %v2355_v13  ;;  %v981_v34 = vmul.f32 %v4725_v49, %v5895_v18  ;;  %v5907_v15 = vld [vmem:[#allocation2 + $0x111] sm:$0xff]  ;;  %v8647_v13 = vld [vmem:[#allocation87_spill] sm:$0xff] }
 0x1bd   : > { %8640 = vst [vmem:[#allocation97_spill] sm:$0xff] %v5895_v18  ;;  %v1773_v50 = vadd.f32 %v1741_v59, %v1675_v33  ;;  %4199 = vmatmul.msk.f32.gmra.mxu2 %vm459_vm0, %v4297_v29  ;;  %v8643_v4 = vld [vmem:[#allocation77_spill] sm:$0xff]  ;;  %v8645_v1 = vld [vmem:[#allocation26_spill] sm:$0xff]  ;;  %v2226_v36 = vmul.f32 %v5776_v53, %v8646_v62  ;;  %v5921_v33 = vld [vmem:[#allocation2 + $0x1e2] sm:$0xff] }
 0x1be   : > { %v5913_v54 = vmul.f32 %v4917_v35, %v8643_v4  ;;  %v2129_v63 = vmul.f32 %v5774_v2, %v8645_v1  ;;  %v1190_v12 = vadd.f32 %v1158_v51, %v1092_v42  ;;  %v3424_v46 = vadd.f32 %v8647_v13, %v3327_v22  ;;  %v8648_v18 = vld [vmem:[#allocation78_spill] sm:$0xff]  ;;  %8649 = vst [vmem:[#allocation87_spill] sm:$0xff] %v5921_v33  ;;  %v8650_v29 = vld [vmem:[#allocation31_spill] sm:$0xff] }
 0x1bf   : > { %v2549_v59 = vadd.f32 %v8648_v18, %v2452_v14  ;;  %v1870_v10 = vadd.f32 %v1838_v57, %v1773_v50  ;;  %v2324_v16 = vmul.f32 %v8650_v29, %v5897_v52  ;;  %v5925_v43 = vld [vmem:[#allocation2 + $0x112] sm:$0xff]  ;;  %v1078_v4 = vmul.f32 %v4740_v55, %v5921_v33  ;;  %v8652_v62 = vld [vmem:[#allocation39_spill] sm:$0xff]  ;;  %v8653_v18 = vld [vmem:[#allocation68_spill] sm:$0xff] }
 0x1c0   : > { %8644 = vst [vmem:[#allocation86_spill] sm:$0xff] %v5913_v54  ;;  %v5927_v54 = vld [vmem:[#allocation2 + $0x80] sm:$0xff]  ;;  %v2421_v42 = vmul.f32 %v8652_v62, %v5907_v15  ;;  %v1287_v51 = vadd.f32 %v1255_v40, %v1190_v12  ;;  %v1352_v22 = vmul.f32 %v5845_v17, %v4898_v28  ;;  %v3460_v14 = vadd.f32 %v8653_v18, %v3424_v46  ;;  %v8655_v33 = vld [vmem:[#allocation40_spill] sm:$0xff] }
 0x1c1   : > { %8651 = vst [vmem:[#allocation78_spill] sm:$0xff] %v5925_v43  ;;  %v2647_v57 = vadd.f32 %v5816_v38, %v2549_v59  ;;  %v1013_v50 = vadd.f32 %v981_v34, %v884_v9  ;;  %v1967_v13 = vadd.f32 %v1935_v23, %v1870_v10  ;;  %v5937_v29 = vld [vmem:[#allocation2 + $0x81] sm:$0xff]  ;;  %v5940_v1 = vadd.f32 %v1272_v21, %v5813_v39  ;;  %v592_v21 = vpop.f32.mrf.mxu0  ;;  %v5962_v9 = vld [vmem:[#allocation2 + $0x1f0] sm:$0xff] }
 0x1c2   : > { %v2518_v55 = vmul.f32 %v8655_v33, %v5925_v43  ;;  %v5946_v40 = vmul.f32 %v8590_v3, %v5519_v31  ;;  %v1450_v12 = vmul.f32 %v4917_v35, %v5927_v54  ;;  %4160 = vmatmul.msk.f32.gmra.mxu1 %vm459_vm0, %v3460_v14  ;;  %v5954_v39 = vmul.f32 %v8591_v26, %v5521_v6  ;;  %v5960_v31 = vld [vmem:[#allocation2 + $0x82] sm:$0xff] }
 0x1c3   : > { %8654 = vst [vmem:[#allocation68_spill] sm:$0xff] %v5940_v1  ;;  %v2744_v10 = vadd.f32 %v5819_v44, %v2647_v57  ;;  %v2064_v38 = vadd.f32 %v2032_v47, %v1967_v13  ;;  %v5958_v23 = vmul.f32 %v8548_v60, %v5523_v24  ;;  %v5966_v34 = vmul.f32 %v5311_v8, %v5585_v45  ;;  %v4298_v57 = vld [vmem:[%s4582_s20 + $0x58] sm:$0xff]  ;;  %v8661_v1 = vld [vmem:[#allocation65_spill] sm:$0xff] }
 0x1c4   : > { %8656 = vst [vmem:[#allocation98_spill] sm:$0xff] %v5962_v9  ;;  %v593_v44 = vadd.f32 %v5503_v5, %v592_v21  ;;  %v1384_v47 = vadd.f32 %v1352_v22, %v1287_v51  ;;  %v1547_v6 = vmul.f32 %v8568_v20, %v5937_v29  ;;  %v1110_v59 = vadd.f32 %v1078_v4, %v1013_v50  ;;  %v5978_v13 = vld [vmem:[#allocation2 + $0x1f1] sm:$0xff] }
 0x1c5   : > { %v2841_v46 = vadd.f32 %v5822_v25, %v2744_v10  ;;  %v2161_v24 = vadd.f32 %v2129_v63, %v2064_v38  ;;  %v5974_v14 = vmul.f32 %v5318_v0, %v5587_v41  ;;  %4200 = vmatmul.msk.f32.gmra.mxu2 %vm459_vm0, %v4298_v57  ;;  %8657 = vst [vmem:[#allocation99_spill] sm:$0xff] %v5978_v13  ;;  %v8658_v10 = vld [vmem:[#allocation80_spill] sm:$0xff]  ;;  %v8660_v57 = vld [vmem:[#allocation81_spill] sm:$0xff] }
 0x1c6   : > { %v5982_v21 = vmul.f32 %v8595_v11, %v8633_v32  ;;  %v654_v51 = vmax.f32 %v593_v44, 0.0  ;;  %v1482_v22 = vadd.f32 %v1450_v12, %v1384_v47  ;;  %v1644_v25 = vmul.f32 %v8600_v37, %v5960_v31  ;;  %v8663_v11 = vld [vmem:[#allocation82_spill] sm:$0xff]  ;;  %v8665_v47 = vld [vmem:[#allocation91_spill] sm:$0xff] }
 0x1c7   : > { %v2939_v63 = vadd.f32 %v5831_v7, %v2841_v46  ;;  %v1176_v4 = vmul.f32 %v8641_v30, %v5962_v9  ;;  %v2258_v50 = vadd.f32 %v2226_v36, %v2161_v24  ;;  %v5991_v38 = vmul.f32 %v8597_v56, %v8658_v10 }
 0x1c8   : > { %v5995_v0 = vmul.f32 %v8661_v1, %v8660_v57  ;;  %v5999_v12 = vmul.f32 %v8634_v58, %v8663_v11  ;;  %808 = vst.msk [vmem:[#allocation2 + $0x201] sm:$0xff] %vm459_vm0, %v654_v51  ;;  %v1579_v44 = vadd.f32 %v1547_v6, %v1482_v22  ;;  %v1742_v7 = vmul.f32 %v5772_v19, %v8603_v61  ;;  %v8667_v51 = vld [vmem:[#allocation79_spill] sm:$0xff]  ;;  %v8668_v22 = vld [vmem:[#allocation92_spill] sm:$0xff]  ;;  %v8670_v61 = vld [vmem:[#allocation90_spill] sm:$0xff] }
 0x1c9   : > { %8659 = vst [vmem:[#allocation80_spill] sm:$0xff] %v5991_v38  ;;  %v3036_v36 = vadd.f32 %v8665_v47, %v2939_v63  ;;  %v885_v46 = vmul.f32 %v4722_v48, %v5962_v9  ;;  %v982_v24 = vmul.f32 %v4725_v49, %v5978_v13  ;;  %v2356_v1 = vadd.f32 %v2324_v16, %v2258_v50  ;;  %v8666_v38 = vld [vmem:[#allocation22_spill] sm:$0xff] }
 0x1ca   : > { %8662 = vst [vmem:[#allocation81_spill] sm:$0xff] %v5995_v0  ;;  %v1676_v0 = vadd.f32 %v1644_v25, %v1579_v44  ;;  %v1839_v58 = vmul.f32 %v5774_v2, %v8666_v38  ;;  %v1936_v6 = vmul.f32 %v5776_v53, %v8632_v27  ;;  %v867_v19 = vmul.f32 %v8667_v51, %v4722_v48  ;;  %v6016_v47 = vld [vmem:[#allocation2 + $0x1f2] sm:$0xff]  ;;  %v8671_v25 = vld [vmem:[#allocation15_spill] sm:$0xff]  ;;  %v8672_v44 = vld [vmem:[#allocation24_spill] sm:$0xff] }
 0x1cb   : > { %8664 = vst [vmem:[#allocation82_spill] sm:$0xff] %v5999_v12  ;;  %v3133_v63 = vadd.f32 %v8668_v22, %v3036_v36  ;;  %v1208_v9 = vadd.f32 %v1176_v4, %v1110_v59  ;;  %v2453_v12 = vadd.f32 %v2421_v42, %v2356_v1  ;;  %v964_v16 = vmul.f32 %v8670_v61, %v4725_v49  ;;  %v8673_v53 = vld [vmem:[#allocation13_spill] sm:$0xff]  ;;  %v4299_v59 = vld [vmem:[%s4582_s20 + $0x60] sm:$0xff]  ;;  %v8675_v1 = vld [vmem:[#allocation26_spill] sm:$0xff] }
 0x1cc   : > { %8669 = vst [vmem:[#allocation91_spill] sm:$0xff] %v6016_v47  ;;  %v1273_v50 = vmul.f32 %v8671_v25, %v5978_v13  ;;  %v1774_v2 = vadd.f32 %v1742_v7, %v1676_v0  ;;  %v2033_v38 = vmul.f32 %v5897_v52, %v8672_v44  ;;  %v1061_v27 = vmul.f32 %v5845_v17, %v8673_v53  ;;  %v8674_v51 = vld [vmem:[#allocation93_spill] sm:$0xff]  ;;  %v8676_v4 = vld [vmem:[#allocation27_spill] sm:$0xff] }
 0x1cd   : > { %v3231_v37 = vadd.f32 %v8674_v51, %v3133_v63  ;;  %v1014_v36 = vadd.f32 %v982_v24, %v885_v46  ;;  %v2550_v22 = vadd.f32 %v2518_v55, %v2453_v12  ;;  %v996_v56 = vadd.f32 %v964_v16, %v867_v19  ;;  %4201 = vmatmul.msk.f32.gmra.mxu2 %vm459_vm0, %v4299_v59  ;;  %v6037_v7 = vld [vmem:[#allocation2 + $0x120] sm:$0xff]  ;;  %v8677_v55 = vld [vmem:[#allocation94_spill] sm:$0xff] }
 0x1ce   : > { %v1079_v61 = vmul.f32 %v8673_v53, %v6016_v47  ;;  %v1370_v0 = vmul.f32 %v4898_v28, %v6016_v47  ;;  %v2130_v42 = vmul.f32 %v5907_v15, %v8675_v1  ;;  %v2227_v17 = vmul.f32 %v5925_v43, %v8676_v4  ;;  %v6039_v46 = vld [vmem:[#allocation2 + $0x121] sm:$0xff] }
 0x1cf   : > { %v3328_v12 = vadd.f32 %v8677_v55, %v3231_v37  ;;  %v1305_v24 = vadd.f32 %v1273_v50, %v1208_v9  ;;  %v2648_v19 = vadd.f32 %v5946_v40, %v2550_v22  ;;  %v6043_v63 = vld [vmem:[#allocation2 + $0x200] sm:$0xff]  ;;  %v1871_v59 = vadd.f32 %v1839_v58, %v1774_v2  ;;  %v8681_v40 = vld [vmem:[#allocation84_spill] sm:$0xff] }
 0x1d0   : > { %8678 = vst [vmem:[#allocation79_spill] sm:$0xff] %v6043_v63  ;;  %v6045_v16 = vld [vmem:[#allocation2 + $0x201] sm:$0xff]  ;;  %v886_v47 = vmul.f32 %v4722_v48, %v6043_v63  ;;  %v1093_v1 = vadd.f32 %v1061_v27, %v996_v56  ;;  %v1159_v37 = vmul.f32 %v5927_v54, %v8641_v30  ;;  %v1111_v50 = vadd.f32 %v1079_v61, %v1014_v36  ;;  %v1418_v61 = vld [vmem:[#allocation2 + $0x90] sm:$0xff] }
 0x1d1   : > { %8679 = vst [vmem:[#allocation92_spill] sm:$0xff] %v6045_v16  ;;  %v6047_v51 = vld [vmem:[#allocation2 + $0x202] sm:$0xff]  ;;  %v983_v13 = vmul.f32 %v4725_v49, %v6045_v16  ;;  %v3425_v9 = vadd.f32 %v8681_v40, %v3328_v12  ;;  %v2745_v22 = vadd.f32 %v5954_v39, %v2648_v19  ;;  %v2422_v43 = vmul.f32 %v8652_v62, %v6039_v46  ;;  %v1515_v40 = vld [vmem:[#allocation2 + $0x91] sm:$0xff] }
 0x1d2   : > { %8680 = vst [vmem:[#allocation90_spill] sm:$0xff] %v6047_v51  ;;  %v6053_v4 = vld [vmem:[#allocation2 + $0x122] sm:$0xff]  ;;  %v1080_v44 = vmul.f32 %v8673_v53, %v6047_v51  ;;  %v1256_v56 = vmul.f32 %v5937_v29, %v8671_v25  ;;  %v1968_v36 = vadd.f32 %v1936_v6, %v1871_v59  ;;  %v1402_v12 = vadd.f32 %v1370_v0, %v1305_v24  ;;  %v595_v0 = vpop.f32.mrf.mxu0 }
 0x1d3   : > { %v8682_v55 = vld [vmem:[#allocation31_spill] sm:$0xff]  ;;  %v1015_v2 = vadd.f32 %v983_v13, %v886_v47  ;;  %v3461_v27 = vadd.f32 %v8653_v18, %v3425_v9  ;;  %v2842_v54 = vadd.f32 %v5958_v23, %v2745_v22  ;;  %v2519_v39 = vmul.f32 %v8655_v33, %v6053_v4  ;;  %v1612_v22 = vld [vmem:[#allocation2 + $0x92] sm:$0xff] }
 0x1d4   : > { %v2325_v58 = vmul.f32 %v8682_v55, %v6037_v7  ;;  %v1191_v47 = vadd.f32 %v1159_v37, %v1093_v1  ;;  %v1353_v19 = vmul.f32 %v5960_v31, %v4898_v28  ;;  %v2065_v9 = vadd.f32 %v2033_v38, %v1968_v36  ;;  %v4300_v37 = vld [vmem:[%s4582_s20 + $0x68] sm:$0xff] }
 0x1d5   : > { %v6071_v13 = vadd.f32 %v1080_v44, %v1015_v2  ;;  %4161 = vmatmul.msk.f32.gmra.mxu1 %vm459_vm0, %v3461_v27  ;;  %v2940_v29 = vadd.f32 %v5966_v34, %v2842_v54  ;;  %v2617_v23 = vmul.f32 %v8590_v3, %v5585_v45  ;;  %v6081_v6 = vmul.f32 %v8591_v26, %v5587_v41  ;;  %v613_v44 = vpop.f32.mrf.mxu3 }
 0x1d6   : > { %v596_v1 = vadd.f32 %v5503_v5, %v595_v0  ;;  %v614_v24 = vadd.f32 %v5503_v5, %v613_v44  ;;  %v1288_v31 = vadd.f32 %v1256_v56, %v1191_v47  ;;  %v1451_v59 = vmul.f32 %v4917_v35, %v1418_v61  ;;  %4202 = vmatmul.msk.f32.gmra.mxu2 %vm459_vm0, %v4300_v37  ;;  %v8684_v47 = vld [vmem:[#allocation62_spill] sm:$0xff]  ;;  %v8688_v44 = vld [vmem:[#allocation80_spill] sm:$0xff]  ;;  %v8690_v37 = vld [vmem:[#allocation65_spill] sm:$0xff] }
 0x1d7   : > { %v3037_v34 = vadd.f32 %v5974_v14, %v2940_v29  ;;  %v2162_v38 = vadd.f32 %v2130_v42, %v2065_v9  ;;  %v6091_v45 = vmul.f32 %v8548_v60, %v8633_v32  ;;  %v1548_v41 = vmul.f32 %v8568_v20, %v1515_v40  ;;  %v8683_v42 = vld [vmem:[#allocation61_spill] sm:$0xff]  ;;  %v8686_v9 = vld [vmem:[#allocation63_spill] sm:$0xff] }
 0x1d8   : > { %v1177_v2 = vmul.f32 %v8641_v30, %v6043_v63  ;;  %v655_v27 = vmax.f32 %v596_v1, 0.0  ;;  %v661_v56 = vmax.f32 %v614_v24, 0.0  ;;  %v1385_v54 = vadd.f32 %v1353_v19, %v1288_v31  ;;  %v8685_v29 = vld [vmem:[#allocation77_spill] sm:$0xff]  ;;  %v8689_v31 = vld [vmem:[#allocation95_spill] sm:$0xff] }
 0x1d9   : > { %v3134_v36 = vadd.f32 %v5982_v21, %v3037_v34  ;;  %v2259_v61 = vadd.f32 %v2227_v17, %v2162_v38  ;;  %v6099_v14 = vmul.f32 %v5311_v8, %v8658_v10  ;;  %v6103_v32 = vmul.f32 %v8683_v42, %v8660_v57  ;;  %v8687_v17 = vld [vmem:[#allocation20_spill] sm:$0xff] }
 0x1da   : > { %v6107_v40 = vmul.f32 %v8684_v47, %v8663_v11  ;;  %v6111_v0 = vmul.f32 %v8686_v9, %v8685_v29  ;;  %809 = vst.msk [vmem:[#allocation2 + $0x211] sm:$0xff] %vm459_vm0, %v655_v27  ;;  %v1483_v21 = vadd.f32 %v1451_v59, %v1385_v54  ;;  %v1645_v19 = vmul.f32 %v8687_v17, %v1612_v22  ;;  %v8692_v38 = vld [vmem:[#allocation96_spill] sm:$0xff]  ;;  %v8693_v47 = vld [vmem:[#allocation66_spill] sm:$0xff]  ;;  %v8694_v22 = vld [vmem:[#allocation21_spill] sm:$0xff] }
 0x1db   : > { %v3232_v1 = vadd.f32 %v8688_v44, %v3134_v36  ;;  %v2357_v24 = vadd.f32 %v2325_v58, %v2259_v61  ;;  %v6118_v34 = vmul.f32 %v8690_v37, %v8689_v31  ;;  %v6122_v42 = vmul.f32 %v8693_v47, %v8692_v38  ;;  %815 = vst.msk [vmem:[#allocation2 + $0x291] sm:$0xff] %vm459_vm0, %v661_v56  ;;  %v8695_v58 = vld [vmem:[#allocation81_spill] sm:$0xff]  ;;  %v8696_v37 = vld [vmem:[#allocation16_spill] sm:$0xff] }
 0x1dc   : > { %v1209_v9 = vadd.f32 %v1177_v2, %v1111_v50  ;;  %v1468_v59 = vmul.f32 %v4917_v35, %v6043_v63  ;;  %v1580_v27 = vadd.f32 %v1548_v41, %v1483_v21  ;;  %v1743_v54 = vmul.f32 %v5897_v52, %v8694_v22  ;;  %v4301_v2 = vld [vmem:[%s4582_s20 + $0x70] sm:$0xff]  ;;  %v1613_v63 = vld [vmem:[#allocation2 + $0xc2] sm:$0xff] }
 0x1dd   : > { %8691 = vst [vmem:[#allocation93_spill] sm:$0xff] %v6118_v34  ;;  %v3329_v36 = vadd.f32 %v8695_v58, %v3232_v1  ;;  %v1274_v61 = vmul.f32 %v8671_v25, %v6045_v16  ;;  %v2454_v44 = vadd.f32 %v2422_v43, %v2357_v24  ;;  %v8697_v34 = vld [vmem:[#allocation30_spill] sm:$0xff]  ;;  %v6136_v56 = vmul.f32 %v4898_v28, %v6047_v51  ;;  %v8702_v24 = vld [vmem:[#allocation44_spill] sm:$0xff] }
 0x1de   : > { %v1386_v47 = vadd.f32 %v8697_v34, %v8696_v37  ;;  %v6140_v50 = vmul.f32 %v8568_v20, %v6045_v16  ;;  %v6144_v52 = vmul.f32 %v8687_v17, %v6047_v51  ;;  %v1677_v41 = vadd.f32 %v1645_v19, %v1580_v27  ;;  %4203 = vmatmul.msk.f32.gmra.mxu2 %vm459_vm0, %v4301_v2  ;;  %v8701_v43 = vld [vmem:[#allocation82_spill] sm:$0xff]  ;;  %v4302_v34 = vld [vmem:[#allocation2 + $0xc1] sm:$0xff] }
 0x1df   : > { %8698 = vst [vmem:[#allocation94_spill] sm:$0xff] %v6136_v56  ;;  %v3426_v21 = vadd.f32 %v8701_v43, %v3329_v36  ;;  %v2551_v1 = vadd.f32 %v2519_v39, %v2454_v44  ;;  %v1549_v58 = vmul.f32 %v4302_v34, %v8568_v20  ;;  %v6151_v56 = vadd.f32 %v1274_v61, %v1209_v9  ;;  %v1711_v51 = vld [vmem:[#allocation2 + $0x140] sm:$0xff]  ;;  %v8710_v44 = vld [vmem:[#allocation22_spill] sm:$0xff] }
 0x1e0   : > { %8699 = vst [vmem:[#allocation84_spill] sm:$0xff] %v6140_v50  ;;  %v1484_v37 = vadd.f32 %v8702_v24, %v1386_v47  ;;  %v6153_v16 = vadd.f32 %v1468_v59, %v1402_v12  ;;  %v1775_v50 = vadd.f32 %v1743_v54, %v1677_v41  ;;  %v8706_v19 = vld [vmem:[#allocation43_spill] sm:$0xff]  ;;  %v1840_v9 = vmul.f32 %v5907_v15, %v8710_v44  ;;  %v8712_v61 = vld [vmem:[#allocation78_spill] sm:$0xff] }
 0x1e1   : > { %8700 = vst [vmem:[#allocation77_spill] sm:$0xff] %v6144_v52  ;;  %v8705_v52 = vld [vmem:[#allocation47_spill] sm:$0xff]  ;;  %v3462_v2 = vadd.f32 %v8653_v18, %v3426_v21  ;;  %v2649_v35 = vadd.f32 %v2617_v23, %v2551_v1  ;;  %v6158_v36 = vld [vmem:[#allocation2 + $0x210] sm:$0xff]  ;;  %v8713_v21 = vld [vmem:[#allocation24_spill] sm:$0xff]  ;;  %v1646_v1 = vmul.f32 %v8687_v17, %v1613_v63  ;;  %v1744_v24 = vmul.f32 %v8694_v22, %v1711_v51 }
 0x1e2   : > { %8703 = vst [vmem:[#allocation80_spill] sm:$0xff] %v6151_v56  ;;  %v1387_v27 = vadd.f32 %v8706_v19, %v8705_v52  ;;  %v6160_v39 = vld [vmem:[#allocation2 + $0x211] sm:$0xff]  ;;  %v1581_v12 = vadd.f32 %v1549_v58, %v1484_v37  ;;  %v887_v59 = vmul.f32 %v4722_v48, %v6158_v36  ;;  %v1178_v18 = vmul.f32 %v8641_v30, %v6158_v36  ;;  %v8711_v23 = vld [vmem:[#allocation23_spill] sm:$0xff] }
 0x1e3   : > { %8704 = vst [vmem:[#allocation95_spill] sm:$0xff] %v6153_v16  ;;  %v6162_v47 = vld [vmem:[#allocation2 + $0x212] sm:$0xff]  ;;  %v984_v54 = vmul.f32 %v4725_v49, %v6160_v39  ;;  %v1937_v52 = vmul.f32 %v8712_v61, %v8711_v23  ;;  %v1808_v41 = vld [vmem:[#allocation2 + $0x141] sm:$0xff]  ;;  %4162 = vmatmul.msk.f32.gmra.mxu1 %vm459_vm0, %v3462_v2  ;;  %v2746_v43 = vadd.f32 %v6081_v6, %v2649_v35 }
 0x1e4   : > { %8707 = vst [vmem:[#allocation96_spill] sm:$0xff] %v6158_v36  ;;  %v2034_v15 = vmul.f32 %v6037_v7, %v8713_v21  ;;  %v1081_v34 = vmul.f32 %v8673_v53, %v6162_v47  ;;  %v6183_v58 = vadd.f32 %v1178_v18, %v6071_v13  ;;  %v1872_v19 = vadd.f32 %v1840_v9, %v1775_v50  ;;  %v1905_v61 = vld [vmem:[#allocation2 + $0x142] sm:$0xff]  ;;  %v2293_v35 = vld [vmem:[#allocation2 + $0x130] sm:$0xff]  ;;  %v8714_v16 = vld [vmem:[#allocation46_spill] sm:$0xff] }
 0x1e5   : > { %8708 = vst [vmem:[#allocation21_spill] sm:$0xff] %v6160_v39  ;;  %v1016_v37 = vadd.f32 %v984_v54, %v887_v59  ;;  %v2843_v2 = vadd.f32 %v6091_v45, %v2746_v43  ;;  %v2390_v6 = vld [vmem:[#allocation2 + $0x131] sm:$0xff]  ;;  %v1678_v7 = vadd.f32 %v1646_v1, %v1581_v12  ;;  %v1841_v63 = vmul.f32 %v8710_v44, %v1808_v41  ;;  %v8716_v13 = vld [vmem:[#allocation48_spill] sm:$0xff]  ;;  %v8718_v12 = vld [vmem:[#allocation27_spill] sm:$0xff] }
 0x1e6   : > { %8709 = vst [vmem:[#allocation81_spill] sm:$0xff] %v6162_v47  ;;  %v2487_v56 = vld [vmem:[#allocation2 + $0x132] sm:$0xff]  ;;  %v1485_v51 = vadd.f32 %v8714_v16, %v1387_v27  ;;  %v1969_v54 = vadd.f32 %v1937_v52, %v1872_v19  ;;  %v2228_v41 = vmul.f32 %v6053_v4, %v8718_v12  ;;  %v1938_v16 = vmul.f32 %v8711_v23, %v1905_v61 }
 0x1e7   : > { %v6188_v59 = vadd.f32 %v1081_v34, %v1016_v37  ;;  %v8715_v36 = vld [vmem:[#allocation26_spill] sm:$0xff]  ;;  %v8717_v18 = vld [vmem:[#allocation45_spill] sm:$0xff]  ;;  %v2941_v45 = vadd.f32 %v6099_v14, %v2843_v2  ;;  %v1776_v43 = vadd.f32 %v1744_v24, %v1678_v7  ;;  %v2326_v52 = vmul.f32 %v8682_v55, %v2293_v35  ;;  %v598_v37 = vpop.f32.mrf.mxu0  ;;  %v616_v34 = vpop.f32.mrf.mxu3 }
 0x1e8   : > { %v2131_v28 = vmul.f32 %v6039_v46, %v8715_v36  ;;  %v6194_v50 = vadd.f32 %v8717_v18, %v8716_v13  ;;  %v4303_v9 = vld [vmem:[%s4582_s20 + $0x78] sm:$0xff]  ;;  %v2066_v27 = vadd.f32 %v2034_v15, %v1969_v54  ;;  %v2423_v46 = vmul.f32 %v8652_v62, %v2390_v6  ;;  %v2002_v19 = vld [vmem:[#allocation2 + $0x150] sm:$0xff] }
 0x1e9   : > { %4204 = vmatmul.msk.f32.gmra.mxu2 %vm459_vm0, %v4303_v9  ;;  %v2520_v1 = vmul.f32 %v8655_v33, %v2487_v56  ;;  %v3038_v13 = vadd.f32 %v6103_v32, %v2941_v45  ;;  %v599_v14 = vadd.f32 %v5503_v5, %v598_v37  ;;  %v617_v2 = vadd.f32 %v5503_v5, %v616_v34  ;;  %v2099_v35 = vld [vmem:[#allocation2 + $0x151] sm:$0xff] }
 0x1ea   : > { %v1873_v4 = vadd.f32 %v1841_v63, %v1776_v43  ;;  %v2163_v24 = vadd.f32 %v2131_v28, %v2066_v27  ;;  %v2618_v15 = vmul.f32 %v8590_v3, %v8658_v10  ;;  %v2035_v61 = vmul.f32 %v8713_v21, %v2002_v19  ;;  %v4304_v6 = vld [vmem:[#allocation2 + $0xd1] sm:$0xff]  ;;  %v6219_v63 = vld [vmem:[#allocation2 + $0x160] sm:$0xff] }
 0x1eb   : > { %v1550_v56 = vmul.f32 %v4304_v6, %v8568_v20  ;;  %v3135_v7 = vadd.f32 %v6107_v40, %v3038_v13  ;;  %v656_v54 = vmax.f32 %v599_v14, 0.0  ;;  %v662_v18 = vmax.f32 %v617_v2, 0.0  ;;  %v1614_v9 = vld [vmem:[#allocation2 + $0xd2] sm:$0xff]  ;;  %v8722_v6 = vld [vmem:[#allocation63_spill] sm:$0xff] }
 0x1ec   : > { %v1970_v32 = vadd.f32 %v1938_v16, %v1873_v4  ;;  %v2260_v45 = vadd.f32 %v2228_v41, %v2163_v24  ;;  %v2715_v5 = vmul.f32 %v8591_v26, %v8660_v57  ;;  %v6217_v28 = vmul.f32 %v8548_v60, %v8663_v11  ;;  %v2196_v10 = vld [vmem:[#allocation2 + $0x152] sm:$0xff] }
 0x1ed   : > { %v1582_v43 = vadd.f32 %v1550_v56, %v1485_v51  ;;  %v3233_v27 = vadd.f32 %v6111_v0, %v3135_v7  ;;  %v6224_v40 = vmul.f32 %v5311_v8, %v8685_v29  ;;  %v3169_v16 = vld [vmem:[#allocation2 + $0x1d0] sm:$0xff]  ;;  %810 = vst.msk [vmem:[#allocation2 + $0x221] sm:$0xff] %vm459_vm0, %v656_v54  ;;  %v2132_v57 = vmul.f32 %v8715_v36, %v2099_v35  ;;  %v8720_v51 = vld [vmem:[#allocation62_spill] sm:$0xff] }
 0x1ee   : > { %v2067_v41 = vadd.f32 %v2035_v61, %v1970_v32  ;;  %v2358_v37 = vadd.f32 %v2326_v52, %v2260_v45  ;;  %v8719_v11 = vld [vmem:[#allocation61_spill] sm:$0xff]  ;;  %v6234_v13 = vmul.f32 %v8720_v51, %v8692_v38  ;;  %816 = vst.msk [vmem:[#allocation2 + $0x2a1] sm:$0xff] %vm459_vm0, %v662_v18  ;;  %v1647_v29 = vmul.f32 %v8687_v17, %v1614_v9  ;;  %v4305_v61 = vld [vmem:[%s4582_s20 + $0x80] sm:$0xff] }
 0x1ef   : > { %v6230_v34 = vmul.f32 %v8719_v11, %v8689_v31  ;;  %v8721_v0 = vld [vmem:[#allocation93_spill] sm:$0xff]  ;;  %v2229_v24 = vmul.f32 %v8718_v12, %v2196_v10  ;;  %v2327_v52 = vmul.f32 %v8682_v55, %v6219_v63  ;;  %v6245_v38 = vmul.f32 %v8722_v6, %v3169_v16  ;;  %v601_v56 = vpop.f32.mrf.mxu0  ;;  %v619_v7 = vpop.f32.mrf.mxu3  ;;  %v6249_v45 = vld [vmem:[#allocation2 + $0x161] sm:$0xff] }
 0x1f0   : > { %v3330_v14 = vadd.f32 %v8721_v0, %v3233_v27  ;;  %v3266_v2 = vld [vmem:[#allocation2 + $0x1d1] sm:$0xff]  ;;  %v2164_v4 = vadd.f32 %v2132_v57, %v2067_v41  ;;  %v2455_v31 = vadd.f32 %v2423_v46, %v2358_v37  ;;  %v1679_v54 = vadd.f32 %v1647_v29, %v1582_v43  ;;  %v6254_v27 = vld [vmem:[%s8177_s2] ss:$0 sm:$0xff] }
 0x1f1   : > { %4205 = vmatmul.msk.f32.gmra.mxu2 %vm459_vm0, %v4305_v61  ;;  %v1745_v18 = vmul.f32 %v2002_v19, %v8694_v22  ;;  %8723 = vst [vmem:[#allocation16_spill] sm:$0xff] %v6254_v27  ;;  %v602_v46 = vadd.f32 %v6254_v27, %v601_v56  ;;  %v620_v16 = vadd.f32 %v6254_v27, %v619_v7  ;;  %v8724_v57 = vld [vmem:[#allocation65_spill] sm:$0xff] }
 0x1f2   : > { %v3427_v32 = vadd.f32 %v6122_v42, %v3330_v14  ;;  %v2261_v9 = vadd.f32 %v2229_v24, %v2164_v4  ;;  %v2552_v41 = vadd.f32 %v2520_v1, %v2455_v31  ;;  %v6259_v37 = vmul.f32 %v8724_v57, %v3266_v2  ;;  %v6265_v42 = vld [vmem:[%s8179_s4] ss:$0 sm:$0xff]  ;;  %v6268_v14 = vld [vmem:[#allocation2 + $0x162] sm:$0xff] }
 0x1f3   : > { %v1777_v43 = vadd.f32 %v1745_v18, %v1679_v54  ;;  %v1842_v19 = vmul.f32 %v2099_v35, %v8710_v44  ;;  %v657_v4 = vmax.f32 %v602_v46, 0.0  ;;  %v663_v24 = vmax.f32 %v620_v16, 0.0  ;;  %v8726_v46 = vld [vmem:[#allocation85_spill] sm:$0xff] }
 0x1f4   : > { %v3463_v29 = vadd.f32 %v6265_v42, %v3427_v32  ;;  %v2359_v0 = vadd.f32 %v2327_v52, %v2261_v9  ;;  %v2650_v61 = vadd.f32 %v2618_v15, %v2552_v41  ;;  %v6270_v1 = vld [vmem:[#allocation2 + $0x220] sm:$0xff]  ;;  %v2424_v35 = vmul.f32 %v8652_v62, %v6249_v45  ;;  %v3363_v41 = vld [vmem:[#allocation2 + $0x1d2] sm:$0xff] }
 0x1f5   : > { %v6272_v2 = vld [vmem:[#allocation2 + $0x221] sm:$0xff]  ;;  %v1874_v56 = vadd.f32 %v1842_v19, %v1777_v43  ;;  %v1939_v7 = vmul.f32 %v2196_v10, %v8711_v23  ;;  %v888_v52 = vmul.f32 %v4722_v48, %v6270_v1  ;;  %v1179_v54 = vmul.f32 %v8641_v30, %v6270_v1  ;;  %811 = vst.msk [vmem:[#allocation2 + $0x231] sm:$0xff] %vm459_vm0, %v657_v4  ;;  %v8729_v4 = vld [vmem:[#allocation97_spill] sm:$0xff] }
 0x1f6   : > { %8725 = vst [vmem:[#allocation30_spill] sm:$0xff] %v6272_v2  ;;  %v6274_v31 = vld [vmem:[#allocation2 + $0x222] sm:$0xff]  ;;  %4163 = vmatmul.msk.f32.gmra.mxu1 %vm459_vm0, %v3463_v29  ;;  %v985_v15 = vmul.f32 %v4725_v49, %v6272_v2  ;;  %v2036_v18 = vmul.f32 %v6219_v63, %v8713_v21  ;;  %v2747_v32 = vadd.f32 %v2715_v5, %v2650_v61  ;;  %v8727_v21 = vld [vmem:[#allocation17_spill] sm:$0xff] }
 0x1f7   : > { %v1082_v9 = vmul.f32 %v8673_v53, %v6274_v31  ;;  %v2521_v10 = vmul.f32 %v8655_v33, %v6268_v14  ;;  %v2619_v16 = vmul.f32 %v8590_v3, %v8726_v46  ;;  %v6296_v19 = vadd.f32 %v1179_v54, %v6188_v59  ;;  %817 = vst.msk [vmem:[#allocation2 + $0x2b1] sm:$0xff] %vm459_vm0, %v663_v24  ;;  %v8732_v54 = vld [vmem:[#allocation18_spill] sm:$0xff] }
 0x1f8   : > { %v1017_v43 = vadd.f32 %v985_v15, %v888_v52  ;;  %v2456_v29 = vadd.f32 %v2424_v35, %v2359_v0  ;;  %v1971_v5 = vadd.f32 %v1939_v7, %v1874_v56  ;;  %v6301_v61 = vmul.f32 %v8671_v25, %v6160_v39  ;;  %v4308_v15 = vld [vmem:[%s4582_s20 + $0x88] sm:$0xff]  ;;  %v6314_v56 = vld [vmem:[#allocation2 + $0x170] sm:$0xff]  ;;  %v604_v39 = vpop.f32.mrf.mxu0 }
 0x1f9   : > { %v6305_v23 = vmul.f32 %v8727_v21, %v6162_v47  ;;  %v2844_v46 = vadd.f32 %v6217_v28, %v2747_v32  ;;  %v2716_v52 = vmul.f32 %v8591_v26, %v8729_v4  ;;  %4206 = vmatmul.msk.f32.gmra.mxu2 %vm459_vm0, %v4308_v15  ;;  %v2133_v35 = vmul.f32 %v6249_v45, %v8715_v36  ;;  %v8731_v7 = vld [vmem:[#allocation96_spill] sm:$0xff]  ;;  %v8734_v32 = vld [vmem:[#allocation66_spill] sm:$0xff]  ;;  %v622_v15 = vpop.f32.mrf.mxu3 }
 0x1fa   : > { %v1114_v59 = vadd.f32 %v1082_v9, %v1017_v43  ;;  %v2553_v0 = vadd.f32 %v2521_v10, %v2456_v29  ;;  %v2068_v24 = vadd.f32 %v2036_v18, %v1971_v5  ;;  %8730 = vst [vmem:[#allocation44_spill] sm:$0xff] %v6314_v56  ;;  %v6318_v47 = vmul.f32 %v8732_v54, %v8731_v7  ;;  %v6322_v4 = vld [vmem:[#allocation2 + $0x171] sm:$0xff]  ;;  %v4309_v9 = vld [vmem:[#allocation2 + $0xe1] sm:$0xff] }
 0x1fb   : > { %8728 = vst [vmem:[#allocation82_spill] sm:$0xff] %v6305_v23  ;;  %v2942_v28 = vadd.f32 %v6224_v40, %v2844_v46  ;;  %v3396_v23 = vmul.f32 %v8734_v32, %v3363_v41  ;;  %v1551_v18 = vmul.f32 %v4309_v9, %v8568_v20  ;;  %v8735_v43 = vld [vmem:[#allocation87_spill] sm:$0xff]  ;;  %v8736_v5 = vld [vmem:[#allocation98_spill] sm:$0xff]  ;;  %v2230_v46 = vmul.f32 %v6268_v14, %v8718_v12 }
 0x1fc   : > { %8733 = vst [vmem:[#allocation47_spill] sm:$0xff] %v6318_v47  ;;  %v2651_v10 = vadd.f32 %v2619_v16, %v2553_v0  ;;  %v2813_v29 = vmul.f32 %v8548_v60, %v8735_v43  ;;  %v2911_v36 = vmul.f32 %v5311_v8, %v8736_v5  ;;  %v2165_v7 = vadd.f32 %v2133_v35, %v2068_v24  ;;  %v8737_v40 = vld [vmem:[#allocation99_spill] sm:$0xff]  ;;  %v6336_v9 = vld [vmem:[#allocation2 + $0x172] sm:$0xff] }
 0x1fd   : > { %v3039_v47 = vadd.f32 %v6230_v34, %v2942_v28  ;;  %v3008_v41 = vmul.f32 %v8719_v11, %v8737_v40  ;;  %v2328_v54 = vmul.f32 %v8682_v55, %v6314_v56  ;;  %v6338_v0 = vld [vmem:[#allocation2 + $0x230] sm:$0xff]  ;;  %v2425_v34 = vmul.f32 %v8652_v62, %v6322_v4 }
 0x1fe   : > { %v2748_v16 = vadd.f32 %v2716_v52, %v2651_v10  ;;  %8738 = vst [vmem:[#allocation43_spill] sm:$0xff] %v6338_v0  ;;  %v6340_v43 = vld [vmem:[#allocation2 + $0x231] sm:$0xff]  ;;  %v605_v24 = vadd.f32 %v6254_v27, %v604_v39  ;;  %v623_v35 = vadd.f32 %v6254_v27, %v622_v15  ;;  %v889_v55 = vmul.f32 %v4722_v48, %v6338_v0  ;;  %v1615_v48 = vld [vmem:[#allocation2 + $0xe2] sm:$0xff] }
 0x1ff   : > { %8739 = vst [vmem:[#allocation22_spill] sm:$0xff] %v6340_v43  ;;  %v6342_v20 = vld [vmem:[#allocation2 + $0x232] sm:$0xff]  ;;  %v3136_v28 = vadd.f32 %v6234_v13, %v3039_v47  ;;  %v986_v52 = vmul.f32 %v4725_v49, %v6340_v43  ;;  %v2262_v10 = vadd.f32 %v2230_v46, %v2165_v7  ;;  %v1180_v56 = vmul.f32 %v8641_v30, %v6338_v0 }
 0x200   : > { %8740 = vst [vmem:[#allocation78_spill] sm:$0xff] %v6342_v20  ;;  %v2845_v12 = vadd.f32 %v2813_v29, %v2748_v16  ;;  %v2522_v62 = vmul.f32 %v8655_v33, %v6336_v9  ;;  %v2620_v39 = vmul.f32 %v8590_v3, %v8736_v5  ;;  %v1083_v13 = vmul.f32 %v8673_v53, %v6342_v20  ;;  %v4310_v49 = vld [vmem:[%s4582_s20 + $0x90] sm:$0xff] }
 0x201   : > { %v3234_v15 = vadd.f32 %v6245_v38, %v3136_v28  ;;  %v1018_v47 = vadd.f32 %v986_v52, %v889_v55  ;;  %v2360_v27 = vadd.f32 %v2328_v54, %v2262_v10  ;;  %4207 = vmatmul.msk.f32.gmra.mxu2 %vm459_vm0, %v4310_v49  ;;  %v1212_v29 = vadd.f32 %v1180_v56, %v1114_v59  ;;  %v8741_v38 = vld [vmem:[#allocation50_spill] sm:$0xff]  ;;  %v8742_v52 = vld [vmem:[#allocation91_spill] sm:$0xff]  ;;  %v8745_v56 = vld [vmem:[#allocation92_spill] sm:$0xff] }
 0x202   : > { %v2943_v7 = vadd.f32 %v2911_v36, %v2845_v12  ;;  %v658_v46 = vmax.f32 %v605_v24, 0.0  ;;  %v664_v16 = vmax.f32 %v623_v35, 0.0  ;;  %v1486_v55 = vadd.f32 %v8741_v38, %v6194_v50  ;;  %v8743_v10 = vld [vmem:[#allocation79_spill] sm:$0xff] }
 0x203   : > { %v3331_v30 = vadd.f32 %v6259_v37, %v3234_v15  ;;  %v6365_v33 = vadd.f32 %v1083_v13, %v1018_v47  ;;  %v2457_v5 = vadd.f32 %v2425_v34, %v2360_v27  ;;  %v3105_v54 = vmul.f32 %v8720_v51, %v8742_v52  ;;  %v8746_v34 = vld [vmem:[#allocation90_spill] sm:$0xff] }
 0x204   : > { %v3040_v28 = vadd.f32 %v3008_v41, %v2943_v7  ;;  %v3203_v53 = vmul.f32 %v8722_v6, %v8743_v10  ;;  %812 = vst.msk [vmem:[#allocation2 + $0x241] sm:$0xff] %vm459_vm0, %v658_v46  ;;  %v1648_v49 = vmul.f32 %v8687_v17, %v1615_v48  ;;  %v1583_v37 = vadd.f32 %v1551_v18, %v1486_v55  ;;  %v8749_v13 = vld [vmem:[#allocation18_spill] sm:$0xff]  ;;  %v8751_v55 = vld [vmem:[#allocation96_spill] sm:$0xff] }
 0x205   : > { %v3428_v36 = vadd.f32 %v3396_v23, %v3331_v30  ;;  %v2554_v12 = vadd.f32 %v2522_v62, %v2457_v5  ;;  %818 = vst.msk [vmem:[#allocation2 + $0x2c1] sm:$0xff] %vm459_vm0, %v664_v16  ;;  %v1746_v27 = vmul.f32 %v6219_v63, %v8694_v22  ;;  %v6380_v50 = vadd.f32 %v6301_v61, %v6183_v58  ;;  %v4311_v16 = vld [vmem:[%s4582_s20 + $0x98] sm:$0xff] }
 0x206   : > { %v3137_v59 = vadd.f32 %v3105_v54, %v3040_v28  ;;  %v3300_v41 = vmul.f32 %v8724_v57, %v8745_v56  ;;  %v3397_v24 = vmul.f32 %v8734_v32, %v8746_v34  ;;  %v2717_v30 = vmul.f32 %v8591_v26, %v8737_v40  ;;  %v8752_v54 = vld [vmem:[#allocation23_spill] sm:$0xff] }
 0x207   : > { %8744 = vst [vmem:[#allocation46_spill] sm:$0xff] %v6380_v50  ;;  %v3464_v48 = vadd.f32 %v6265_v42, %v3428_v36  ;;  %v2652_v62 = vadd.f32 %v2620_v39, %v2554_v12  ;;  %v1680_v23 = vadd.f32 %v1648_v49, %v1583_v37  ;;  %v1276_v63 = vmul.f32 %v8671_v25, %v6272_v2  ;;  %v8753_v36 = vld [vmem:[#allocation24_spill] sm:$0xff] }
 0x208   : > { %v6393_v58 = vmul.f32 %v8727_v21, %v6274_v31  ;;  %v3235_v61 = vadd.f32 %v3203_v53, %v3137_v59  ;;  %v2814_v18 = vmul.f32 %v8548_v60, %v8742_v52  ;;  %v2912_v39 = vmul.f32 %v5311_v8, %v8743_v10  ;;  %v8754_v12 = vld [vmem:[#allocation44_spill] sm:$0xff] }
 0x209   : > { %4164 = vmatmul.msk.f32.gmra.mxu1 %vm459_vm0, %v3464_v48  ;;  %v2749_v35 = vadd.f32 %v2717_v30, %v2652_v62  ;;  %v1778_v15 = vadd.f32 %v1746_v27, %v1680_v23  ;;  %v1843_v40 = vmul.f32 %v6249_v45, %v8710_v44  ;;  %v6403_v47 = vadd.f32 %v1276_v63, %v6296_v19  ;;  %v6423_v27 = vld [vmem:[#allocation2 + $0x180] sm:$0xff]  ;;  %v8757_v48 = vld [vmem:[#allocation21_spill] sm:$0xff] }
 0x20a   : > { %8747 = vst [vmem:[#allocation48_spill] sm:$0xff] %v6393_v58  ;;  %v6407_v7 = vmul.f32 %v8749_v13, %v6270_v1  ;;  %v3332_v53 = vadd.f32 %v3300_v41, %v3235_v61  ;;  %v3009_v46 = vmul.f32 %v8719_v11, %v8745_v56  ;;  %4208 = vmatmul.msk.f32.gmra.mxu2 %vm459_vm0, %v4311_v16  ;;  %v6433_v23 = vld [vmem:[#allocation2 + $0x181] sm:$0xff] }
 0x20b   : > { %8748 = vst [vmem:[#allocation45_spill] sm:$0xff] %v6403_v47  ;;  %v2846_v5 = vadd.f32 %v2814_v18, %v2749_v35  ;;  %v3106_v38 = vmul.f32 %v8720_v51, %v8746_v34  ;;  %v3204_v45 = vmul.f32 %v8722_v6, %v8751_v55  ;;  %v1875_v19 = vadd.f32 %v1843_v40, %v1778_v15  ;;  %v6435_v63 = vld [vmem:[#allocation2 + $0x182] sm:$0xff]  ;;  %v8771_v47 = vld [vmem:[#allocation49_spill] sm:$0xff] }
 0x20c   : > { %8750 = vst [vmem:[#allocation61_spill] sm:$0xff] %v6407_v7  ;;  %v3429_v28 = vadd.f32 %v3397_v24, %v3332_v53  ;;  %v1277_v52 = vmul.f32 %v8671_v25, %v6340_v43  ;;  %v1940_v49 = vmul.f32 %v6268_v14, %v8752_v54  ;;  %v2037_v37 = vmul.f32 %v8754_v12, %v8753_v36  ;;  %v8758_v24 = vld [vmem:[#allocation81_spill] sm:$0xff]  ;;  %v6444_v35 = vld [vmem:[#allocation2 + $0x240] sm:$0xff]  ;;  %v8765_v53 = vld [vmem:[#allocation26_spill] sm:$0xff] }
 0x20d   : > { %8755 = vst [vmem:[#allocation62_spill] sm:$0xff] %v6423_v27  ;;  %v6427_v59 = vmul.f32 %v8727_v21, %v6342_v20  ;;  %v2944_v41 = vadd.f32 %v2912_v39, %v2846_v5  ;;  %v3301_v62 = vmul.f32 %v8724_v57, %v8757_v48  ;;  %v3398_v30 = vmul.f32 %v8734_v32, %v8758_v24  ;;  %v6446_v40 = vld [vmem:[#allocation2 + $0x241] sm:$0xff] }
 0x20e   : > { %8759 = vst [vmem:[#allocation63_spill] sm:$0xff] %v6433_v23  ;;  %v3465_v14 = vadd.f32 %v6265_v42, %v3429_v28  ;;  %v6438_v61 = vadd.f32 %v1277_v52, %v1212_v29  ;;  %v6442_v18 = vmul.f32 %v8749_v13, %v6338_v0  ;;  %v1972_v39 = vadd.f32 %v1940_v49, %v1875_v19  ;;  %v8766_v5 = vld [vmem:[#allocation27_spill] sm:$0xff]  ;;  %v625_v49 = vpop.f32.mrf.mxu3  ;;  %v8773_v0 = vld [vmem:[#allocation16_spill] sm:$0xff] }
 0x20f   : > { %8756 = vst [vmem:[#allocation93_spill] sm:$0xff] %v6427_v59  ;;  %v3041_v15 = vadd.f32 %v3009_v46, %v2944_v41  ;;  %v2134_v16 = vmul.f32 %v6322_v4, %v8765_v53  ;;  %v2231_v59 = vmul.f32 %v6336_v9, %v8766_v5  ;;  %v8767_v28 = vld [vmem:[#allocation31_spill] sm:$0xff]  ;;  %v607_v46 = vpop.f32.mrf.mxu0  ;;  %v8770_v41 = vld [vmem:[#allocation53_spill] sm:$0xff] }
 0x210   : > { %8760 = vst [vmem:[#allocation65_spill] sm:$0xff] %v6435_v63  ;;  %v2329_v29 = vmul.f32 %v8767_v28, %v6423_v27  ;;  %v2069_v52 = vadd.f32 %v2037_v37, %v1972_v39  ;;  %v1389_v7 = vadd.f32 %v8771_v47, %v8770_v41  ;;  %v8772_v20 = vld [vmem:[#allocation11_spill] sm:$0xff]  ;;  %v608_v37 = vadd.f32 %v8773_v0, %v607_v46  ;;  %v8774_v28 = vld [vmem:[#allocation12_spill] sm:$0xff]  ;;  %v4312_v53 = vld [vmem:[#allocation2 + $0xf1] sm:$0xff] }
 0x211   : > { %8761 = vst [vmem:[#allocation85_spill] sm:$0xff] %v6438_v61  ;;  %v8768_v61 = vld [vmem:[#allocation39_spill] sm:$0xff]  ;;  %4165 = vmatmul.msk.f32.gmra.mxu1 %vm459_vm0, %v3465_v14  ;;  %v3138_v50 = vadd.f32 %v3106_v38, %v3041_v15  ;;  %v890_v43 = vmul.f32 %v8772_v20, %v6444_v35  ;;  %v626_v39 = vadd.f32 %v8773_v0, %v625_v49  ;;  %v8777_v14 = vld [vmem:[#allocation14_spill] sm:$0xff] }
 0x212   : > { %8762 = vst [vmem:[#allocation97_spill] sm:$0xff] %v6442_v18  ;;  %v2426_v58 = vmul.f32 %v8768_v61, %v6433_v23  ;;  %v8769_v18 = vld [vmem:[#allocation40_spill] sm:$0xff]  ;;  %v1616_v61 = vld [vmem:[#allocation2 + $0xf2] sm:$0xff]  ;;  %v987_v5 = vmul.f32 %v8774_v28, %v6446_v40  ;;  %v8776_v27 = vld [vmem:[#allocation19_spill] sm:$0xff]  ;;  %v1181_v15 = vmul.f32 %v8777_v14, %v6444_v35  ;;  %v659_v46 = vmax.f32 %v608_v37, 0.0 }
 0x213   : > { %8763 = vst [vmem:[#allocation87_spill] sm:$0xff] %v6444_v35  ;;  %v2523_v19 = vmul.f32 %v8769_v18, %v6435_v63  ;;  %v2166_v18 = vadd.f32 %v2134_v16, %v2069_v52  ;;  %v8775_v63 = vld [vmem:[#allocation52_spill] sm:$0xff]  ;;  %v1552_v47 = vmul.f32 %v4312_v53, %v8776_v27  ;;  %v4313_v41 = vld [vmem:[%s4582_s20 + $0xa0] sm:$0xff]  ;;  %v3236_v38 = vadd.f32 %v3204_v45, %v3138_v50 }
 0x214   : > { %8764 = vst [vmem:[#allocation98_spill] sm:$0xff] %v6446_v40  ;;  %v1487_v23 = vadd.f32 %v8775_v63, %v1389_v7  ;;  %4209 = vmatmul.msk.f32.gmra.mxu2 %vm459_vm0, %v4313_v41  ;;  %v665_v20 = vmax.f32 %v626_v39, 0.0  ;;  %v1649_v36 = vmul.f32 %v8687_v17, %v1616_v61  ;;  %v1747_v16 = vmul.f32 %v8754_v12, %v8694_v22  ;;  %v6483_v45 = vld [vmem:[#allocation2 + $0x242] sm:$0xff] }
 0x215   : > { %v2263_v49 = vadd.f32 %v2231_v59, %v2166_v18  ;;  %v3333_v7 = vadd.f32 %v3301_v62, %v3236_v38  ;;  %v2621_v63 = vmul.f32 %v8590_v3, %v8743_v10  ;;  %v2718_v53 = vmul.f32 %v8591_v26, %v8745_v56  ;;  %813 = vst.msk [vmem:[#allocation2 + $0x251] sm:$0xff] %vm459_vm0, %v659_v46  ;;  %v8782_v39 = vld [vmem:[#allocation56_spill] sm:$0xff] }
 0x216   : > { %v1584_v0 = vadd.f32 %v1552_v47, %v1487_v23  ;;  %v2815_v50 = vmul.f32 %v8548_v60, %v8746_v34  ;;  %8778 = vst [vmem:[#allocation99_spill] sm:$0xff] %v6483_v45  ;;  %v2913_v23 = vmul.f32 %v5311_v8, %v8751_v55  ;;  %v6489_v12 = vmul.f32 %v8719_v11, %v8757_v48  ;;  %v4314_v41 = vld [vmem:[%s4582_s20 + $0xa8] sm:$0xff] }
 0x217   : > { %v2361_v59 = vadd.f32 %v2329_v29, %v2263_v49  ;;  %819 = vst.msk [vmem:[#allocation2 + $0x2d1] sm:$0xff] %vm459_vm0, %v665_v20  ;;  %v3430_v62 = vadd.f32 %v3398_v30, %v3333_v7  ;;  %v1019_v56 = vadd.f32 %v987_v5, %v890_v43  ;;  %v6494_v34 = vmul.f32 %v8720_v51, %v8758_v24  ;;  %v8784_v46 = vld [vmem:[#allocation24_spill] sm:$0xff]  ;;  %v8785_v49 = vld [vmem:[#allocation62_spill] sm:$0xff] }
 0x218   : > { %v1681_v10 = vadd.f32 %v1649_v36, %v1584_v0  ;;  %v6498_v61 = vmul.f32 %v8722_v6, %v6270_v1  ;;  %v1213_v18 = vadd.f32 %v1181_v15, %v6365_v33  ;;  %v1844_v37 = vmul.f32 %v6322_v4, %v8710_v44  ;;  %v8779_v0 = vld [vmem:[#allocation13_spill] sm:$0xff]  ;;  %v8783_v4 = vld [vmem:[#allocation51_spill] sm:$0xff] }
 0x219   : > { %v2458_v29 = vadd.f32 %v2426_v58, %v2361_v59  ;;  %v3466_v20 = vadd.f32 %v6265_v42, %v3430_v62  ;;  %v1084_v43 = vmul.f32 %v8779_v0, %v6483_v45  ;;  %v1278_v36 = vmul.f32 %v8671_v25, %v6446_v40  ;;  %v1617_v7 = vld [vmem:[#allocation2 + $0x102] sm:$0xff]  ;;  %v6553_v40 = vld [vmem:[#allocation2 + $0x190] sm:$0xff] }
 0x21a   : > { %v1779_v52 = vadd.f32 %v1747_v16, %v1681_v10  ;;  %v6510_v30 = vmul.f32 %v8727_v21, %v6483_v45  ;;  %v6514_v33 = vmul.f32 %v8749_v13, %v6444_v35  ;;  %v1390_v47 = vadd.f32 %v8783_v4, %v8782_v39  ;;  %v8791_v4 = vld [vmem:[#allocation11_spill] sm:$0xff]  ;;  %v6560_v35 = vld [vmem:[#allocation2 + $0x192] sm:$0xff]  ;;  %v8798_v13 = vld [vmem:[#allocation16_spill] sm:$0xff] }
 0x21b   : > { %v2555_v58 = vadd.f32 %v2523_v19, %v2458_v29  ;;  %4166 = vmatmul.msk.f32.gmra.mxu1 %vm459_vm0, %v3466_v20  ;;  %v6523_v38 = vmul.f32 %v8724_v57, %v6272_v2  ;;  %v6527_v15 = vmul.f32 %v8734_v32, %v6274_v31  ;;  %v1941_v19 = vmul.f32 %v6336_v9, %v8752_v54  ;;  %v8790_v20 = vld [vmem:[#allocation55_spill] sm:$0xff] }
 0x21c   : > { %8780 = vst [vmem:[#allocation50_spill] sm:$0xff] %v6510_v30  ;;  %v1876_v5 = vadd.f32 %v1844_v37, %v1779_v52  ;;  %4210 = vmatmul.msk.f32.gmra.mxu2 %vm459_vm0, %v4314_v41  ;;  %v2038_v16 = vmul.f32 %v8785_v49, %v8784_v46  ;;  %v6533_v59 = vadd.f32 %v1084_v43, %v1019_v56  ;;  %v6537_v29 = vld [vmem:[#allocation2 + $0x250] sm:$0xff]  ;;  %v4315_v56 = vld [vmem:[#allocation2 + $0x101] sm:$0xff] }
 0x21d   : > { %8781 = vst [vmem:[#allocation91_spill] sm:$0xff] %v6514_v33  ;;  %v6535_v10 = vadd.f32 %v1278_v36, %v1213_v18  ;;  %v2653_v62 = vadd.f32 %v2621_v63, %v2555_v58  ;;  %v6539_v52 = vld [vmem:[#allocation2 + $0x251] sm:$0xff]  ;;  %v1488_v39 = vadd.f32 %v8790_v20, %v1390_v47  ;;  %v891_v9 = vmul.f32 %v8791_v4, %v6537_v29  ;;  %v8793_v36 = vld [vmem:[#allocation63_spill] sm:$0xff] }
 0x21e   : > { %8787 = vst [vmem:[#allocation92_spill] sm:$0xff] %v6537_v29  ;;  %v6541_v37 = vld [vmem:[#allocation2 + $0x252] sm:$0xff]  ;;  %v988_v41 = vmul.f32 %v8774_v28, %v6539_v52  ;;  %v1973_v30 = vadd.f32 %v1941_v19, %v1876_v5  ;;  %v1553_v18 = vmul.f32 %v4315_v56, %v8776_v27  ;;  %v1650_v47 = vmul.f32 %v8687_v17, %v1617_v7  ;;  %v610_v19 = vpop.f32.mrf.mxu0 }
 0x21f   : > { %8786 = vst [vmem:[#allocation79_spill] sm:$0xff] %v6535_v10  ;;  %v2750_v43 = vadd.f32 %v2718_v53, %v2653_v62  ;;  %v8792_v63 = vld [vmem:[#allocation26_spill] sm:$0xff]  ;;  %v8794_v10 = vld [vmem:[#allocation27_spill] sm:$0xff]  ;;  %v8795_v33 = vld [vmem:[#allocation65_spill] sm:$0xff]  ;;  %v1085_v4 = vmul.f32 %v8779_v0, %v6541_v37  ;;  %v628_v53 = vpop.f32.mrf.mxu3  ;;  %v611_v21 = vadd.f32 %v8798_v13, %v610_v19  ;;  %v1748_v7 = vmul.f32 %v8785_v49, %v8694_v22 }
 0x220   : > { %8788 = vst [vmem:[#allocation90_spill] sm:$0xff] %v6539_v52  ;;  %v2135_v58 = vmul.f32 %v8793_v36, %v8792_v63  ;;  %v2232_v45 = vmul.f32 %v8795_v33, %v8794_v10  ;;  %v1020_v20 = vadd.f32 %v988_v41, %v891_v9  ;;  %v2070_v28 = vadd.f32 %v2038_v16, %v1973_v30  ;;  %v6558_v5 = vld [vmem:[#allocation2 + $0x191] sm:$0xff]  ;;  %v8799_v30 = vld [vmem:[#allocation31_spill] sm:$0xff] }
 0x221   : > { %8789 = vst [vmem:[#allocation96_spill] sm:$0xff] %v6541_v37  ;;  %v1585_v62 = vadd.f32 %v1553_v18, %v1488_v39  ;;  %v2847_v56 = vadd.f32 %v2815_v50, %v2750_v43  ;;  %v629_v25 = vadd.f32 %v8798_v13, %v628_v53  ;;  %v2330_v16 = vmul.f32 %v8799_v30, %v6553_v40  ;;  %v8800_v39 = vld [vmem:[#allocation39_spill] sm:$0xff]  ;;  %v4316_v52 = vld [vmem:[%s4582_s20 + $0xb0] sm:$0xff]  ;;  %v8801_v53 = vld [vmem:[#allocation40_spill] sm:$0xff] }
 0x222   : > { %8796 = vst [vmem:[#allocation23_spill] sm:$0xff] %v6558_v5  ;;  %v6566_v9 = vadd.f32 %v1085_v4, %v1020_v20  ;;  %v2167_v0 = vadd.f32 %v2135_v58, %v2070_v28  ;;  %v2427_v50 = vmul.f32 %v8800_v39, %v6558_v5  ;;  %v660_v18 = vmax.f32 %v611_v21, 0.0 }
 0x223   : > { %8797 = vst [vmem:[#allocation44_spill] sm:$0xff] %v6560_v35  ;;  %v1682_v41 = vadd.f32 %v1650_v47, %v1585_v62  ;;  %v2945_v37 = vadd.f32 %v2913_v23, %v2847_v56  ;;  %v666_v43 = vmax.f32 %v629_v25, 0.0  ;;  %v2524_v49 = vmul.f32 %v8801_v53, %v6560_v35  ;;  %v8802_v62 = vld [vmem:[#allocation43_spill] sm:$0xff]  ;;  %v8803_v56 = vld [vmem:[#allocation22_spill] sm:$0xff] }
 0x224   : > { %4211 = vmatmul.msk.f32.gmra.mxu2 %vm459_vm0, %v4316_v52  ;;  %v2264_v19 = vadd.f32 %v2232_v45, %v2167_v0  ;;  %v1845_v58 = vmul.f32 %v8793_v36, %v8710_v44  ;;  %v2622_v23 = vmul.f32 %v8590_v3, %v8751_v55  ;;  %v2719_v21 = vmul.f32 %v8591_v26, %v8757_v48  ;;  %v6627_v48 = vld [vmem:[#allocation2 + $0x280] sm:$0xff] }
 0x225   : > { %v1780_v20 = vadd.f32 %v1748_v7, %v1682_v41  ;;  %v3042_v4 = vadd.f32 %v6489_v12, %v2945_v37  ;;  %v2816_v25 = vmul.f32 %v8548_v60, %v8758_v24  ;;  %814 = vst.msk [vmem:[#allocation2 + $0x261] sm:$0xff] %vm459_vm0, %v660_v18  ;;  %v1942_v36 = vmul.f32 %v8795_v33, %v8752_v54  ;;  %v8805_v41 = vld [vmem:[#allocation78_spill] sm:$0xff] }
 0x226   : > { %v2362_v45 = vadd.f32 %v2330_v16, %v2264_v19  ;;  %820 = vst.msk [vmem:[#allocation2 + $0x2e1] sm:$0xff] %vm459_vm0, %v666_v43  ;;  %v2039_v12 = vmul.f32 %v6553_v40, %v8784_v46  ;;  %v2914_v37 = vmul.f32 %v5311_v8, %v6270_v1  ;;  %v6596_v24 = vmul.f32 %v8719_v11, %v6272_v2  ;;  %v8808_v43 = vld [vmem:[#allocation57_spill] sm:$0xff]  ;;  %v8809_v19 = vld [vmem:[#allocation54_spill] sm:$0xff] }
 0x227   : > { %v1877_v52 = vadd.f32 %v1845_v58, %v1780_v20  ;;  %v3139_v55 = vadd.f32 %v6494_v34, %v3042_v4  ;;  %v6600_v47 = vmul.f32 %v8720_v51, %v6274_v31  ;;  %v6604_v33 = vmul.f32 %v8722_v6, %v8802_v62  ;;  %8812 = vst [vmem:[#allocation12_spill] sm:$0xff] %v6627_v48 }
 0x228   : > { %v2459_v28 = vadd.f32 %v2427_v50, %v2362_v45  ;;  %v6608_v7 = vmul.f32 %v8724_v57, %v8803_v56  ;;  %v1182_v16 = vmul.f32 %v8777_v14, %v6537_v29  ;;  %v6615_v18 = vmul.f32 %v8734_v32, %v8805_v41  ;;  %v6617_v50 = vld [vmem:[#allocation2 + $0x1a0] sm:$0xff] }
 0x229   : > { %v1974_v34 = vadd.f32 %v1942_v36, %v1877_v52  ;;  %v3237_v0 = vadd.f32 %v6498_v61, %v3139_v55  ;;  %8807 = vst [vmem:[#allocation49_spill] sm:$0xff] %v6617_v50  ;;  %v6621_v20 = vadd.f32 %v8809_v19, %v8808_v43  ;;  %v2136_v45 = vmul.f32 %v6558_v5, %v8792_v63  ;;  %v631_v61 = vpop.f32.mrf.mxu3  ;;  %v8810_v52 = vld [vmem:[#allocation95_spill] sm:$0xff]  ;;  %v8811_v36 = vld [vmem:[#allocation84_spill] sm:$0xff] }
 0x22a   : > { %8804 = vst [vmem:[#allocation81_spill] sm:$0xff] %v6608_v7  ;;  %v2556_v58 = vadd.f32 %v2524_v49, %v2459_v28  ;;  %v1597_v55 = vadd.f32 %v8811_v36, %v8810_v52  ;;  %v6629_v7 = vld [vmem:[#allocation2 + $0x281] sm:$0xff]  ;;  %v2233_v32 = vmul.f32 %v6560_v35, %v8794_v10  ;;  %v632_v43 = vadd.f32 %v8798_v13, %v631_v61  ;;  %v8815_v36 = vld [vmem:[#allocation77_spill] sm:$0xff] }
 0x22b   : > { %8806 = vst [vmem:[#allocation53_spill] sm:$0xff] %v6615_v18  ;;  %v2071_v4 = vadd.f32 %v2039_v12, %v1974_v34  ;;  %v3334_v18 = vadd.f32 %v6523_v38, %v3237_v0  ;;  %v1760_v49 = vmul.f32 %v8694_v22, %v6627_v48  ;;  %v4317_v12 = vld [vmem:[%s4582_s20 + $0xb8] sm:$0xff]  ;;  %v2331_v52 = vmul.f32 %v8799_v30, %v6617_v50  ;;  %v6644_v0 = vld [vmem:[#allocation2 + $0x282] sm:$0xff] }
 0x22c   : > { %8813 = vst [vmem:[#allocation52_spill] sm:$0xff] %v6629_v7  ;;  %4212 = vmatmul.msk.f32.gmra.mxu2 %vm459_vm0, %v4317_v12  ;;  %v2654_v28 = vadd.f32 %v2622_v23, %v2556_v58  ;;  %v6639_v34 = vld [vmem:[#allocation2 + $0x260] sm:$0xff]  ;;  %v1694_v38 = vadd.f32 %v8815_v36, %v1597_v55  ;;  %v1857_v23 = vmul.f32 %v8710_v44, %v6629_v7  ;;  %v4318_v58 = vld [vmem:[#allocation2 + $0x111] sm:$0xff]  ;;  %v667_v36 = vmax.f32 %v632_v43, 0.0 }
 0x22d   : > { %8814 = vst [vmem:[#allocation14_spill] sm:$0xff] %v6639_v34  ;;  %v2168_v19 = vadd.f32 %v2136_v45, %v2071_v4  ;;  %v3431_v35 = vadd.f32 %v6527_v15, %v3334_v18  ;;  %v1183_v61 = vmul.f32 %v8777_v14, %v6639_v34  ;;  %v6649_v48 = vld [vmem:[#allocation2 + $0x1a1] sm:$0xff]  ;;  %v1554_v4 = vmul.f32 %v4318_v58, %v8776_v27  ;;  %v1618_v45 = vld [vmem:[#allocation2 + $0x112] sm:$0xff] }
 0x22e   : > { %8816 = vst [vmem:[#allocation13_spill] sm:$0xff] %v6644_v0  ;;  %v1214_v12 = vadd.f32 %v1182_v16, %v6533_v59  ;;  %v2751_v13 = vadd.f32 %v2719_v21, %v2654_v28  ;;  %v6659_v14 = vld [vmem:[#allocation2 + $0x1a2] sm:$0xff]  ;;  %v1792_v18 = vadd.f32 %v1760_v49, %v1694_v38  ;;  %v1954_v7 = vmul.f32 %v8752_v54, %v6644_v0  ;;  %v8821_v59 = vld [vmem:[#allocation90_spill] sm:$0xff]  ;;  %v8824_v43 = vld [vmem:[#allocation17_spill] sm:$0xff] }
 0x22f   : > { %8817 = vst [vmem:[#allocation56_spill] sm:$0xff] %v6649_v48  ;;  %v2265_v55 = vadd.f32 %v2233_v32, %v2168_v19  ;;  %v3467_v50 = vadd.f32 %v6265_v42, %v3431_v35  ;;  %v6657_v15 = vadd.f32 %v1183_v61, %v6566_v9  ;;  %v2428_v58 = vmul.f32 %v8800_v39, %v6649_v48  ;;  %v6666_v32 = vld [vmem:[#allocation2 + $0x290] sm:$0xff]  ;;  %v8822_v9 = vld [vmem:[#allocation15_spill] sm:$0xff]  ;;  %v8823_v16 = vld [vmem:[#allocation96_spill] sm:$0xff] }
 0x230   : > { %8819 = vst [vmem:[#allocation62_spill] sm:$0xff] %v6659_v14  ;;  %v2848_v34 = vadd.f32 %v2816_v25, %v2751_v13  ;;  %v1651_v35 = vmul.f32 %v8687_v17, %v1618_v45  ;;  %v1279_v21 = vmul.f32 %v8822_v9, %v8821_v59  ;;  %v6674_v49 = vmul.f32 %v8824_v43, %v8823_v16  ;;  %v8826_v13 = vld [vmem:[#allocation18_spill] sm:$0xff]  ;;  %v2699_v43 = vld [vmem:[#allocation2 + $0x321] sm:$0xff] }
 0x231   : > { %8818 = vst [vmem:[#allocation51_spill] sm:$0xff] %v6657_v15  ;;  %v2363_v5 = vadd.f32 %v2331_v52, %v2265_v55  ;;  %4167 = vmatmul.msk.f32.gmra.mxu1 %vm459_vm0, %v3467_v50  ;;  %v6678_v25 = vmul.f32 %v8826_v13, %v6537_v29  ;;  %v1889_v28 = vadd.f32 %v1857_v23, %v1792_v18  ;;  %v6684_v61 = vld [vmem:[#allocation2 + $0x291] sm:$0xff]  ;;  %v2796_v9 = vld [vmem:[#allocation2 + $0x322] sm:$0xff] }
 0x232   : > { %821 = vst.msk [vmem:[#allocation2 + $0x2f1] sm:$0xff] %vm459_vm0, %v667_v36  ;;  %v2946_v19 = vadd.f32 %v2914_v37, %v2848_v34  ;;  %v2525_v38 = vmul.f32 %v8801_v53, %v6659_v14  ;;  %v2623_v50 = vmul.f32 %v8590_v3, %v6270_v1  ;;  %v6686_v45 = vadd.f32 %v1279_v21, %v1214_v12  ;;  %v6697_v23 = vld [vmem:[#allocation2 + $0x292] sm:$0xff]  ;;  %v6699_v12 = vld [vmem:[#allocation2 + $0x2a0] sm:$0xff] }
 0x233   : > { %8820 = vst [vmem:[#allocation55_spill] sm:$0xff] %v6666_v32  ;;  %v2460_v52 = vadd.f32 %v2428_v58, %v2363_v5  ;;  %v2720_v55 = vmul.f32 %v8591_v26, %v6272_v2  ;;  %v1986_v36 = vadd.f32 %v1954_v7, %v1889_v28  ;;  %v2817_v34 = vmul.f32 %v8548_v60, %v6274_v31  ;;  %v8832_v28 = vld [vmem:[#allocation87_spill] sm:$0xff]  ;;  %v8836_v0 = vld [vmem:[#allocation98_spill] sm:$0xff]  ;;  %v6725_v2 = vld [vmem:[#allocation2 + $0x330] sm:$0xff] }
 0x234   : > { %8825 = vst [vmem:[#allocation11_spill] sm:$0xff] %v6674_v49  ;;  %v2051_v49 = vmul.f32 %v8784_v46, %v6666_v32  ;;  %v3043_v37 = vadd.f32 %v6596_v24, %v2946_v19  ;;  %v2915_v1 = vmul.f32 %v5311_v8, %v8802_v62  ;;  %v3012_v18 = vmul.f32 %v8719_v11, %v8803_v56  ;;  %v8837_v13 = vld [vmem:[#allocation99_spill] sm:$0xff] }
 0x235   : > { %8827 = vst [vmem:[#allocation26_spill] sm:$0xff] %v6678_v25  ;;  %v2557_v5 = vadd.f32 %v2525_v38, %v2460_v52  ;;  %v3109_v7 = vmul.f32 %v8720_v51, %v8805_v41  ;;  %v2148_v24 = vmul.f32 %v8792_v63, %v6684_v61  ;;  %v3207_v19 = vmul.f32 %v8722_v6, %v8832_v28  ;;  %v6710_v52 = vld [vmem:[#allocation2 + $0x2a1] sm:$0xff] }
 0x236   : > { %8828 = vst [vmem:[#allocation63_spill] sm:$0xff] %v6684_v61  ;;  %v2083_v58 = vadd.f32 %v2051_v49, %v1986_v36  ;;  %v3140_v21 = vadd.f32 %v6600_v47, %v3043_v37  ;;  %v6712_v38 = vld [vmem:[#allocation2 + $0x2a2] sm:$0xff]  ;;  %v6718_v15 = vmul.f32 %v8724_v57, %v8836_v0  ;;  %v2245_v36 = vmul.f32 %v8794_v10, %v6697_v23 }
 0x237   : > { %8829 = vst [vmem:[#allocation65_spill] sm:$0xff] %v6686_v45  ;;  %v2655_v31 = vadd.f32 %v2623_v50, %v2557_v5  ;;  %v8835_v45 = vld [vmem:[#allocation59_spill] sm:$0xff]  ;;  %v2343_v47 = vmul.f32 %v8799_v30, %v6699_v12  ;;  %v2732_v59 = vmul.f32 %v8591_v26, %v2699_v43 }
 0x238   : > { %8830 = vst [vmem:[#allocation39_spill] sm:$0xff] %v6697_v23  ;;  %v1489_v25 = vadd.f32 %v8835_v45, %v6621_v20  ;;  %v2180_v49 = vadd.f32 %v2148_v24, %v2083_v58  ;;  %v2602_v50 = vld [vmem:[#allocation2 + $0x320] sm:$0xff]  ;;  %v3238_v37 = vadd.f32 %v6604_v33, %v3140_v21  ;;  %v1749_v45 = vmul.f32 %v6553_v40, %v8694_v22  ;;  %v8838_v58 = vld [vmem:[#allocation66_spill] sm:$0xff] }
 0x239   : > { %8831 = vst [vmem:[#allocation40_spill] sm:$0xff] %v6699_v12  ;;  %v2752_v5 = vadd.f32 %v2720_v55, %v2655_v31  ;;  %v6731_v24 = vmul.f32 %v8838_v58, %v8837_v13  ;;  %v2440_v12 = vmul.f32 %v8800_v39, %v6710_v52  ;;  %v2537_v33 = vmul.f32 %v8801_v53, %v6712_v38  ;;  %v8839_v55 = vld [vmem:[#allocation81_spill] sm:$0xff] }
 0x23a   : > { %8833 = vst [vmem:[#allocation43_spill] sm:$0xff] %v6710_v52  ;;  %v1586_v20 = vadd.f32 %v1554_v4, %v1489_v25  ;;  %v2277_v23 = vadd.f32 %v2245_v36, %v2180_v49  ;;  %v3335_v21 = vadd.f32 %v8839_v55, %v3238_v37  ;;  %v2635_v61 = vmul.f32 %v8590_v3, %v2602_v50  ;;  %v6739_v4 = vld [vmem:[#allocation2 + $0x331] sm:$0xff]  ;;  %v6748_v37 = vld [vmem:[#allocation2 + $0x340] sm:$0xff] }
 0x23b   : > { %8834 = vst [vmem:[#allocation22_spill] sm:$0xff] %v6712_v38  ;;  %v2849_v31 = vadd.f32 %v2817_v34, %v2752_v5  ;;  %v6741_v25 = vld [vmem:[#allocation2 + $0x332] sm:$0xff]  ;;  %v2829_v49 = vmul.f32 %v8548_v60, %v2796_v9  ;;  %v2927_v36 = vmul.f32 %v5311_v8, %v6725_v2  ;;  %v6750_v34 = vld [vmem:[#allocation2 + $0x341] sm:$0xff]  ;;  %v3024_v9 = vmul.f32 %v8719_v11, %v6739_v4 }
 0x23c   : > { %8840 = vst [vmem:[#allocation78_spill] sm:$0xff] %v6741_v25  ;;  %v1683_v40 = vadd.f32 %v1651_v35, %v1586_v20  ;;  %v2375_v16 = vadd.f32 %v2343_v47, %v2277_v23  ;;  %v8841_v52 = vld [vmem:[#allocation53_spill] sm:$0xff]  ;;  %v6752_v50 = vld [vmem:[#allocation2 + $0x342] sm:$0xff]  ;;  %v6760_v43 = vmul.f32 %v8720_v51, %v6741_v25  ;;  %v6775_v25 = vmul.f32 %v8722_v6, %v6748_v37 }
 0x23d   : > { %v3432_v38 = vadd.f32 %v8841_v52, %v3335_v21  ;;  %v2947_v29 = vadd.f32 %v2915_v1, %v2849_v31  ;;  %8842 = vst [vmem:[#allocation57_spill] sm:$0xff] %v6748_v37  ;;  %v8845_v35 = vld [vmem:[#allocation23_spill] sm:$0xff]  ;;  %v8846_v1 = vld [vmem:[#allocation44_spill] sm:$0xff] }
 0x23e   : > { %8843 = vst [vmem:[#allocation54_spill] sm:$0xff] %v6750_v34  ;;  %v1781_v5 = vadd.f32 %v1749_v45, %v1683_v40  ;;  %v1846_v23 = vmul.f32 %v8845_v35, %v8710_v44  ;;  %v2472_v47 = vadd.f32 %v2440_v12, %v2375_v16  ;;  %v1943_v52 = vmul.f32 %v8846_v1, %v8752_v54  ;;  %v8847_v45 = vld [vmem:[#allocation49_spill] sm:$0xff] }
 0x23f   : > { %8844 = vst [vmem:[#allocation95_spill] sm:$0xff] %v6752_v50  ;;  %v3468_v20 = vadd.f32 %v6265_v42, %v3432_v38  ;;  %v3044_v55 = vadd.f32 %v3012_v18, %v2947_v29  ;;  %v2040_v31 = vmul.f32 %v8847_v45, %v8784_v46  ;;  %v6767_v40 = vld [vmem:[#allocation2 + $0x1b0] sm:$0xff]  ;;  %v6779_v1 = vmul.f32 %v8724_v57, %v6750_v34 }
 0x240   : > { %v1878_v21 = vadd.f32 %v1846_v23, %v1781_v5  ;;  %8848 = vst [vmem:[#allocation84_spill] sm:$0xff] %v6767_v40  ;;  %v6769_v16 = vld [vmem:[#allocation2 + $0x1b1] sm:$0xff]  ;;  %v2569_v35 = vadd.f32 %v2537_v33, %v2472_v47  ;;  %v6783_v29 = vmul.f32 %v8838_v58, %v6752_v50  ;;  %v2137_v5 = vmul.f32 %v6649_v48, %v8792_v63 }
 0x241   : > { %8849 = vst [vmem:[#allocation77_spill] sm:$0xff] %v6769_v16  ;;  %v6771_v12 = vld [vmem:[#allocation2 + $0x1b2] sm:$0xff]  ;;  %4168 = vmatmul.msk.f32.gmra.mxu1 %vm459_vm0, %v3468_v20  ;;  %v3141_v18 = vadd.f32 %v3109_v7, %v3044_v55  ;;  %v2234_v33 = vmul.f32 %v6659_v14, %v8794_v10  ;;  %v2332_v47 = vmul.f32 %v8799_v30, %v6767_v40  ;;  %v8851_v55 = vld [vmem:[#allocation80_spill] sm:$0xff] }
 0x242   : > { %8850 = vst [vmem:[#allocation87_spill] sm:$0xff] %v6771_v12  ;;  %v1975_v38 = vadd.f32 %v1943_v52, %v1878_v21  ;;  %v2667_v23 = vadd.f32 %v2635_v61, %v2569_v35  ;;  %v2429_v34 = vmul.f32 %v8800_v39, %v6769_v16  ;;  %v2526_v50 = vmul.f32 %v8801_v53, %v6771_v12  ;;  %v634_v52 = vpop.f32.mrf.mxu3  ;;  %v8852_v21 = vld [vmem:[#allocation94_spill] sm:$0xff]  ;;  %v8854_v16 = vld [vmem:[#allocation16_spill] sm:$0xff] }
 0x243   : > { %v3239_v37 = vadd.f32 %v3207_v19, %v3141_v18  ;;  %v2624_v7 = vmul.f32 %v8590_v3, %v8802_v62  ;;  %v1403_v48 = vadd.f32 %v8852_v21, %v8851_v55  ;;  %v2721_v61 = vmul.f32 %v8591_v26, %v8803_v56  ;;  %v6807_v12 = vld [vmem:[#allocation2 + $0x212] sm:$0xff]  ;;  %v8856_v62 = vld [vmem:[#allocation47_spill] sm:$0xff] }
 0x244   : > { %v2072_v20 = vadd.f32 %v2040_v31, %v1975_v38  ;;  %v2764_v14 = vadd.f32 %v2732_v59, %v2667_v23  ;;  %v6804_v35 = vmul.f32 %v8548_v60, %v8805_v41  ;;  %v635_v40 = vadd.f32 %v8854_v16, %v634_v52  ;;  %8855 = vst [vmem:[#allocation98_spill] sm:$0xff] %v6807_v12  ;;  %v8857_v38 = vld [vmem:[#allocation21_spill] sm:$0xff]  ;;  %v8858_v41 = vld [vmem:[#allocation60_spill] sm:$0xff]  ;;  %v8859_v21 = vld [vmem:[#allocation58_spill] sm:$0xff] }
 0x245   : > { %v3336_v19 = vadd.f32 %v6718_v15, %v3239_v37  ;;  %v1501_v18 = vadd.f32 %v8856_v62, %v1403_v48  ;;  %v1566_v55 = vmul.f32 %v8776_v27, %v8857_v38  ;;  %v6815_v56 = vmul.f32 %v5311_v8, %v8832_v28  ;;  %v8861_v62 = vld [vmem:[#allocation92_spill] sm:$0xff]  ;;  %v8862_v38 = vld [vmem:[#allocation90_spill] sm:$0xff] }
 0x246   : > { %8853 = vst [vmem:[#allocation59_spill] sm:$0xff] %v6804_v35  ;;  %v2169_v31 = vadd.f32 %v2137_v5, %v2072_v20  ;;  %v2861_v59 = vadd.f32 %v2829_v49, %v2764_v14  ;;  %v668_v23 = vmax.f32 %v635_v40, 0.0  ;;  %v1392_v60 = vadd.f32 %v8859_v21, %v8858_v41  ;;  %v8860_v49 = vld [vmem:[#allocation35_spill] sm:$0xff] }
 0x247   : > { %v3433_v16 = vadd.f32 %v6731_v24, %v3336_v19  ;;  %v1598_v35 = vadd.f32 %v1566_v55, %v1501_v18  ;;  %v1663_v15 = vmul.f32 %v8687_v17, %v6807_v12  ;;  %v6824_v37 = vmul.f32 %v8719_v11, %v8836_v0  ;;  %v1426_v19 = vld [vmem:[#allocation2 + $0x130] sm:$0xff] }
 0x248   : > { %v2266_v52 = vadd.f32 %v2234_v33, %v2169_v31  ;;  %v2959_v48 = vadd.f32 %v2927_v36, %v2861_v59  ;;  %v6828_v14 = vmul.f32 %v8720_v51, %v8837_v13  ;;  %822 = vst.msk [vmem:[#allocation2 + $0x301] sm:$0xff] %vm459_vm0, %v668_v23  ;;  %v1490_v40 = vadd.f32 %v8860_v49, %v1392_v60  ;;  %v1619_v36 = vld [vmem:[#allocation2 + $0x122] sm:$0xff]  ;;  %v8866_v49 = vld [vmem:[#allocation33_spill] sm:$0xff] }
 0x249   : > { %v3469_v24 = vadd.f32 %v6265_v42, %v3433_v16  ;;  %v1695_v33 = vadd.f32 %v1663_v15, %v1598_v35  ;;  %v1761_v20 = vmul.f32 %v6666_v32, %v8694_v22  ;;  %v6837_v18 = vmul.f32 %v8722_v6, %v8861_v62  ;;  %v8863_v59 = vld [vmem:[#allocation96_spill] sm:$0xff]  ;;  %v8864_v23 = vld [vmem:[#allocation63_spill] sm:$0xff]  ;;  %v1523_v16 = vld [vmem:[#allocation2 + $0x131] sm:$0xff] }
 0x24a   : > { %v2364_v5 = vadd.f32 %v2332_v47, %v2266_v52  ;;  %v3056_v31 = vadd.f32 %v3024_v9, %v2959_v48  ;;  %v6841_v55 = vmul.f32 %v8724_v57, %v8862_v38  ;;  %v6845_v60 = vmul.f32 %v8838_v58, %v8863_v59  ;;  %v4319_v9 = vld [vmem:[#allocation2 + $0x121] sm:$0xff]  ;;  %v8865_v48 = vld [vmem:[#allocation38_spill] sm:$0xff] }
 0x24b   : > { %4169 = vmatmul.msk.f32.gmra.mxu1 %vm459_vm0, %v3469_v24  ;;  %v1793_v35 = vadd.f32 %v1761_v20, %v1695_v33  ;;  %v1858_v41 = vmul.f32 %v8864_v23, %v8710_v44  ;;  %v1555_v21 = vmul.f32 %v4319_v9, %v8776_v27  ;;  %v1652_v15 = vmul.f32 %v8687_v17, %v1619_v36  ;;  %v8867_v32 = vld [vmem:[#allocation18_spill] sm:$0xff]  ;;  %v6858_v33 = vld [vmem:[#allocation2 + $0x2b0] sm:$0xff] }
 0x24c   : > { %v2461_v47 = vadd.f32 %v2429_v34, %v2364_v5  ;;  %v3153_v52 = vadd.f32 %v6760_v43, %v3056_v31  ;;  %v1393_v12 = vadd.f32 %v8866_v49, %v8865_v48  ;;  %v1459_v59 = vmul.f32 %v8867_v32, %v1426_v19  ;;  %v8868_v34 = vld [vmem:[#allocation39_spill] sm:$0xff]  ;;  %8869 = vst [vmem:[#allocation99_spill] sm:$0xff] %v6858_v33  ;;  %v6860_v20 = vld [vmem:[#allocation2 + $0x2b1] sm:$0xff]  ;;  %v8871_v43 = vld [vmem:[#allocation40_spill] sm:$0xff] }
 0x24d   : > { %v1890_v24 = vadd.f32 %v1858_v41, %v1793_v35  ;;  %v1955_v5 = vmul.f32 %v8868_v34, %v8752_v54  ;;  %8870 = vst [vmem:[#allocation81_spill] sm:$0xff] %v6860_v20  ;;  %v1587_v9 = vadd.f32 %v1555_v21, %v1490_v40  ;;  %v2052_v36 = vmul.f32 %v8871_v43, %v8784_v46  ;;  %v8872_v48 = vld [vmem:[#allocation64_spill] sm:$0xff]  ;;  %v8873_v49 = vld [vmem:[#allocation69_spill] sm:$0xff]  ;;  %v8874_v35 = vld [vmem:[#allocation43_spill] sm:$0xff] }
 0x24e   : > { %v2558_v38 = vadd.f32 %v2526_v50, %v2461_v47  ;;  %v3251_v23 = vadd.f32 %v6775_v25, %v3153_v52  ;;  %v1556_v31 = vmul.f32 %v8776_v27, %v1523_v16  ;;  %v1394_v19 = vadd.f32 %v8873_v49, %v8872_v48  ;;  %v8875_v34 = vld [vmem:[#allocation22_spill] sm:$0xff] }
 0x24f   : > { %v1987_v47 = vadd.f32 %v1955_v5, %v1890_v24  ;;  %v2149_v41 = vmul.f32 %v8874_v35, %v8792_v63  ;;  %v2246_v32 = vmul.f32 %v8875_v34, %v8794_v10  ;;  %v6872_v62 = vld [vmem:[#allocation2 + $0x2b2] sm:$0xff]  ;;  %v2344_v40 = vmul.f32 %v8799_v30, %v6858_v33 }
 0x250   : > { %v2656_v50 = vadd.f32 %v2624_v7, %v2558_v38  ;;  %8876 = vst [vmem:[#allocation53_spill] sm:$0xff] %v6872_v62  ;;  %v3348_v25 = vadd.f32 %v6779_v1, %v3251_v23  ;;  %v2441_v21 = vmul.f32 %v8800_v39, %v6860_v20  ;;  %v8877_v16 = vld [vmem:[#allocation42_spill] sm:$0xff]  ;;  %v1684_v24 = vadd.f32 %v1652_v15, %v1587_v9 }
 0x251   : > { %v6880_v52 = vadd.f32 %v8877_v16, %v1394_v19  ;;  %v2084_v38 = vadd.f32 %v2052_v36, %v1987_v47  ;;  %v1750_v5 = vmul.f32 %v8847_v45, %v8694_v22  ;;  %v2538_v1 = vmul.f32 %v8801_v53, %v6872_v62  ;;  %v8879_v19 = vld [vmem:[#allocation59_spill] sm:$0xff]  ;;  %v6894_v36 = vld [vmem:[#allocation2 + $0x350] sm:$0xff]  ;;  %v8881_v45 = vld [vmem:[#allocation56_spill] sm:$0xff] }
 0x252   : > { %v2753_v7 = vadd.f32 %v2721_v61, %v2656_v50  ;;  %v3445_v48 = vadd.f32 %v6783_v29, %v3348_v25  ;;  %v2636_v23 = vmul.f32 %v6725_v2, %v8590_v3  ;;  %v6891_v49 = vmul.f32 %v6739_v4, %v8591_v26  ;;  %8880 = vst [vmem:[#allocation44_spill] sm:$0xff] %v6894_v36  ;;  %v8882_v50 = vld [vmem:[#allocation37_spill] sm:$0xff]  ;;  %v8883_v47 = vld [vmem:[#allocation78_spill] sm:$0xff]  ;;  %v8890_v62 = vld [vmem:[#allocation95_spill] sm:$0xff] }
 0x253   : > { %8878 = vst [vmem:[#allocation23_spill] sm:$0xff] %v6880_v52  ;;  %v2181_v61 = vadd.f32 %v2149_v41, %v2084_v38  ;;  %v1782_v15 = vadd.f32 %v1750_v5, %v1684_v24  ;;  %v1847_v9 = vmul.f32 %v8881_v45, %v8710_v44  ;;  %v6901_v25 = vmul.f32 %v8883_v47, %v8882_v50  ;;  %v8884_v2 = vld [vmem:[#allocation57_spill] sm:$0xff]  ;;  %v8886_v41 = vld [vmem:[#allocation62_spill] sm:$0xff] }
 0x254   : > { %v2850_v16 = vadd.f32 %v8879_v19, %v2753_v7  ;;  %v3481_v29 = vadd.f32 %v6265_v42, %v3445_v48  ;;  %v6905_v52 = vmul.f32 %v8884_v2, %v5311_v8  ;;  %v6907_v4 = vld [vmem:[#allocation2 + $0x351] sm:$0xff]  ;;  %v1944_v7 = vmul.f32 %v8886_v41, %v8752_v54  ;;  %v8888_v42 = vld [vmem:[#allocation84_spill] sm:$0xff] }
 0x255   : > { %8885 = vst [vmem:[#allocation49_spill] sm:$0xff] %v6907_v4  ;;  %v2278_v24 = vadd.f32 %v2246_v32, %v2181_v61  ;;  %v6912_v5 = vld [vmem:[#allocation2 + $0x352] sm:$0xff]  ;;  %v1879_v19 = vadd.f32 %v1847_v9, %v1782_v15  ;;  %v2041_v48 = vmul.f32 %v8888_v42, %v8784_v46  ;;  %v6923_v20 = vmul.f32 %v8890_v62, %v8720_v51 }
 0x256   : > { %v2948_v38 = vadd.f32 %v6815_v56, %v2850_v16  ;;  %8887 = vst [vmem:[#allocation80_spill] sm:$0xff] %v6912_v5  ;;  %v1620_v45 = vld [vmem:[#allocation2 + $0x132] sm:$0xff]  ;;  %4181 = vmatmul.msk.f32.vlgmr.msrb.gmra.mxu3 %vm459_vm0, %v3481_v29  ;;  %v6927_v32 = vmul.f32 %v8722_v6, %v6894_v36  ;;  %v1491_v56 = vadd.f32 %v1459_v59, %v1393_v12  ;;  %v6934_v29 = vld [vmem:[#allocation2 + $0x1c0] sm:$0xff] }
 0x257   : > { %v8889_v47 = vld [vmem:[#allocation54_spill] sm:$0xff]  ;;  %8891 = vst [vmem:[#allocation94_spill] sm:$0xff] %v6923_v20  ;;  %v2376_v61 = vadd.f32 %v2344_v40, %v2278_v24  ;;  %v6932_v15 = vmul.f32 %v8724_v57, %v6907_v4  ;;  %v1976_v9 = vadd.f32 %v1944_v7, %v1879_v19  ;;  %v6938_v41 = vmul.f32 %v8838_v58, %v6912_v5  ;;  %v8896_v62 = vld [vmem:[#allocation77_spill] sm:$0xff]  ;;  %v4320_v12 = vld [vmem:[#allocation2 + $0x161] sm:$0xff] }
 0x258   : > { %v6919_v2 = vmul.f32 %v8889_v47, %v8719_v11  ;;  %8892 = vst [vmem:[#allocation16_spill] sm:$0xff] %v6927_v32  ;;  %v3045_v16 = vadd.f32 %v6824_v37, %v2948_v38  ;;  %v2138_v47 = vmul.f32 %v8896_v62, %v8792_v63  ;;  %v1653_v36 = vmul.f32 %v8687_v17, %v1620_v45  ;;  %v1621_v59 = vld [vmem:[#allocation2 + $0x162] sm:$0xff]  ;;  %v8898_v5 = vld [vmem:[#allocation46_spill] sm:$0xff] }
 0x259   : > { %8893 = vst [vmem:[#allocation47_spill] sm:$0xff] %v6932_v15  ;;  %v6944_v37 = vmul.f32 %v4320_v12, %v8776_v27  ;;  %v2473_v38 = vadd.f32 %v2441_v21, %v2376_v61  ;;  %v2073_v7 = vadd.f32 %v2041_v48, %v1976_v9  ;;  %v6947_v24 = vld [vmem:[#allocation2 + $0x1c1] sm:$0xff]  ;;  %v2333_v12 = vmul.f32 %v8799_v30, %v6934_v29  ;;  %v8903_v9 = vld [vmem:[#allocation61_spill] sm:$0xff] }
 0x25a   : > { %8894 = vst [vmem:[#allocation21_spill] sm:$0xff] %v6934_v29  ;;  %v3142_v40 = vadd.f32 %v6828_v14, %v3045_v16  ;;  %v6949_v19 = vld [vmem:[#allocation2 + $0x1c2] sm:$0xff]  ;;  %v1588_v21 = vadd.f32 %v1556_v31, %v1491_v56  ;;  %v6970_v29 = vmul.f32 %v8687_v17, %v1621_v59 }
 0x25b   : > { %8895 = vst [vmem:[#allocation60_spill] sm:$0xff] %v6938_v41  ;;  %v8899_v41 = vld [vmem:[#allocation82_spill] sm:$0xff]  ;;  %v6953_v4 = vld [vmem:[#allocation2 + $0x222] sm:$0xff]  ;;  %v2570_v16 = vadd.f32 %v2538_v1, %v2473_v38  ;;  %v2170_v61 = vadd.f32 %v2138_v47, %v2073_v7  ;;  %v2625_v47 = vmul.f32 %v8590_v3, %v8832_v28 }
 0x25c   : > { %8897 = vst [vmem:[#allocation58_spill] sm:$0xff] %v6944_v37  ;;  %v1404_v15 = vadd.f32 %v8899_v41, %v8898_v5  ;;  %v8901_v45 = vld [vmem:[#allocation87_spill] sm:$0xff]  ;;  %v8902_v37 = vld [vmem:[#allocation30_spill] sm:$0xff]  ;;  %v3240_v48 = vadd.f32 %v6837_v18, %v3142_v40  ;;  %v2430_v5 = vmul.f32 %v8800_v39, %v6947_v24  ;;  %v2527_v41 = vmul.f32 %v8801_v53, %v6949_v19  ;;  %v8906_v28 = vld [vmem:[#allocation92_spill] sm:$0xff] }
 0x25d   : > { %8900 = vst [vmem:[#allocation35_spill] sm:$0xff] %v6953_v4  ;;  %v2235_v32 = vmul.f32 %v8901_v45, %v8794_v10  ;;  %v1567_v14 = vmul.f32 %v8776_v27, %v8902_v37  ;;  %v1664_v45 = vmul.f32 %v8687_v17, %v6953_v4  ;;  %v2668_v56 = vadd.f32 %v2636_v23, %v2570_v16  ;;  %v6981_v38 = vld [vmem:[#allocation2 + $0x261] sm:$0xff] }
 0x25e   : > { %v1502_v20 = vadd.f32 %v8903_v9, %v1404_v15  ;;  %v3337_v31 = vadd.f32 %v6841_v55, %v3240_v48  ;;  %v2722_v15 = vmul.f32 %v8591_v26, %v8836_v0  ;;  %v2819_v37 = vmul.f32 %v8882_v50, %v8837_v13  ;;  %8904 = vst [vmem:[#allocation38_spill] sm:$0xff] %v6981_v38  ;;  %v6983_v59 = vld [vmem:[#allocation2 + $0x262] sm:$0xff]  ;;  %v8907_v0 = vld [vmem:[#allocation90_spill] sm:$0xff] }
 0x25f   : > { %v2267_v18 = vadd.f32 %v2235_v32, %v2170_v61  ;;  %v1762_v40 = vmul.f32 %v8871_v43, %v8694_v22  ;;  %8905 = vst [vmem:[#allocation33_spill] sm:$0xff] %v6983_v59  ;;  %v2917_v7 = vmul.f32 %v5311_v8, %v8906_v28  ;;  %v8908_v13 = vld [vmem:[#allocation96_spill] sm:$0xff]  ;;  %v1859_v16 = vmul.f32 %v8874_v35, %v8710_v44  ;;  %v8910_v9 = vld [vmem:[#allocation14_spill] sm:$0xff]  ;;  %v8917_v35 = vld [vmem:[#allocation41_spill] sm:$0xff] }
 0x260   : > { %v1599_v1 = vadd.f32 %v1567_v14, %v1502_v20  ;;  %v3434_v55 = vadd.f32 %v6845_v60, %v3337_v31  ;;  %v2765_v20 = vadd.f32 %v6891_v49, %v2668_v56  ;;  %v3014_v14 = vmul.f32 %v8719_v11, %v8907_v0  ;;  %v7000_v60 = vld [vmem:[%s8179_s4] ss:$0 sm:$0xff] }
 0x261   : > { %v2365_v23 = vadd.f32 %v2333_v12, %v2267_v18  ;;  %v6993_v48 = vmul.f32 %v8720_v51, %v8908_v13  ;;  %8909 = vst [vmem:[#allocation64_spill] sm:$0xff] %v7000_v60  ;;  %v7006_v31 = vmul.f32 %v8722_v6, %v8910_v9  ;;  %v7010_v56 = vmul.f32 %v8724_v57, %v6981_v38  ;;  %v8914_v13 = vld [vmem:[#allocation53_spill] sm:$0xff] }
 0x262   : > { %v1696_v32 = vadd.f32 %v1664_v45, %v1599_v1  ;;  %v3470_v49 = vadd.f32 %v7000_v60, %v3434_v55  ;;  %v2862_v45 = vadd.f32 %v6901_v25, %v2765_v20  ;;  %v7014_v18 = vmul.f32 %v8838_v58, %v6983_v59  ;;  %v7016_v1 = vld [vmem:[#allocation2 + $0x2c0] sm:$0xff] }
 0x263   : > { %v2462_v12 = vadd.f32 %v2430_v5, %v2365_v23  ;;  %8911 = vst [vmem:[#allocation69_spill] sm:$0xff] %v7016_v1  ;;  %v1685_v28 = vadd.f32 %v1653_v36, %v1588_v21  ;;  %v1956_v55 = vmul.f32 %v8875_v34, %v8752_v54  ;;  %v7022_v20 = vld [vmem:[#allocation2 + $0x2c1] sm:$0xff]  ;;  %v2053_v23 = vmul.f32 %v6858_v33, %v8784_v46  ;;  %v8916_v34 = vld [vmem:[#allocation25_spill] sm:$0xff] }
 0x264   : > { %v1794_v61 = vadd.f32 %v1762_v40, %v1696_v32  ;;  %4170 = vmatmul.msk.f32.gmra.mxu1 %vm459_vm0, %v3470_v49  ;;  %v2960_v25 = vadd.f32 %v6905_v52, %v2862_v45  ;;  %8912 = vst [vmem:[#allocation42_spill] sm:$0xff] %v7022_v20  ;;  %v8913_v32 = vld [vmem:[#allocation81_spill] sm:$0xff]  ;;  %v2247_v36 = vmul.f32 %v8914_v13, %v8794_v10  ;;  %v7030_v21 = vld [vmem:[#allocation2 + $0x2c2] sm:$0xff]  ;;  %v8918_v13 = vld [vmem:[#allocation94_spill] sm:$0xff] }
 0x265   : > { %v2559_v5 = vadd.f32 %v2527_v41, %v2462_v12  ;;  %v2150_v0 = vmul.f32 %v8913_v32, %v8792_v63  ;;  %8915 = vst [vmem:[#allocation59_spill] sm:$0xff] %v7030_v21  ;;  %v1751_v52 = vmul.f32 %v8888_v42, %v8694_v22  ;;  %v2345_v45 = vmul.f32 %v8799_v30, %v7016_v1 }
 0x266   : > { %v1891_v40 = vadd.f32 %v1859_v16, %v1794_v61  ;;  %v3057_v41 = vadd.f32 %v6919_v2, %v2960_v25  ;;  %v2442_v12 = vmul.f32 %v8800_v39, %v7022_v20  ;;  %v1848_v4 = vmul.f32 %v8896_v62, %v8710_v44  ;;  %v8919_v25 = vld [vmem:[#allocation57_spill] sm:$0xff]  ;;  %v8922_v20 = vld [vmem:[#allocation16_spill] sm:$0xff] }
 0x267   : > { %v2657_v16 = vadd.f32 %v2625_v47, %v2559_v5  ;;  %v1783_v61 = vadd.f32 %v1751_v52, %v1685_v28  ;;  %v7043_v43 = vadd.f32 %v8917_v35, %v8916_v34  ;;  %v2539_v47 = vmul.f32 %v8801_v53, %v7030_v21  ;;  %v8920_v28 = vld [vmem:[#allocation87_spill] sm:$0xff]  ;;  %v8921_v62 = vld [vmem:[#allocation21_spill] sm:$0xff]  ;;  %v8938_v21 = vld [vmem:[#allocation48_spill] sm:$0xff] }
 0x268   : > { %v1988_v49 = vadd.f32 %v1956_v55, %v1891_v40  ;;  %v3154_v42 = vadd.f32 %v8918_v13, %v3057_v41  ;;  %v2637_v5 = vmul.f32 %v8919_v25, %v8590_v3  ;;  %v1945_v55 = vmul.f32 %v8920_v28, %v8752_v54  ;;  %v7057_v13 = vld [vmem:[#allocation2 + $0x360] sm:$0xff]  ;;  %v8928_v25 = vld [vmem:[#allocation49_spill] sm:$0xff]  ;;  %v8930_v28 = vld [vmem:[#allocation80_spill] sm:$0xff] }
 0x269   : > { %v2754_v59 = vadd.f32 %v2722_v15, %v2657_v16  ;;  %v1880_v40 = vadd.f32 %v1848_v4, %v1783_v61  ;;  %v2042_v52 = vmul.f32 %v8921_v62, %v8784_v46  ;;  %v8923_v15 = vld [vmem:[#allocation54_spill] sm:$0xff]  ;;  %8924 = vst [vmem:[#allocation56_spill] sm:$0xff] %v7057_v13  ;;  %v7059_v41 = vld [vmem:[#allocation2 + $0x361] sm:$0xff]  ;;  %v7076_v62 = vmul.f32 %v8930_v28, %v8720_v51 }
 0x26a   : > { %v2085_v2 = vadd.f32 %v2053_v23, %v1988_v49  ;;  %v3252_v34 = vadd.f32 %v8922_v20, %v3154_v42  ;;  %v2734_v23 = vmul.f32 %v8923_v15, %v8591_v26  ;;  %8925 = vst [vmem:[#allocation37_spill] sm:$0xff] %v7059_v41  ;;  %v8926_v16 = vld [vmem:[#allocation95_spill] sm:$0xff]  ;;  %v8927_v49 = vld [vmem:[#allocation44_spill] sm:$0xff]  ;;  %v7071_v20 = vmul.f32 %v8928_v25, %v8719_v11  ;;  %v2301_v15 = vld [vmem:[#allocation2 + $0x1d0] sm:$0xff] }
 0x26b   : > { %v2851_v35 = vadd.f32 %v2819_v37, %v2754_v59  ;;  %v7063_v4 = vmul.f32 %v8926_v16, %v8882_v50  ;;  %v7067_v61 = vmul.f32 %v8927_v49, %v5311_v8  ;;  %v1977_v37 = vadd.f32 %v1945_v55, %v1880_v40  ;;  %v8929_v59 = vld [vmem:[#allocation47_spill] sm:$0xff]  ;;  %8931 = vst [vmem:[#allocation78_spill] sm:$0xff] %v7076_v62  ;;  %v8936_v28 = vld [vmem:[#allocation58_spill] sm:$0xff] }
 0x26c   : > { %v2182_v1 = vadd.f32 %v2150_v0, %v2085_v2  ;;  %v3349_v0 = vadd.f32 %v8929_v59, %v3252_v34  ;;  %v7080_v16 = vmul.f32 %v8722_v6, %v7057_v13  ;;  %v7084_v49 = vmul.f32 %v8724_v57, %v7059_v41  ;;  %v7086_v25 = vld [vmem:[#allocation2 + $0x362] sm:$0xff] }
 0x26d   : > { %v2949_v42 = vadd.f32 %v2917_v7, %v2851_v35  ;;  %v2074_v40 = vadd.f32 %v2042_v52, %v1977_v37  ;;  %v2139_v7 = vmul.f32 %v6947_v24, %v8792_v63  ;;  %v2398_v35 = vld [vmem:[#allocation2 + $0x1d1] sm:$0xff]  ;;  %v8935_v59 = vld [vmem:[#allocation23_spill] sm:$0xff]  ;;  %v2334_v41 = vmul.f32 %v8799_v30, %v2301_v15 }
 0x26e   : > { %v2279_v2 = vadd.f32 %v2247_v36, %v2182_v1  ;;  %8932 = vst [vmem:[#allocation62_spill] sm:$0xff] %v7080_v16  ;;  %v8934_v1 = vld [vmem:[#allocation60_spill] sm:$0xff]  ;;  %v1589_v62 = vadd.f32 %v8936_v28, %v8935_v59  ;;  %v2236_v16 = vmul.f32 %v6949_v19, %v8794_v10  ;;  %v1719_v37 = vld [vmem:[#allocation2 + $0x1e0] sm:$0xff]  ;;  %v2431_v19 = vmul.f32 %v8800_v39, %v2398_v35  ;;  %v8940_v15 = vld [vmem:[#allocation97_spill] sm:$0xff] }
 0x26f   : > { %8933 = vst [vmem:[#allocation84_spill] sm:$0xff] %v7084_v49  ;;  %v3446_v36 = vadd.f32 %v8934_v1, %v3349_v0  ;;  %v3046_v55 = vadd.f32 %v3014_v14, %v2949_v42  ;;  %v2171_v13 = vadd.f32 %v2139_v7, %v2074_v40  ;;  %v8937_v49 = vld [vmem:[#allocation45_spill] sm:$0xff]  ;;  %v1913_v1 = vld [vmem:[#allocation2 + $0x1e2] sm:$0xff] }
 0x270   : > { %v2377_v34 = vadd.f32 %v2345_v45, %v2279_v2  ;;  %v1405_v52 = vadd.f32 %v8938_v21, %v8937_v49  ;;  %v7102_v45 = vmul.f32 %v8838_v58, %v7086_v25  ;;  %v2495_v42 = vld [vmem:[#allocation2 + $0x1d2] sm:$0xff]  ;;  %v1816_v49 = vld [vmem:[#allocation2 + $0x1e1] sm:$0xff] }
 0x271   : > { %v3482_v24 = vadd.f32 %v7000_v60, %v3446_v36  ;;  %v3143_v0 = vadd.f32 %v6993_v48, %v3046_v55  ;;  %v7104_v2 = vld [vmem:[#allocation2 + $0x232] sm:$0xff]  ;;  %v2268_v28 = vadd.f32 %v2236_v16, %v2171_v13  ;;  %v1686_v55 = vadd.f32 %v6970_v29, %v1589_v62 }
 0x272   : > { %v2474_v14 = vadd.f32 %v2442_v12, %v2377_v34  ;;  %8939 = vst [vmem:[#allocation77_spill] sm:$0xff] %v7104_v2  ;;  %v1503_v40 = vadd.f32 %v8940_v15, %v1405_v52  ;;  %v4322_v7 = vld [vmem:[#allocation2 + $0x231] sm:$0xff]  ;;  %v1752_v34 = vmul.f32 %v8694_v22, %v1719_v37  ;;  %v2528_v16 = vmul.f32 %v8801_v53, %v2495_v42 }
 0x273   : > { %v1568_v21 = vmul.f32 %v4322_v7, %v8776_v27  ;;  %4182 = vmatmul.msk.f32.gmra.mxu3 %vm459_vm0, %v3482_v24  ;;  %v3241_v48 = vadd.f32 %v7006_v31, %v3143_v0  ;;  %v2593_v36 = vld [vmem:[#allocation2 + $0x250] sm:$0xff]  ;;  %v2366_v13 = vadd.f32 %v2334_v41, %v2268_v28  ;;  %v1665_v15 = vmul.f32 %v8687_v17, %v7104_v2 }
 0x274   : > { %v2571_v12 = vadd.f32 %v2539_v47, %v2474_v14  ;;  %v2690_v35 = vld [vmem:[#allocation2 + $0x251] sm:$0xff]  ;;  %v1849_v31 = vmul.f32 %v8710_v44, %v1816_v49  ;;  %v1946_v47 = vmul.f32 %v8752_v54, %v1913_v1  ;;  %v2626_v62 = vmul.f32 %v8590_v3, %v2593_v36 }
 0x275   : > { %v7114_v59 = vld [vmem:[#allocation2 + $0x252] sm:$0xff]  ;;  %v1600_v52 = vadd.f32 %v1568_v21, %v1503_v40  ;;  %v3338_v24 = vadd.f32 %v7010_v56, %v3241_v48  ;;  %v2463_v29 = vadd.f32 %v2431_v19, %v2366_v13  ;;  %v1763_v37 = vmul.f32 %v6858_v33, %v8694_v22 }
 0x276   : > { %8941 = vst [vmem:[#allocation46_spill] sm:$0xff] %v7114_v59  ;;  %v2669_v7 = vadd.f32 %v2637_v5, %v2571_v12  ;;  %v2723_v42 = vmul.f32 %v8591_v26, %v2690_v35  ;;  %v2820_v56 = vmul.f32 %v8882_v50, %v7114_v59  ;;  %v3177_v5 = vld [vmem:[#allocation2 + $0x270] sm:$0xff]  ;;  %v2918_v40 = vmul.f32 %v5311_v8, %v8910_v9 }
 0x277   : > { %v1697_v41 = vadd.f32 %v1665_v15, %v1600_v52  ;;  %v3435_v0 = vadd.f32 %v7014_v18, %v3338_v24  ;;  %v2560_v28 = vadd.f32 %v2528_v16, %v2463_v29  ;;  %v3274_v19 = vld [vmem:[#allocation2 + $0x271] sm:$0xff]  ;;  %v1860_v49 = vmul.f32 %v8913_v32, %v8710_v44  ;;  %v8945_v29 = vld [vmem:[#allocation32_spill] sm:$0xff] }
 0x278   : > { %v2766_v14 = vadd.f32 %v2734_v23, %v2669_v7  ;;  %v3015_v23 = vmul.f32 %v8719_v11, %v6981_v38  ;;  %v8942_v48 = vld [vmem:[#allocation33_spill] sm:$0xff]  ;;  %v3210_v13 = vmul.f32 %v8722_v6, %v3177_v5  ;;  %v7144_v24 = vmul.f32 %v8724_v57, %v3274_v19  ;;  %v8947_v5 = vld [vmem:[#allocation42_spill] sm:$0xff]  ;;  %v8948_v19 = vld [vmem:[#allocation59_spill] sm:$0xff] }
 0x279   : > { %v1795_v21 = vadd.f32 %v1763_v37, %v1697_v41  ;;  %v3471_v1 = vadd.f32 %v7000_v60, %v3435_v0  ;;  %v3112_v12 = vmul.f32 %v8720_v51, %v8942_v48  ;;  %v2658_v36 = vadd.f32 %v2626_v62, %v2560_v28  ;;  %v8943_v35 = vld [vmem:[#allocation53_spill] sm:$0xff]  ;;  %v8953_v32 = vld [vmem:[#allocation62_spill] sm:$0xff] }
 0x27a   : > { %v2863_v18 = vadd.f32 %v7063_v4, %v2766_v14  ;;  %v1957_v52 = vmul.f32 %v8943_v35, %v8752_v54  ;;  %v7146_v4 = vld [vmem:[#allocation2 + $0x2d0] sm:$0xff]  ;;  %v1784_v7 = vadd.f32 %v1752_v34, %v1686_v55  ;;  %v7150_v41 = vadd.f32 %v8945_v29, %v7043_v43  ;;  %v8950_v55 = vld [vmem:[#allocation28_spill] sm:$0xff]  ;;  %v7179_v35 = vld [vmem:[#allocation2 + $0x200] sm:$0xff] }
 0x27b   : > { %v1892_v16 = vadd.f32 %v1860_v49, %v1795_v21  ;;  %4171 = vmatmul.msk.f32.gmra.mxu1 %vm459_vm0, %v3471_v1  ;;  %8944 = vst [vmem:[#allocation82_spill] sm:$0xff] %v7146_v4  ;;  %v2755_v62 = vadd.f32 %v2723_v42, %v2658_v36  ;;  %v8946_v0 = vld [vmem:[#allocation69_spill] sm:$0xff]  ;;  %v2151_v28 = vmul.f32 %v8947_v5, %v8792_v63  ;;  %v3604_v36 = vpop.f32.mrf.mxu1 }
 0x27c   : > { %v2961_v15 = vadd.f32 %v7067_v61, %v2863_v18  ;;  %v2054_v14 = vmul.f32 %v8946_v0, %v8784_v46  ;;  %v2248_v21 = vmul.f32 %v8948_v19, %v8794_v10  ;;  %v1881_v49 = vadd.f32 %v1849_v31, %v1784_v7  ;;  %v8949_v1 = vld [vmem:[#allocation29_spill] sm:$0xff]  ;;  %v8952_v7 = vld [vmem:[#allocation78_spill] sm:$0xff] }
 0x27d   : > { %v1989_v37 = vadd.f32 %v1957_v52, %v1892_v16  ;;  %v7161_v34 = vadd.f32 %v8950_v55, %v8949_v1  ;;  %v2852_v43 = vadd.f32 %v2820_v56, %v2755_v62  ;;  %v2346_v42 = vmul.f32 %v8799_v30, %v7146_v4  ;;  %v3781_v16 = vpop.f32.mrf.mxu2  ;;  %v7168_v52 = vld [vmem:[%s8182_s7] ss:$0 sm:$0xff]  ;;  %v7172_v31 = vld [vmem:[#allocation2 + $0x1f1] sm:$0xff] }
 0x27e   : > { %v3058_v61 = vadd.f32 %v7071_v20, %v2961_v15  ;;  %8951 = vst [vmem:[#allocation30_spill] sm:$0xff] %v7168_v52  ;;  %v3913_v20 = vlaneseq  ;;  %v7170_v15 = vld [vmem:[#allocation2 + $0x1f0] sm:$0xff]  ;;  %v3782_v1 = vadd.f32 %v3781_v16, %v3604_v36  ;;  %v1978_v56 = vadd.f32 %v1946_v47, %v1881_v49 }
 0x27f   : > { %v2086_v18 = vadd.f32 %v2054_v14, %v1989_v37  ;;  %v2043_v62 = vmul.f32 %v8784_v46, %v7170_v15  ;;  %v7177_v37 = vld [vmem:[#allocation2 + $0x1f2] sm:$0xff]  ;;  %v2950_v14 = vadd.f32 %v2918_v40, %v2852_v43  ;;  %v2140_v47 = vmul.f32 %v8792_v63, %v7172_v31 }
 0x280   : > { %v3155_v29 = vadd.f32 %v8952_v7, %v3058_v61  ;;  %v3914_v2 = vand.u32 127, %v3913_v20  ;;  %v7182_v59 = vld [vmem:[#allocation2 + $0x2d1] sm:$0xff]  ;;  %v3881_v4 = vadd.f32 %v7168_v52, %v3782_v1  ;;  %v2237_v40 = vmul.f32 %v8794_v10, %v7177_v37 }
 0x281   : > { %v2183_v55 = vadd.f32 %v2151_v28, %v2086_v18  ;;  %8954 = vst [vmem:[#allocation61_spill] sm:$0xff] %v7182_v59  ;;  %v2075_v61 = vadd.f32 %v2043_v62, %v1978_v56  ;;  %v3047_v49 = vadd.f32 %v3015_v23, %v2950_v14  ;;  %v3371_v36 = vld [vmem:[#allocation2 + $0x272] sm:$0xff]  ;;  %v8955_v28 = vld [vmem:[#allocation84_spill] sm:$0xff]  ;;  %v2443_v23 = vmul.f32 %v8800_v39, %v7182_v59 }
 0x282   : > { %v3253_v33 = vadd.f32 %v8953_v32, %v3155_v29  ;;  %v3919_v7 = vand.u32 1, %v3914_v2  ;;  %v7190_v18 = vld [vmem:[#allocation2 + $0x2d2] sm:$0xff]  ;;  %v3928_v32 = vmax.f32 %v3881_v4, 0.0  ;;  %v2335_v29 = vmul.f32 %v8799_v30, %v7179_v35 }
 0x283   : > { %v2280_v16 = vadd.f32 %v2248_v21, %v2183_v55  ;;  %8956 = vst [vmem:[#allocation92_spill] sm:$0xff] %v7190_v18  ;;  %v2172_v20 = vadd.f32 %v2140_v47, %v2075_v61  ;;  %v3144_v1 = vadd.f32 %v3112_v12, %v3047_v49  ;;  %v8957_v2 = vmov 0  ;;  %v7200_v21 = vld [vmem:[#allocation2 + $0x201] sm:$0xff] }
 0x284   : > { %v3350_v43 = vadd.f32 %v8955_v28, %v3253_v33  ;;  %vm7196_vm3 = vcmp.eq.s32.totalorder %v3919_v7, 1  ;;  %8960 = vst [vmem:[#allocation96_spill] sm:$0xff] %v7200_v21  ;;  %v3404_v62 = vmul.f32 %v8838_v58, %v3371_v36  ;;  %v8961_v47 = vld [vmem:[#allocation44_spill] sm:$0xff]  ;;  %v8963_v36 = vld [vmem:[#allocation15_spill] sm:$0xff]  ;;  %v2432_v7 = vmul.f32 %v8800_v39, %v7200_v21 }
 0x285   : > { %v2378_v56 = vadd.f32 %v2346_v42, %v2280_v16  ;;  %v8958_v2 = vsel %vm7196_vm3, 4294967295, %v8957_v2  ;;  %v3962_v14 = vsel %vm7196_vm3, %v3928_v32, %v3881_v4  ;;  %v2269_v55 = vadd.f32 %v2237_v40, %v2172_v20  ;;  %v8964_v40 = vld [vmem:[#allocation17_spill] sm:$0xff] }
 0x286   : > { %8959 = vst [vmem:[#allocation90_spill] sm:$0xff] %v8958_v2  ;;  %v3447_v33 = vadd.f32 %v7102_v45, %v3350_v43  ;;  %v3242_v61 = vadd.f32 %v3210_v13, %v3144_v1  ;;  %v2540_v42 = vmul.f32 %v8801_v53, %v7190_v18  ;;  %v2638_v49 = vmul.f32 %v8961_v47, %v8590_v3  ;;  %v7216_v45 = vld [vmem:[#allocation2 + $0x202] sm:$0xff]  ;;  %v8966_v20 = vld [vmem:[#allocation49_spill] sm:$0xff] }
 0x287   : > { %v2475_v12 = vadd.f32 %v2443_v23, %v2378_v56  ;;  %3995 = vst.msk [vmem:[%s7212_s21] sm:$0xff] %vm3994_vm2, %v3962_v14  ;;  %v1280_v4 = vmul.f32 %v8963_v36, %v6981_v38  ;;  %v2367_v16 = vadd.f32 %v2335_v29, %v2269_v55  ;;  %v7225_v28 = vmul.f32 %v8964_v40, %v8942_v48  ;;  %v8967_v29 = vld [vmem:[#allocation12_spill] sm:$0xff]  ;;  %v8968_v14 = vld [vmem:[#allocation85_spill] sm:$0xff]  ;;  %v8970_v48 = vld [vmem:[#allocation18_spill] sm:$0xff] }
 0x288   : > { %8962 = vst [vmem:[#allocation14_spill] sm:$0xff] %v7216_v45  ;;  %v3483_v13 = vadd.f32 %v7000_v60, %v3447_v33  ;;  %v3339_v43 = vadd.f32 %v7144_v24, %v3242_v61  ;;  %v2735_v1 = vmul.f32 %v8966_v20, %v8591_v26  ;;  %v2529_v23 = vmul.f32 %v8801_v53, %v7216_v45  ;;  %v8969_v55 = vld [vmem:[#allocation93_spill] sm:$0xff]  ;;  %v8974_v40 = vld [vmem:[#allocation52_spill] sm:$0xff] }
 0x289   : > { %8965 = vst [vmem:[#allocation25_spill] sm:$0xff] %v7225_v28  ;;  %v2572_v32 = vadd.f32 %v2540_v42, %v2475_v12  ;;  %v2464_v56 = vadd.f32 %v2432_v7, %v2367_v16  ;;  %v2627_v33 = vmul.f32 %v8590_v3, %v8967_v29  ;;  %v1406_v47 = vadd.f32 %v8969_v55, %v8968_v14  ;;  %v8972_v12 = vld [vmem:[#allocation80_spill] sm:$0xff]  ;;  %v7245_v16 = vld [vmem:[#allocation2 + $0x370] sm:$0xff]  ;;  %v8975_v29 = vld [vmem:[#allocation91_spill] sm:$0xff] }
 0x28a   : > { %4183 = vmatmul.msk.f32.gmra.mxu3 %vm459_vm0, %v3483_v13  ;;  %v7239_v36 = vmul.f32 %v8970_v48, %v8910_v9  ;;  %v3436_v24 = vadd.f32 %v3404_v62, %v3339_v43  ;;  %v2832_v42 = vmul.f32 %v8972_v12, %v8882_v50  ;;  %v7243_v13 = vld [vmem:[#allocation2 + $0x242] sm:$0xff]  ;;  %v2724_v20 = vmul.f32 %v8591_v26, %v8974_v40  ;;  %v7257_v12 = vld [vmem:[#allocation2 + $0x371] sm:$0xff] }
 0x28b   : > { %v2670_v61 = vadd.f32 %v2638_v49, %v2572_v32  ;;  %8973 = vst [vmem:[#allocation94_spill] sm:$0xff] %v7243_v13  ;;  %v2561_v7 = vadd.f32 %v2529_v23, %v2464_v56  ;;  %v1504_v28 = vadd.f32 %v8975_v29, %v1406_v47  ;;  %v4323_v14 = vld [vmem:[#allocation2 + $0x241] sm:$0xff]  ;;  %v7259_v56 = vld [vmem:[#allocation2 + $0x372] sm:$0xff] }
 0x28c   : > { %8971 = vst [vmem:[#allocation41_spill] sm:$0xff] %v7239_v36  ;;  %v1569_v55 = vmul.f32 %v4323_v14, %v8776_v27  ;;  %v8976_v9 = vld [vmem:[#allocation51_spill] sm:$0xff]  ;;  %v3472_v62 = vadd.f32 %v7000_v60, %v3436_v24  ;;  %v8978_v43 = vld [vmem:[#allocation56_spill] sm:$0xff]  ;;  %v8980_v40 = vld [vmem:[#allocation13_spill] sm:$0xff]  ;;  %v1666_v14 = vmul.f32 %v8687_v17, %v7243_v13 }
 0x28d   : > { %v7252_v48 = vadd.f32 %v1280_v4, %v8976_v9  ;;  %v2767_v49 = vadd.f32 %v2735_v1, %v2670_v61  ;;  %v2930_v32 = vmul.f32 %v8978_v43, %v5311_v8  ;;  %8979 = vst [vmem:[#allocation87_spill] sm:$0xff] %v7259_v56  ;;  %v2659_v23 = vadd.f32 %v2627_v33, %v2561_v7  ;;  %v1622_v4 = vld [vmem:[#allocation2 + $0x172] sm:$0xff]  ;;  %v8982_v36 = vld [vmem:[#allocation55_spill] sm:$0xff]  ;;  %v9010_v2 = vld [vmem:[#allocation20_spill] sm:$0xff] }
 0x28e   : > { %v2821_v47 = vmul.f32 %v8882_v50, %v8980_v40  ;;  %v1601_v29 = vadd.f32 %v1569_v55, %v1504_v28  ;;  %4172 = vmatmul.msk.f32.gmra.mxu1 %vm459_vm0, %v3472_v62  ;;  %v8981_v1 = vld [vmem:[#allocation37_spill] sm:$0xff]  ;;  %v3124_v9 = vmul.f32 %v7086_v25, %v8720_v51  ;;  %v3222_v33 = vmul.f32 %v8722_v6, %v7245_v16 }
 0x28f   : > { %8977 = vst [vmem:[#allocation57_spill] sm:$0xff] %v7252_v48  ;;  %v2864_v24 = vadd.f32 %v2832_v42, %v2767_v49  ;;  %v3027_v61 = vmul.f32 %v8981_v1, %v8719_v11  ;;  %v3319_v7 = vmul.f32 %v8724_v57, %v7257_v12  ;;  %v2756_v28 = vadd.f32 %v2724_v20, %v2659_v23  ;;  %v4324_v62 = vld [vmem:[#allocation2 + $0x171] sm:$0xff] }
 0x290   : > { %v1698_v55 = vadd.f32 %v1666_v14, %v1601_v29  ;;  %v1764_v40 = vmul.f32 %v8946_v0, %v8694_v22  ;;  %v3416_v42 = vmul.f32 %v8838_v58, %v7259_v56  ;;  %v1558_v49 = vmul.f32 %v4324_v62, %v8776_v27  ;;  %v8983_v29 = vld [vmem:[#allocation63_spill] sm:$0xff]  ;;  %v8989_v0 = vld [vmem:[#allocation70_spill] sm:$0xff] }
 0x291   : > { %v2962_v13 = vadd.f32 %v2930_v32, %v2864_v24  ;;  %v1655_v48 = vmul.f32 %v8687_v17, %v1622_v4  ;;  %v2853_v38 = vadd.f32 %v2821_v47, %v2756_v28  ;;  %v2919_v45 = vmul.f32 %v5311_v8, %v8982_v36  ;;  %v4325_v24 = vld [vmem:[#allocation2 + $0x181] sm:$0xff] }
 0x292   : > { %v1796_v21 = vadd.f32 %v1764_v40, %v1698_v55  ;;  %v1861_v20 = vmul.f32 %v8947_v5, %v8710_v44  ;;  %v3016_v32 = vmul.f32 %v8719_v11, %v8983_v29  ;;  %v1958_v14 = vmul.f32 %v8948_v19, %v8752_v54  ;;  %v8985_v36 = vld [vmem:[#allocation71_spill] sm:$0xff]  ;;  %v8987_v29 = vld [vmem:[#allocation40_spill] sm:$0xff]  ;;  %v8988_v19 = vld [vmem:[#allocation73_spill] sm:$0xff] }
 0x293   : > { %v3059_v23 = vadd.f32 %v3027_v61, %v2962_v13  ;;  %v7289_v62 = vmul.f32 %v4325_v24, %v8776_v27  ;;  %v2951_v4 = vadd.f32 %v2919_v45, %v2853_v38  ;;  %v1590_v28 = vadd.f32 %v1558_v49, %v7150_v41  ;;  %v8986_v13 = vld [vmem:[#allocation39_spill] sm:$0xff]  ;;  %v8991_v41 = vld [vmem:[#allocation82_spill] sm:$0xff] }
 0x294   : > { %v1893_v47 = vadd.f32 %v1861_v20, %v1796_v21  ;;  %v7294_v55 = vadd.f32 %v8985_v36, %v7161_v34  ;;  %v3113_v61 = vmul.f32 %v8720_v51, %v8986_v13  ;;  %v3211_v5 = vmul.f32 %v8722_v6, %v8987_v29  ;;  %v7306_v34 = vld [vmem:[#allocation2 + $0x2e0] sm:$0xff]  ;;  %v8993_v20 = vld [vmem:[#allocation76_spill] sm:$0xff] }
 0x295   : > { %8984 = vst [vmem:[#allocation21_spill] sm:$0xff] %v7289_v62  ;;  %v3156_v40 = vadd.f32 %v3124_v9, %v3059_v23  ;;  %v1397_v17 = vadd.f32 %v8989_v0, %v8988_v19  ;;  %v3048_v24 = vadd.f32 %v3016_v32, %v2951_v4  ;;  %v8990_v62 = vld [vmem:[#allocation43_spill] sm:$0xff]  ;;  %v2055_v45 = vmul.f32 %v8991_v41, %v8784_v46 }
 0x296   : > { %v3308_v38 = vmul.f32 %v8724_v57, %v8990_v62  ;;  %v1990_v21 = vadd.f32 %v1958_v14, %v1893_v47  ;;  %8992 = vst [vmem:[#allocation16_spill] sm:$0xff] %v7306_v34  ;;  %v2152_v49 = vmul.f32 %v7182_v59, %v8792_v63  ;;  %v8995_v36 = vld [vmem:[#allocation67_spill] sm:$0xff]  ;;  %v3607_v62 = vpop.f32.mrf.mxu1  ;;  %v3784_v14 = vpop.f32.mrf.mxu2  ;;  %v1687_v4 = vadd.f32 %v1655_v48, %v1590_v28 }
 0x297   : > { %v3254_v9 = vadd.f32 %v3222_v33, %v3156_v40  ;;  %v7311_v23 = vadd.f32 %v8993_v20, %v1397_v17  ;;  %v8996_v13 = vld [vmem:[#allocation75_spill] sm:$0xff]  ;;  %v3145_v19 = vadd.f32 %v3113_v61, %v3048_v24  ;;  %v1753_v47 = vmul.f32 %v7170_v15, %v8694_v22  ;;  %v8999_v15 = vld [vmem:[#allocation22_spill] sm:$0xff] }
 0x298   : > { %v7315_v0 = vadd.f32 %v8996_v13, %v8995_v36  ;;  %v2087_v32 = vadd.f32 %v2055_v45, %v1990_v21  ;;  %v2249_v33 = vmul.f32 %v7190_v18, %v8794_v10  ;;  %v2347_v17 = vmul.f32 %v8799_v30, %v7306_v34  ;;  %v7323_v36 = vld [vmem:[#allocation2 + $0x2e1] sm:$0xff] }
 0x299   : > { %8994 = vst [vmem:[#allocation54_spill] sm:$0xff] %v7311_v23  ;;  %v3351_v29 = vadd.f32 %v3319_v7, %v3254_v9  ;;  %v3785_v40 = vadd.f32 %v3784_v14, %v3607_v62  ;;  %v3243_v20 = vadd.f32 %v3211_v5, %v3145_v19  ;;  %v7325_v61 = vld [vmem:[#allocation2 + $0x2e2] sm:$0xff]  ;;  %v1785_v24 = vadd.f32 %v1753_v47, %v1687_v4 }
 0x29a   : > { %v2184_v23 = vadd.f32 %v2152_v49, %v2087_v32  ;;  %8997 = vst [vmem:[#allocation95_spill] sm:$0xff] %v7323_v36  ;;  %v1850_v48 = vmul.f32 %v7172_v31, %v8710_v44  ;;  %v3405_v7 = vmul.f32 %v8838_v58, %v8999_v15  ;;  %v1947_v45 = vmul.f32 %v7177_v37, %v8752_v54 }
 0x29b   : > { %8998 = vst [vmem:[#allocation47_spill] sm:$0xff] %v7325_v61  ;;  %v3448_v28 = vadd.f32 %v3416_v42, %v3351_v29  ;;  %v3882_v21 = vadd.f32 %v7168_v52, %v3785_v40  ;;  %v3340_v9 = vadd.f32 %v3308_v38, %v3243_v20  ;;  %v2044_v13 = vmul.f32 %v7179_v35, %v8784_v46  ;;  %v7343_v38 = vld [vmem:[#allocation2 + $0x380] sm:$0xff] }
 0x29c   : > { %v2281_v5 = vadd.f32 %v2249_v33, %v2184_v23  ;;  %v1882_v49 = vadd.f32 %v1850_v48, %v1785_v24  ;;  %v2444_v31 = vmul.f32 %v8800_v39, %v7323_v36  ;;  %v2541_v42 = vmul.f32 %v8801_v53, %v7325_v61  ;;  %9000 = vst [vmem:[#allocation60_spill] sm:$0xff] %v7343_v38  ;;  %v7357_v20 = vld [vmem:[#allocation2 + $0x381] sm:$0xff] }
 0x29d   : > { %v3484_v19 = vadd.f32 %v7000_v60, %v3448_v28  ;;  %v3929_v32 = vmax.f32 %v3882_v21, 0.0  ;;  %v3437_v62 = vadd.f32 %v3405_v7, %v3340_v9  ;;  %v2639_v37 = vmul.f32 %v8978_v43, %v8590_v3  ;;  %9002 = vst [vmem:[#allocation58_spill] sm:$0xff] %v7357_v20  ;;  %v7359_v24 = vld [vmem:[#allocation2 + $0x382] sm:$0xff] }
 0x29e   : > { %v2379_v14 = vadd.f32 %v2347_v17, %v2281_v5  ;;  %v1979_v23 = vadd.f32 %v1947_v45, %v1882_v49  ;;  %v2736_v4 = vmul.f32 %v8981_v1, %v8591_v26  ;;  %v2833_v47 = vmul.f32 %v7086_v25, %v8882_v50  ;;  %v7354_v17 = vld [vmem:[#allocation2 + $0x210] sm:$0xff]  ;;  %9003 = vst [vmem:[#allocation45_spill] sm:$0xff] %v7359_v24  ;;  %v9004_v25 = vld [vmem:[#allocation96_spill] sm:$0xff]  ;;  %v9006_v45 = vld [vmem:[#allocation50_spill] sm:$0xff] }
 0x29f   : > { %4184 = vmatmul.msk.f32.gmra.mxu3 %vm459_vm0, %v3484_v19  ;;  %v2931_v29 = vmul.f32 %v7245_v16, %v5311_v8  ;;  %v3963_v33 = vsel %vm7196_vm3, %v3929_v32, %v3882_v21  ;;  %9001 = vst [vmem:[#allocation23_spill] sm:$0xff] %v7354_v17  ;;  %v3473_v43 = vadd.f32 %v7000_v60, %v3437_v62  ;;  %v9005_v21 = vld [vmem:[#allocation79_spill] sm:$0xff]  ;;  %v9007_v19 = vld [vmem:[#allocation14_spill] sm:$0xff] }
 0x2a0   : > { %v2476_v40 = vadd.f32 %v2444_v31, %v2379_v14  ;;  %3996 = vst.msk [vmem:[%s7212_s21 + $0x8] sm:$0xff] %vm3994_vm2, %v3963_v33  ;;  %v2076_v1 = vadd.f32 %v2044_v13, %v1979_v23  ;;  %v2141_v48 = vmul.f32 %v9004_v25, %v8792_v63  ;;  %v3028_v28 = vmul.f32 %v7257_v12, %v8719_v11  ;;  %v1623_v5 = vld [vmem:[#allocation2 + $0x182] sm:$0xff]  ;;  %v1624_v62 = vld [vmem:[#allocation2 + $0x192] sm:$0xff] }
 0x2a1   : > { %v7369_v15 = vmul.f32 %v7259_v56, %v8720_v51  ;;  %v7373_v7 = vmul.f32 %v8722_v6, %v7343_v38  ;;  %v1407_v9 = vadd.f32 %v9006_v45, %v9005_v21  ;;  %4173 = vmatmul.msk.f32.gmra.mxu1 %vm459_vm0, %v3473_v43  ;;  %v2238_v31 = vmul.f32 %v9007_v19, %v8794_v10  ;;  %v7390_v33 = vld [vmem:[#allocation2 + $0x211] sm:$0xff] }
 0x2a2   : > { %v2573_v49 = vadd.f32 %v2541_v42, %v2476_v40  ;;  %v2173_v13 = vadd.f32 %v2141_v48, %v2076_v1  ;;  %v2336_v32 = vmul.f32 %v8799_v30, %v7354_v17  ;;  %v7384_v14 = vmul.f32 %v8724_v57, %v7357_v20  ;;  %v9009_v43 = vld [vmem:[#allocation26_spill] sm:$0xff]  ;;  %v2595_v45 = vld [vmem:[#allocation2 + $0x290] sm:$0xff] }
 0x2a3   : > { %v7388_v23 = vmul.f32 %v8838_v58, %v7359_v24  ;;  %v1505_v42 = vadd.f32 %v9009_v43, %v1407_v9  ;;  %v4326_v40 = vld [vmem:[#allocation2 + $0x251] sm:$0xff]  ;;  %v1656_v60 = vmul.f32 %v9010_v2, %v1623_v5  ;;  %v2433_v5 = vmul.f32 %v8800_v39, %v7390_v33 }
 0x2a4   : > { %v1570_v1 = vmul.f32 %v4326_v40, %v8776_v27  ;;  %v2671_v48 = vadd.f32 %v2639_v37, %v2573_v49  ;;  %v2270_v21 = vadd.f32 %v2238_v31, %v2173_v13  ;;  %v4327_v38 = vld [vmem:[#allocation2 + $0x191] sm:$0xff]  ;;  %v7403_v40 = vmul.f32 %v9010_v2, %v1624_v62  ;;  %v7407_v13 = vld [vmem:[#allocation2 + $0x2a0] sm:$0xff] }
 0x2a5   : > { %9008 = vst [vmem:[#allocation48_spill] sm:$0xff] %v7388_v23  ;;  %v7396_v20 = vmul.f32 %v4327_v38, %v8776_v27  ;;  %v2692_v56 = vld [vmem:[#allocation2 + $0x291] sm:$0xff]  ;;  %v7409_v38 = vld [vmem:[#allocation2 + $0x2a1] sm:$0xff] }
 0x2a6   : > { %v2789_v17 = vld [vmem:[#allocation2 + $0x292] sm:$0xff]  ;;  %v1602_v24 = vadd.f32 %v1570_v1, %v1505_v42  ;;  %v2768_v37 = vadd.f32 %v2736_v4, %v2671_v48  ;;  %v2368_v49 = vadd.f32 %v2336_v32, %v2270_v21  ;;  %9013 = vst [vmem:[#allocation97_spill] sm:$0xff] %v7409_v38  ;;  %v4328_v31 = vld [vmem:[#allocation2 + $0x1a1] sm:$0xff]  ;;  %v1765_v32 = vmul.f32 %v8991_v41, %v8694_v22 }
 0x2a7   : > { %v9011_v23 = vld [vmem:[#allocation46_spill] sm:$0xff]  ;;  %v9012_v9 = vld [vmem:[#allocation21_spill] sm:$0xff]  ;;  %v7412_v42 = vmul.f32 %v4328_v31, %v8776_v27  ;;  %v7417_v62 = vld [vmem:[#allocation2 + $0x2a2] sm:$0xff]  ;;  %v2920_v31 = vmul.f32 %v5311_v8, %v7407_v13 }
 0x2a8   : > { %v1667_v19 = vmul.f32 %v9011_v23, %v9010_v2  ;;  %v1591_v43 = vadd.f32 %v9012_v9, %v7294_v55  ;;  %v9015_v23 = vld [vmem:[#allocation98_spill] sm:$0xff]  ;;  %v2628_v55 = vmul.f32 %v8590_v3, %v2595_v45  ;;  %9016 = vst [vmem:[#allocation32_spill] sm:$0xff] %v7417_v62  ;;  %v2865_v48 = vadd.f32 %v2833_v47, %v2768_v37  ;;  %v9017_v37 = vld [vmem:[#allocation99_spill] sm:$0xff]  ;;  %v9022_v41 = vld [vmem:[#allocation81_spill] sm:$0xff] }
 0x2a9   : > { %9014 = vst [vmem:[#allocation33_spill] sm:$0xff] %v7412_v42  ;;  %v2530_v1 = vmul.f32 %v8801_v53, %v9015_v23  ;;  %v2465_v21 = vadd.f32 %v2433_v5, %v2368_v49  ;;  %v2725_v9 = vmul.f32 %v8591_v26, %v2692_v56  ;;  %v2822_v2 = vmul.f32 %v8882_v50, %v2789_v17  ;;  %v7437_v5 = vld [vmem:[#allocation2 + $0x2f0] sm:$0xff] }
 0x2aa   : > { %v1699_v4 = vadd.f32 %v1667_v19, %v1602_v24  ;;  %v3017_v23 = vmul.f32 %v8719_v11, %v7409_v38  ;;  %v1862_v45 = vmul.f32 %v7182_v59, %v8710_v44  ;;  %v2963_v24 = vadd.f32 %v2931_v29, %v2865_v48  ;;  %9018 = vst [vmem:[#allocation29_spill] sm:$0xff] %v7437_v5  ;;  %v9020_v59 = vld [vmem:[#allocation83_spill] sm:$0xff]  ;;  %v9021_v29 = vld [vmem:[#allocation34_spill] sm:$0xff] }
 0x2ab   : > { %v2562_v19 = vadd.f32 %v2530_v1, %v2465_v21  ;;  %v3114_v47 = vmul.f32 %v8720_v51, %v7417_v62  ;;  %v7433_v56 = vmul.f32 %v8722_v6, %v9017_v37  ;;  %v1959_v49 = vmul.f32 %v7190_v18, %v8752_v54  ;;  %v9023_v37 = vld [vmem:[#allocation53_spill] sm:$0xff] }
 0x2ac   : > { %v1797_v42 = vadd.f32 %v1765_v32, %v1699_v4  ;;  %v9019_v4 = vld [vmem:[#allocation36_spill] sm:$0xff]  ;;  %v1399_v1 = vadd.f32 %v9021_v29, %v9020_v59  ;;  %v3060_v48 = vadd.f32 %v3028_v28, %v2963_v24  ;;  %v7447_v62 = vmul.f32 %v8724_v57, %v9022_v41  ;;  %v7459_v59 = vld [vmem:[#allocation2 + $0x2f2] sm:$0xff] }
 0x2ad   : > { %v7441_v32 = vadd.f32 %v9019_v4, %v7315_v0  ;;  %v2660_v21 = vadd.f32 %v2628_v55, %v2562_v19  ;;  %v2056_v0 = vmul.f32 %v7306_v34, %v8784_v46  ;;  %v2153_v4 = vmul.f32 %v7323_v36, %v8792_v63  ;;  %9025 = vst [vmem:[#allocation78_spill] sm:$0xff] %v7459_v59  ;;  %v9026_v28 = vld [vmem:[#allocation89_spill] sm:$0xff]  ;;  %v3787_v36 = vpop.f32.mrf.mxu2 }
 0x2ae   : > { %v1894_v17 = vadd.f32 %v1862_v45, %v1797_v42  ;;  %v7451_v42 = vmul.f32 %v8838_v58, %v9023_v37  ;;  %v7453_v45 = vld [vmem:[#allocation2 + $0x2f1] sm:$0xff]  ;;  %v7462_v55 = vadd.f32 %v9026_v28, %v1399_v1  ;;  %v3157_v41 = vadd.f32 %v7369_v15, %v3060_v48  ;;  %v3610_v37 = vpop.f32.mrf.mxu1 }
 0x2af   : > { %9024 = vst [vmem:[#allocation28_spill] sm:$0xff] %v7453_v45  ;;  %v2757_v24 = vadd.f32 %v2725_v9, %v2660_v21  ;;  %v2250_v19 = vmul.f32 %v7325_v61, %v8794_v10  ;;  %v2445_v29 = vmul.f32 %v8800_v39, %v7453_v45  ;;  %v1688_v38 = vadd.f32 %v1656_v60, %v1591_v43 }
 0x2b0   : > { %v1991_v18 = vadd.f32 %v1959_v49, %v1894_v17  ;;  %9027 = vst [vmem:[#allocation62_spill] sm:$0xff] %v7462_v55  ;;  %v2348_v17 = vmul.f32 %v8799_v30, %v7437_v5  ;;  %v1754_v1 = vmul.f32 %v7179_v35, %v8694_v22  ;;  %v3255_v28 = vadd.f32 %v7373_v7, %v3157_v41 }
 0x2b1   : > { %v2854_v15 = vadd.f32 %v2822_v2, %v2757_v24  ;;  %v2542_v9 = vmul.f32 %v8801_v53, %v7459_v59  ;;  %v3788_v48 = vadd.f32 %v3787_v36, %v3610_v37  ;;  %v1851_v55 = vmul.f32 %v9004_v25, %v8710_v44  ;;  %v9028_v36 = vld [vmem:[#allocation14_spill] sm:$0xff]  ;;  %v9029_v24 = vld [vmem:[#allocation23_spill] sm:$0xff] }
 0x2b2   : > { %v2088_v49 = vadd.f32 %v2056_v0, %v1991_v18  ;;  %v2640_v18 = vmul.f32 %v7245_v16, %v8590_v3  ;;  %v1786_v0 = vadd.f32 %v1754_v1, %v1688_v38  ;;  %v3352_v60 = vadd.f32 %v7384_v14, %v3255_v28  ;;  %v9030_v38 = vld [vmem:[#allocation48_spill] sm:$0xff]  ;;  %v9031_v25 = vld [vmem:[#allocation87_spill] sm:$0xff]  ;;  %v7516_v59 = vld [vmem:[#allocation2 + $0x392] sm:$0xff] }
 0x2b3   : > { %v2952_v43 = vadd.f32 %v2920_v31, %v2854_v15  ;;  %v2737_v35 = vmul.f32 %v7257_v12, %v8591_v26  ;;  %v3883_v2 = vadd.f32 %v7168_v52, %v3788_v48  ;;  %v2045_v16 = vmul.f32 %v9029_v24, %v8784_v46  ;;  %v9032_v12 = vld [vmem:[#allocation60_spill] sm:$0xff]  ;;  %v7499_v15 = vld [vmem:[#allocation2 + $0x390] sm:$0xff]  ;;  %9040 = vst [vmem:[#allocation15_spill] sm:$0xff] %v7516_v59 }
 0x2b4   : > { %v2185_v21 = vadd.f32 %v2153_v4, %v2088_v49  ;;  %v1883_v41 = vadd.f32 %v1851_v55, %v1786_v0  ;;  %v1948_v4 = vmul.f32 %v9028_v36, %v8752_v54  ;;  %v3449_v49 = vadd.f32 %v9030_v38, %v3352_v60  ;;  %v9033_v55 = vld [vmem:[#allocation58_spill] sm:$0xff]  ;;  %9034 = vst [vmem:[#allocation84_spill] sm:$0xff] %v7499_v15  ;;  %v9036_v0 = vld [vmem:[#allocation64_spill] sm:$0xff]  ;;  %v9039_v52 = vld [vmem:[#allocation45_spill] sm:$0xff] }
 0x2b5   : > { %v3049_v37 = vadd.f32 %v3017_v23, %v2952_v43  ;;  %v2834_v14 = vmul.f32 %v9031_v25, %v8882_v50  ;;  %v3930_v31 = vmax.f32 %v3883_v2, 0.0  ;;  %v7493_v28 = vmul.f32 %v9032_v12, %v5311_v8  ;;  %v7501_v48 = vld [vmem:[#allocation2 + $0x391] sm:$0xff] }
 0x2b6   : > { %v2282_v7 = vadd.f32 %v2250_v19, %v2185_v21  ;;  %v7497_v19 = vmul.f32 %v9033_v55, %v8719_v11  ;;  %9035 = vst [vmem:[#allocation44_spill] sm:$0xff] %v7501_v48  ;;  %v1980_v21 = vadd.f32 %v1948_v4, %v1883_v41  ;;  %v7503_v23 = vld [vmem:[#allocation2 + $0x212] sm:$0xff]  ;;  %v3485_v60 = vadd.f32 %v9036_v0, %v3449_v49  ;;  %v1625_v4 = vld [vmem:[#allocation2 + $0x1a2] sm:$0xff] }
 0x2b7   : > { %v3146_v43 = vadd.f32 %v3114_v47, %v3049_v37  ;;  %v9038_v38 = vld [vmem:[#allocation54_spill] sm:$0xff]  ;;  %v7514_v12 = vmul.f32 %v9039_v52, %v8720_v51  ;;  %v2142_v47 = vmul.f32 %v7390_v33, %v8792_v63  ;;  %v2239_v49 = vmul.f32 %v8794_v10, %v7503_v23 }
 0x2b8   : > { %v2380_v1 = vadd.f32 %v2348_v17, %v2282_v7  ;;  %v3964_v17 = vsel %vm7196_vm3, %v3930_v31, %v3883_v2  ;;  %v7508_v7 = vld [vmem:[#allocation2 + $0x220] sm:$0xff]  ;;  %v1592_v25 = vadd.f32 %v7396_v20, %v9038_v38  ;;  %v2077_v41 = vadd.f32 %v2045_v16, %v1980_v21  ;;  %4185 = vmatmul.msk.f32.gmra.mxu3 %vm459_vm0, %v3485_v60  ;;  %v9041_v21 = vld [vmem:[#allocation65_spill] sm:$0xff]  ;;  %v9047_v52 = vld [vmem:[#allocation38_spill] sm:$0xff] }
 0x2b9   : > { %3997 = vst.msk [vmem:[%s7212_s21 + $0x10] sm:$0xff] %vm3994_vm2, %v3964_v17  ;;  %v3244_v2 = vadd.f32 %v7433_v56, %v3146_v43  ;;  %v7526_v20 = vmul.f32 %v8722_v6, %v7499_v15  ;;  %v2337_v31 = vmul.f32 %v8799_v30, %v7508_v7  ;;  %v9042_v56 = vld [vmem:[#allocation11_spill] sm:$0xff]  ;;  %v7543_v17 = vmul.f32 %v8838_v58, %v7516_v59  ;;  %v9048_v59 = vld [vmem:[#allocation33_spill] sm:$0xff] }
 0x2ba   : > { %v2477_v55 = vadd.f32 %v2445_v29, %v2380_v1  ;;  %v7530_v29 = vmul.f32 %v8724_v57, %v7501_v48  ;;  %v2174_v37 = vadd.f32 %v2142_v47, %v2077_v41  ;;  %v7536_v1 = vld [vmem:[#allocation2 + $0x221] sm:$0xff]  ;;  %v1408_v60 = vadd.f32 %v9042_v56, %v9041_v21  ;;  %v9046_v48 = vld [vmem:[#allocation41_spill] sm:$0xff] }
 0x2bb   : > { %v3341_v43 = vadd.f32 %v7447_v62, %v3244_v2  ;;  %9043 = vst [vmem:[#allocation17_spill] sm:$0xff] %v7543_v17  ;;  %v7545_v38 = vld [vmem:[#allocation2 + $0x262] sm:$0xff]  ;;  %v1689_v36 = vadd.f32 %v7403_v40, %v1592_v25  ;;  %v1571_v21 = vmul.f32 %v8776_v27, %v9047_v52  ;;  %v1626_v56 = vld [vmem:[#allocation2 + $0x1b2] sm:$0xff]  ;;  %v2434_v2 = vmul.f32 %v8800_v39, %v7536_v1 }
 0x2bc   : > { %v2574_v16 = vadd.f32 %v2542_v9, %v2477_v55  ;;  %9044 = vst [vmem:[#allocation49_spill] sm:$0xff] %v7545_v38  ;;  %v9045_v9 = vld [vmem:[#allocation20_spill] sm:$0xff]  ;;  %v2271_v47 = vadd.f32 %v2239_v49, %v2174_v37  ;;  %v1506_v15 = vadd.f32 %v9046_v48, %v1408_v60  ;;  %v7559_v17 = vadd.f32 %v9048_v59, %v7441_v32  ;;  %v4329_v40 = vld [vmem:[#allocation2 + $0x1b1] sm:$0xff]  ;;  %v9049_v37 = vld [vmem:[#allocation35_spill] sm:$0xff] }
 0x2bd   : > { %v7549_v55 = vmul.f32 %v9045_v9, %v1625_v4  ;;  %v3438_v62 = vadd.f32 %v7451_v42, %v3341_v43  ;;  %v7562_v25 = vmul.f32 %v4329_v40, %v8776_v27  ;;  %v7564_v48 = vld [vmem:[#allocation2 + $0x2b0] sm:$0xff]  ;;  %v1668_v42 = vmul.f32 %v9045_v9, %v7545_v38 }
 0x2be   : > { %v2672_v41 = vadd.f32 %v2640_v18, %v2574_v16  ;;  %v2369_v4 = vadd.f32 %v2337_v31, %v2271_v47  ;;  %v7566_v49 = vld [vmem:[#allocation2 + $0x2b1] sm:$0xff]  ;;  %v1603_v52 = vadd.f32 %v1571_v21, %v1506_v15  ;;  %v2531_v32 = vmul.f32 %v8801_v53, %v9049_v37 }
 0x2bf   : > { %v3474_v16 = vadd.f32 %v9036_v0, %v3438_v62  ;;  %v2629_v59 = vmul.f32 %v7407_v13, %v8590_v3  ;;  %v7576_v60 = vmul.f32 %v9045_v9, %v1626_v56  ;;  %v7578_v43 = vld [vmem:[#allocation2 + $0x2b2] sm:$0xff]  ;;  %v1766_v15 = vmul.f32 %v7306_v34, %v8694_v22  ;;  %v9052_v62 = vld [vmem:[#allocation32_spill] sm:$0xff] }
 0x2c0   : > { %v2769_v18 = vadd.f32 %v2737_v35, %v2672_v41  ;;  %v2466_v31 = vadd.f32 %v2434_v2, %v2369_v4  ;;  %v1700_v41 = vadd.f32 %v1668_v42, %v1603_v52  ;;  %v9051_v47 = vld [vmem:[#allocation97_spill] sm:$0xff]  ;;  %v2823_v40 = vmul.f32 %v9052_v62, %v8882_v50  ;;  %v9053_v4 = vld [vmem:[#allocation95_spill] sm:$0xff] }
 0x2c1   : > { %9050 = vst [vmem:[#allocation12_spill] sm:$0xff] %v7576_v60  ;;  %4174 = vmatmul.msk.f32.gmra.mxu1 %vm459_vm0, %v3474_v16  ;;  %v2726_v21 = vmul.f32 %v9051_v47, %v8591_v26  ;;  %v2921_v13 = vmul.f32 %v5311_v8, %v7564_v48  ;;  %v1863_v52 = vmul.f32 %v9053_v4, %v8710_v44  ;;  %v9054_v16 = vld [vmem:[#allocation69_spill] sm:$0xff]  ;;  %v9055_v47 = vld [vmem:[#allocation42_spill] sm:$0xff]  ;;  %v3790_v60 = vpop.f32.mrf.mxu2 }
 0x2c2   : > { %v2866_v35 = vadd.f32 %v2834_v14, %v2769_v18  ;;  %v3018_v14 = vmul.f32 %v8719_v11, %v7566_v49  ;;  %v2563_v2 = vadd.f32 %v2531_v32, %v2466_v31  ;;  %v1798_v18 = vadd.f32 %v1766_v15, %v1700_v41  ;;  %v9056_v41 = vld [vmem:[#allocation59_spill] sm:$0xff] }
 0x2c3   : > { %v3115_v42 = vmul.f32 %v8720_v51, %v7578_v43  ;;  %v7598_v37 = vmul.f32 %v8722_v6, %v9054_v16  ;;  %v7602_v62 = vmul.f32 %v8724_v57, %v9055_v47  ;;  %v1755_v38 = vmul.f32 %v9029_v24, %v8694_v22 }
 0x2c4   : > { %v2964_v56 = vadd.f32 %v7493_v28, %v2866_v35  ;;  %v2661_v32 = vadd.f32 %v2629_v59, %v2563_v2  ;;  %v1895_v35 = vadd.f32 %v1863_v52, %v1798_v18  ;;  %v1960_v31 = vmul.f32 %v7325_v61, %v8752_v54  ;;  %v7622_v2 = vld [vmem:[#allocation2 + $0x301] sm:$0xff]  ;;  %v3613_v61 = vpop.f32.mrf.mxu1 }
 0x2c5   : > { %v7611_v15 = vmul.f32 %v8838_v58, %v9056_v41  ;;  %v2057_v16 = vmul.f32 %v7437_v5, %v8784_v46  ;;  %v1787_v4 = vadd.f32 %v1755_v38, %v1689_v36  ;;  %v1852_v47 = vmul.f32 %v7390_v33, %v8710_v44  ;;  %v7624_v18 = vld [vmem:[#allocation2 + $0x302] sm:$0xff]  ;;  %v9059_v38 = vld [vmem:[#allocation74_spill] sm:$0xff] }
 0x2c6   : > { %v3061_v28 = vadd.f32 %v7497_v19, %v2964_v56  ;;  %v2758_v34 = vadd.f32 %v2726_v21, %v2661_v32  ;;  %v1992_v19 = vadd.f32 %v1960_v31, %v1895_v35  ;;  %v2154_v59 = vmul.f32 %v7453_v45, %v8792_v63  ;;  %v7620_v56 = vld [vmem:[#allocation2 + $0x300] sm:$0xff]  ;;  %9058 = vst [vmem:[#allocation93_spill] sm:$0xff] %v7624_v18  ;;  %v9062_v31 = vld [vmem:[#allocation78_spill] sm:$0xff] }
 0x2c7   : > { %9057 = vst [vmem:[#allocation85_spill] sm:$0xff] %v7620_v56  ;;  %v1884_v52 = vadd.f32 %v1852_v47, %v1787_v4  ;;  %v1949_v36 = vmul.f32 %v7503_v23, %v8752_v54  ;;  %v2046_v33 = vmul.f32 %v7508_v7, %v8784_v46  ;;  %v2251_v41 = vmul.f32 %v9062_v31, %v8794_v10 }
 0x2c8   : > { %v3158_v24 = vadd.f32 %v7514_v12, %v3061_v28  ;;  %v9060_v12 = vld [vmem:[#allocation88_spill] sm:$0xff]  ;;  %v2855_v32 = vadd.f32 %v2823_v40, %v2758_v34  ;;  %v2089_v35 = vadd.f32 %v2057_v16, %v1992_v19  ;;  %v2349_v4 = vmul.f32 %v8799_v30, %v7620_v56  ;;  %v7646_v40 = vld [vmem:[#allocation2 + $0x230] sm:$0xff]  ;;  %v9064_v19 = vld [vmem:[#allocation30_spill] sm:$0xff] }
 0x2c9   : > { %v7632_v21 = vadd.f32 %v9060_v12, %v9059_v38  ;;  %v2446_v23 = vmul.f32 %v8800_v39, %v7622_v2  ;;  %v3791_v47 = vadd.f32 %v3790_v60, %v3613_v61  ;;  %v1981_v46 = vadd.f32 %v1949_v36, %v1884_v52  ;;  %v9063_v16 = vld [vmem:[#allocation60_spill] sm:$0xff]  ;;  %v9065_v60 = vld [vmem:[#allocation17_spill] sm:$0xff]  ;;  %v9066_v52 = vld [vmem:[#allocation58_spill] sm:$0xff] }
 0x2ca   : > { %v3256_v28 = vadd.f32 %v7526_v20, %v3158_v24  ;;  %v2953_v12 = vadd.f32 %v2921_v13, %v2855_v32  ;;  %v2543_v34 = vmul.f32 %v8801_v53, %v7624_v18  ;;  %v7644_v20 = vld [vmem:[#allocation2 + $0x222] sm:$0xff]  ;;  %v2641_v24 = vmul.f32 %v9063_v16, %v8590_v3 }
 0x2cb   : > { %9061 = vst [vmem:[#allocation80_spill] sm:$0xff] %v7632_v21  ;;  %v2186_v21 = vadd.f32 %v2154_v59, %v2089_v35  ;;  %v3884_v56 = vadd.f32 %v9064_v19, %v3791_v47  ;;  %v2078_v31 = vadd.f32 %v2046_v33, %v1981_v46  ;;  %v2143_v61 = vmul.f32 %v7536_v1, %v8792_v63  ;;  %v7673_v19 = vld [vmem:[#allocation2 + $0x3a0] sm:$0xff] }
 0x2cc   : > { %v3353_v38 = vadd.f32 %v7530_v29, %v3256_v28  ;;  %v3050_v13 = vadd.f32 %v3018_v14, %v2953_v12  ;;  %v2738_v36 = vmul.f32 %v9066_v52, %v8591_v26  ;;  %v2240_v35 = vmul.f32 %v8794_v10, %v7644_v20  ;;  %v7667_v12 = vld [vmem:[#allocation2 + $0x271] sm:$0xff]  ;;  %v7685_v18 = vld [vmem:[#allocation2 + $0x3a1] sm:$0xff] }
 0x2cd   : > { %v2283_v59 = vadd.f32 %v2251_v41, %v2186_v21  ;;  %v3931_v28 = vmax.f32 %v3884_v56, 0.0  ;;  %v2175_v32 = vadd.f32 %v2143_v61, %v2078_v31  ;;  %v2338_v16 = vmul.f32 %v8799_v30, %v7646_v40  ;;  %v7663_v21 = vld [vmem:[#allocation2 + $0x231] sm:$0xff]  ;;  %9069 = vst [vmem:[#allocation91_spill] sm:$0xff] %v7667_v12  ;;  %v9070_v31 = vld [vmem:[#allocation84_spill] sm:$0xff] }
 0x2ce   : > { %v3450_v29 = vadd.f32 %v9065_v60, %v3353_v38  ;;  %v3147_v33 = vadd.f32 %v3115_v42, %v3050_v13  ;;  %v9067_v38 = vld [vmem:[#allocation45_spill] sm:$0xff]  ;;  %v2933_v61 = vmul.f32 %v9070_v31, %v5311_v8  ;;  %v9071_v60 = vld [vmem:[#allocation44_spill] sm:$0xff] }
 0x2cf   : > { %v2381_v47 = vadd.f32 %v2349_v4, %v2283_v59  ;;  %v2835_v14 = vmul.f32 %v9067_v38, %v8882_v50  ;;  %v7665_v41 = vld [vmem:[#allocation2 + $0x270] sm:$0xff]  ;;  %v3030_v52 = vmul.f32 %v9071_v60, %v8719_v11  ;;  %v3965_v42 = vsel %vm7196_vm3, %v3931_v28, %v3884_v56  ;;  %v7687_v60 = vld [vmem:[#allocation2 + $0x3a2] sm:$0xff]  ;;  %v9076_v28 = vld [vmem:[#allocation18_spill] sm:$0xff] }
 0x2d0   : > { %v3486_v46 = vadd.f32 %v9036_v0, %v3450_v29  ;;  %9068 = vst [vmem:[#allocation52_spill] sm:$0xff] %v7665_v41  ;;  %v2272_v4 = vadd.f32 %v2240_v35, %v2175_v32  ;;  %v3245_v29 = vadd.f32 %v7598_v37, %v3147_v33  ;;  %v9073_v59 = vld [vmem:[#allocation57_spill] sm:$0xff]  ;;  %v2435_v56 = vmul.f32 %v8800_v39, %v7663_v21 }
 0x2d1   : > { %v2478_v13 = vadd.f32 %v2446_v23, %v2381_v47  ;;  %3998 = vst.msk [vmem:[%s7212_s21 + $0x18] sm:$0xff] %vm3994_vm2, %v3965_v42  ;;  %v9074_v38 = vld [vmem:[#allocation25_spill] sm:$0xff]  ;;  %v1475_v32 = vmul.f32 %v9076_v28, %v7665_v41  ;;  %v1572_v37 = vmul.f32 %v8776_v27, %v7667_v12  ;;  %v7700_v47 = vmul.f32 %v8722_v6, %v7673_v19 }
 0x2d2   : > { %4186 = vmatmul.msk.f32.gmra.mxu3 %vm459_vm0, %v3486_v46  ;;  %v1409_v30 = vadd.f32 %v9074_v38, %v9073_v59  ;;  %v7683_v31 = vld [vmem:[#allocation2 + $0x272] sm:$0xff]  ;;  %v2370_v10 = vadd.f32 %v2338_v16, %v2272_v4  ;;  %v3342_v23 = vadd.f32 %v7602_v62, %v3245_v29  ;;  %v9077_v46 = vld [vmem:[#allocation15_spill] sm:$0xff]  ;;  %v7709_v62 = vmul.f32 %v8724_v57, %v7685_v18 }
 0x2d3   : > { %9075 = vst [vmem:[#allocation51_spill] sm:$0xff] %v7683_v31  ;;  %v2575_v35 = vadd.f32 %v2543_v34, %v2478_v13  ;;  %v3127_v33 = vmul.f32 %v9077_v46, %v8720_v51  ;;  %v9078_v42 = vld [vmem:[#allocation77_spill] sm:$0xff]  ;;  %v1669_v38 = vmul.f32 %v9045_v9, %v7683_v31  ;;  %v7713_v34 = vmul.f32 %v8838_v58, %v7687_v60  ;;  %v7717_v13 = vld [vmem:[#allocation2 + $0x2c0] sm:$0xff] }
 0x2d4   : > { %v2467_v16 = vadd.f32 %v2435_v56, %v2370_v10  ;;  %v2532_v4 = vmul.f32 %v8801_v53, %v9078_v42  ;;  %v1507_v59 = vadd.f32 %v1475_v32, %v1409_v30  ;;  %v3439_v12 = vadd.f32 %v7611_v15, %v3342_v23  ;;  %v7719_v30 = vld [vmem:[#allocation2 + $0x2c1] sm:$0xff] }
 0x2d5   : > { %v2673_v41 = vadd.f32 %v2641_v24, %v2575_v35  ;;  %v2630_v10 = vmul.f32 %v7564_v48, %v8590_v3  ;;  %v1690_v15 = vadd.f32 %v7549_v55, %v7559_v17  ;;  %v7726_v24 = vld [vmem:[%s8179_s4] ss:$0 sm:$0xff]  ;;  %v7729_v35 = vld [vmem:[#allocation2 + $0x2c2] sm:$0xff]  ;;  %v2727_v17 = vmul.f32 %v7566_v49, %v8591_v26 }
 0x2d6   : > { %v2564_v29 = vadd.f32 %v2532_v4, %v2467_v16  ;;  %v1604_v56 = vadd.f32 %v1572_v37, %v1507_v59  ;;  %v3475_v32 = vadd.f32 %v7726_v24, %v3439_v12  ;;  %v9079_v16 = vld [vmem:[#allocation62_spill] sm:$0xff]  ;;  %v4331_v42 = vld [vmem:[#allocation2 + $0x1c1] sm:$0xff]  ;;  %v1767_v59 = vmul.f32 %v7437_v5, %v8694_v22 }
 0x2d7   : > { %v2770_v23 = vadd.f32 %v2738_v36, %v2673_v41  ;;  %v7733_v48 = vadd.f32 %v7562_v25, %v9079_v16  ;;  %v7736_v37 = vmul.f32 %v4331_v42, %v8776_v27  ;;  %v2824_v41 = vmul.f32 %v7578_v43, %v8882_v50  ;;  %v9084_v5 = vld [vmem:[#allocation24_spill] sm:$0xff] }
 0x2d8   : > { %v2662_v4 = vadd.f32 %v2630_v10, %v2564_v29  ;;  %v1701_v55 = vadd.f32 %v1669_v38, %v1604_v56  ;;  %4175 = vmatmul.msk.f32.gmra.mxu1 %vm459_vm0, %v3475_v32  ;;  %v2922_v25 = vmul.f32 %v5311_v8, %v7717_v13  ;;  %v3019_v12 = vmul.f32 %v8719_v11, %v7719_v30  ;;  %v9081_v32 = vld [vmem:[#allocation82_spill] sm:$0xff] }
 0x2d9   : > { %9080 = vst [vmem:[#allocation56_spill] sm:$0xff] %v7736_v37  ;;  %v2867_v36 = vadd.f32 %v2835_v14, %v2770_v23  ;;  %v3116_v49 = vmul.f32 %v8720_v51, %v7729_v35  ;;  %v1864_v10 = vmul.f32 %v7453_v45, %v8710_v44  ;;  %v3214_v14 = vmul.f32 %v8722_v6, %v9081_v32  ;;  %v9082_v23 = vld [vmem:[#allocation61_spill] sm:$0xff]  ;;  %v9086_v45 = vld [vmem:[#allocation92_spill] sm:$0xff] }
 0x2da   : > { %v2759_v29 = vadd.f32 %v2727_v17, %v2662_v4  ;;  %v1799_v38 = vadd.f32 %v1767_v59, %v1701_v55  ;;  %v3311_v43 = vmul.f32 %v8724_v57, %v9082_v23  ;;  %v1756_v16 = vmul.f32 %v7508_v7, %v8694_v22  ;;  %v9083_v4 = vld [vmem:[#allocation78_spill] sm:$0xff]  ;;  %v9085_v55 = vld [vmem:[#allocation85_spill] sm:$0xff] }
 0x2db   : > { %v2965_v56 = vadd.f32 %v2933_v61, %v2867_v36  ;;  %v1961_v17 = vmul.f32 %v9083_v4, %v8752_v54  ;;  %v2058_v59 = vmul.f32 %v9085_v55, %v9084_v5  ;;  %v3408_v61 = vmul.f32 %v8838_v58, %v9086_v45  ;;  %v7767_v37 = vld [vmem:[#allocation2 + $0x310] sm:$0xff] }
 0x2dc   : > { %v2856_v42 = vadd.f32 %v2824_v41, %v2759_v29  ;;  %v1896_v31 = vadd.f32 %v1864_v10, %v1799_v38  ;;  %v1788_v36 = vadd.f32 %v1756_v16, %v1690_v15  ;;  %v1853_v32 = vmul.f32 %v7536_v1, %v8710_v44  ;;  %v9087_v41 = vld [vmem:[#allocation80_spill] sm:$0xff]  ;;  %v9088_v29 = vld [vmem:[#allocation86_spill] sm:$0xff] }
 0x2dd   : > { %v3062_v27 = vadd.f32 %v3030_v52, %v2965_v56  ;;  %v1950_v7 = vmul.f32 %v7644_v20, %v8752_v54  ;;  %v7773_v38 = vadd.f32 %v9088_v29, %v9087_v41  ;;  %v7775_v52 = vld [vmem:[#allocation2 + $0x311] sm:$0xff]  ;;  %v2047_v1 = vmul.f32 %v7646_v40, %v9084_v5  ;;  %v9091_v15 = vld [vmem:[#allocation68_spill] sm:$0xff]  ;;  %v3793_v29 = vpop.f32.mrf.mxu2 }
 0x2de   : > { %v2954_v23 = vadd.f32 %v2922_v25, %v2856_v42  ;;  %v1993_v28 = vadd.f32 %v1961_v17, %v1896_v31  ;;  %v7777_v56 = vld [vmem:[#allocation2 + $0x312] sm:$0xff]  ;;  %v1885_v45 = vadd.f32 %v1853_v32, %v1788_v36  ;;  %v9092_v31 = vld [vmem:[#allocation72_spill] sm:$0xff]  ;;  %v2155_v20 = vmul.f32 %v7622_v2, %v8792_v63  ;;  %v9093_v17 = vld [vmem:[#allocation27_spill] sm:$0xff] }
 0x2df   : > { %9089 = vst [vmem:[#allocation13_spill] sm:$0xff] %v7773_v38  ;;  %v3159_v10 = vadd.f32 %v3127_v33, %v3062_v27  ;;  %v7783_v25 = vadd.f32 %v9092_v31, %v9091_v15  ;;  %v9094_v41 = vld [vmem:[#allocation93_spill] sm:$0xff]  ;;  %v3616_v33 = vpop.f32.mrf.mxu1  ;;  %v9095_v36 = vld [vmem:[#allocation31_spill] sm:$0xff] }
 0x2e0   : > { %9090 = vst [vmem:[#allocation37_spill] sm:$0xff] %v7777_v56  ;;  %v3051_v16 = vadd.f32 %v3019_v12, %v2954_v23  ;;  %v2090_v42 = vadd.f32 %v2058_v59, %v1993_v28  ;;  %v2252_v27 = vmul.f32 %v9094_v41, %v9093_v17  ;;  %v2350_v32 = vmul.f32 %v9095_v36, %v7767_v37  ;;  %v2208_v38 = vld [vmem:[#allocation2 + $0x232] sm:$0xff]  ;;  %v7796_v59 = vld [vmem:[#allocation2 + $0x240] sm:$0xff] }
 0x2e1   : > { %v3257_v55 = vadd.f32 %v7700_v47, %v3159_v10  ;;  %v3794_v4 = vadd.f32 %v3793_v29, %v3616_v33  ;;  %v1982_v58 = vadd.f32 %v1950_v7, %v1885_v45  ;;  %v2447_v28 = vmul.f32 %v8800_v39, %v7775_v52  ;;  %v9096_v41 = vld [vmem:[#allocation30_spill] sm:$0xff] }
 0x2e2   : > { %v3148_v15 = vadd.f32 %v3116_v49, %v3051_v16  ;;  %v2187_v31 = vadd.f32 %v2155_v20, %v2090_v42  ;;  %v2544_v12 = vmul.f32 %v8801_v53, %v7777_v56  ;;  %v2144_v33 = vmul.f32 %v7663_v21, %v8792_v63  ;;  %v9097_v49 = vld [vmem:[#allocation84_spill] sm:$0xff] }
 0x2e3   : > { %v3354_v23 = vadd.f32 %v7709_v62, %v3257_v55  ;;  %v3885_v47 = vadd.f32 %v9096_v41, %v3794_v4  ;;  %v2079_v10 = vadd.f32 %v2047_v1, %v1982_v58  ;;  %v2642_v16 = vmul.f32 %v9097_v49, %v8590_v3  ;;  %v9098_v55 = vld [vmem:[#allocation44_spill] sm:$0xff]  ;;  %v3193_v49 = vld [vmem:[#allocation2 + $0x3b0] sm:$0xff] }
 0x2e4   : > { %v3246_v7 = vadd.f32 %v3214_v14, %v3148_v15  ;;  %v2284_v45 = vadd.f32 %v2252_v27, %v2187_v31  ;;  %v2241_v42 = vmul.f32 %v9093_v17, %v2208_v38  ;;  %v2339_v62 = vmul.f32 %v9095_v36, %v7796_v59  ;;  %v7812_v41 = vld [vmem:[#allocation2 + $0x241] sm:$0xff] }
 0x2e5   : > { %v3451_v20 = vadd.f32 %v7713_v34, %v3354_v23  ;;  %v3932_v29 = vmax.f32 %v3885_v47, 0.0  ;;  %v2176_v56 = vadd.f32 %v2144_v33, %v2079_v10  ;;  %v2739_v1 = vmul.f32 %v9098_v55, %v8591_v26  ;;  %v3796_v10 = vpop.f32.mrf.mxu2  ;;  %v9099_v33 = vld [vmem:[#allocation12_spill] sm:$0xff] }
 0x2e6   : > { %v3343_v4 = vadd.f32 %v3311_v43, %v3246_v7  ;;  %v2382_v58 = vadd.f32 %v2350_v32, %v2284_v45  ;;  %v2836_v14 = vmul.f32 %v9077_v46, %v8882_v50  ;;  %v2934_v34 = vmul.f32 %v7673_v19, %v5311_v8 }
 0x2e7   : > { %v3487_v27 = vadd.f32 %v7726_v24, %v3451_v20  ;;  %v3966_v15 = vsel %vm7196_vm3, %v3932_v29, %v3885_v47  ;;  %v2273_v31 = vadd.f32 %v2241_v42, %v2176_v56  ;;  %v3619_v32 = vpop.f32.mrf.mxu1  ;;  %v1691_v46 = vadd.f32 %v9099_v33, %v7733_v48  ;;  %v3290_v20 = vld [vmem:[#allocation2 + $0x3b1] sm:$0xff] }
 0x2e8   : > { %v3440_v23 = vadd.f32 %v3408_v61, %v3343_v4  ;;  %v2479_v43 = vadd.f32 %v2447_v28, %v2382_v58  ;;  %3999 = vst.msk [vmem:[%s7212_s21 + $0x20] sm:$0xff] %vm3994_vm2, %v3966_v15  ;;  %v1757_v7 = vmul.f32 %v7646_v40, %v8694_v22  ;;  %v3031_v19 = vmul.f32 %v7685_v18, %v8719_v11  ;;  %v9100_v4 = vld [vmem:[#allocation94_spill] sm:$0xff]  ;;  %v1627_v58 = vld [vmem:[#allocation2 + $0x1c2] sm:$0xff] }
 0x2e9   : > { %4187 = vmatmul.msk.f32.gmra.mxu3 %vm459_vm0, %v3487_v27  ;;  %v2371_v45 = vadd.f32 %v2339_v62, %v2273_v31  ;;  %v2436_v61 = vmul.f32 %v8800_v39, %v7812_v41  ;;  %v3797_v56 = vadd.f32 %v3796_v10, %v3619_v32  ;;  %v1854_v48 = vmul.f32 %v7663_v21, %v8710_v44  ;;  %v7840_v62 = vld [vmem:[%s8182_s7] ss:$0 sm:$0xff] }
 0x2ea   : > { %v3476_v28 = vadd.f32 %v7726_v24, %v3440_v23  ;;  %v2576_v47 = vadd.f32 %v2544_v12, %v2479_v43  ;;  %v1789_v42 = vadd.f32 %v1757_v7, %v1691_v46  ;;  %v3128_v40 = vmul.f32 %v7687_v60, %v8720_v51  ;;  %v7850_v43 = vld [vmem:[#allocation2 + $0x2d0] sm:$0xff]  ;;  %v2209_v46 = vld [vmem:[#allocation2 + $0x242] sm:$0xff] }
 0x2eb   : > { %v2468_v29 = vadd.f32 %v2436_v61, %v2371_v45  ;;  %v2533_v18 = vmul.f32 %v8801_v53, %v9100_v4  ;;  %v3886_v12 = vadd.f32 %v7840_v62, %v3797_v56  ;;  %v1951_v27 = vmul.f32 %v2208_v38, %v8752_v54  ;;  %v7860_v56 = vld [vmem:[#allocation2 + $0x250] sm:$0xff] }
 0x2ec   : > { %4176 = vmatmul.msk.f32.gmra.mxu1 %vm459_vm0, %v3476_v28  ;;  %v2674_v55 = vadd.f32 %v2642_v16, %v2576_v47  ;;  %v1886_v21 = vadd.f32 %v1854_v48, %v1789_v42  ;;  %v2048_v60 = vmul.f32 %v7796_v59, %v9084_v5  ;;  %v3226_v15 = vmul.f32 %v8722_v6, %v3193_v49  ;;  %v2987_v47 = vld [vmem:[#allocation2 + $0x2d1] sm:$0xff] }
 0x2ed   : > { %v2565_v31 = vadd.f32 %v2533_v18, %v2468_v29  ;;  %v2631_v23 = vmul.f32 %v7717_v13, %v8590_v3  ;;  %v3933_v32 = vmax.f32 %v3886_v12, 0.0  ;;  %v3323_v33 = vmul.f32 %v8724_v57, %v3290_v20  ;;  %v3799_v48 = vpop.f32.mrf.mxu2  ;;  %v9101_v18 = vld [vmem:[#allocation13_spill] sm:$0xff] }
 0x2ee   : > { %v2771_v10 = vadd.f32 %v2739_v1, %v2674_v55  ;;  %v1983_v16 = vadd.f32 %v1951_v27, %v1886_v21  ;;  %v1660_v38 = vmul.f32 %v9045_v9, %v1627_v58  ;;  %v2728_v45 = vmul.f32 %v7719_v30, %v8591_v26 }
 0x2ef   : > { %v2663_v7 = vadd.f32 %v2631_v23, %v2565_v31  ;;  %v2825_v61 = vmul.f32 %v7729_v35, %v8882_v50  ;;  %v3967_v13 = vsel %vm7196_vm3, %v3933_v32, %v3886_v12  ;;  %v2923_v1 = vmul.f32 %v5311_v8, %v7850_v43  ;;  %v3622_v30 = vpop.f32.mrf.mxu1  ;;  %v7868_v35 = vld [vmem:[#allocation2 + $0x2d2] sm:$0xff] }
 0x2f0   : > { %v2868_v28 = vadd.f32 %v2836_v14, %v2771_v10  ;;  %4000 = vst.msk [vmem:[%s7212_s21 + $0x28] sm:$0xff] %vm3994_vm2, %v3967_v13  ;;  %v2080_v49 = vadd.f32 %v2048_v60, %v1983_v16  ;;  %v2145_v42 = vmul.f32 %v7812_v41, %v8792_v63  ;;  %v2242_v29 = vmul.f32 %v9093_v17, %v2209_v46  ;;  %v9102_v14 = vld [vmem:[#allocation56_spill] sm:$0xff]  ;;  %v7878_v23 = vld [vmem:[#allocation2 + $0x251] sm:$0xff] }
 0x2f1   : > { %v2760_v20 = vadd.f32 %v2728_v45, %v2663_v7  ;;  %v3800_v4 = vadd.f32 %v3799_v48, %v3622_v30  ;;  %v1595_v12 = vadd.f32 %v9102_v14, %v9101_v18  ;;  %v2340_v21 = vmul.f32 %v9095_v36, %v7860_v56 }
 0x2f2   : > { %v2966_v58 = vadd.f32 %v2934_v34, %v2868_v28  ;;  %v2177_v55 = vadd.f32 %v2145_v42, %v2080_v49  ;;  %v1758_v27 = vmul.f32 %v7796_v59, %v8694_v22  ;;  %v3020_v31 = vmul.f32 %v8719_v11, %v2987_v47  ;;  %v9103_v34 = vld [vmem:[#allocation16_spill] sm:$0xff]  ;;  %v3387_v28 = vld [vmem:[#allocation2 + $0x3b2] sm:$0xff] }
 0x2f3   : > { %v2857_v60 = vadd.f32 %v2825_v61, %v2760_v20  ;;  %v3887_v32 = vadd.f32 %v7840_v62, %v3800_v4  ;;  %v1692_v10 = vadd.f32 %v1660_v38, %v1595_v12  ;;  %v3117_v7 = vmul.f32 %v8720_v51, %v7868_v35  ;;  %v7885_v42 = vld [vmem:[#allocation2 + $0x252] sm:$0xff] }
 0x2f4   : > { %v3063_v16 = vadd.f32 %v3031_v19, %v2966_v58  ;;  %v3215_v45 = vmul.f32 %v8722_v6, %v9103_v34  ;;  %v2274_v13 = vadd.f32 %v2242_v29, %v2177_v55  ;;  %v1855_v30 = vmul.f32 %v7812_v41, %v8710_v44  ;;  %v9104_v12 = vld [vmem:[#allocation66_spill] sm:$0xff] }
 0x2f5   : > { %v2955_v49 = vadd.f32 %v2923_v1, %v2857_v60  ;;  %v3934_v59 = vmax.f32 %v3887_v32, 0.0  ;;  %v1790_v61 = vadd.f32 %v1758_v27, %v1692_v10  ;;  %v2437_v19 = vmul.f32 %v8800_v39, %v7878_v23  ;;  %v9106_v27 = vld [vmem:[#allocation47_spill] sm:$0xff] }
 0x2f6   : > { %v3160_v48 = vadd.f32 %v3128_v40, %v3063_v16  ;;  %v2372_v38 = vadd.f32 %v2340_v21, %v2274_v13  ;;  %v1952_v20 = vmul.f32 %v2209_v46, %v8752_v54  ;;  %v2049_v18 = vmul.f32 %v7860_v56, %v9084_v5  ;;  %v9105_v21 = vld [vmem:[#allocation95_spill] sm:$0xff]  ;;  %v1434_v13 = vld [vmem:[#allocation2 + $0x1d0] sm:$0xff] }
 0x2f7   : > { %v3052_v4 = vadd.f32 %v3020_v31, %v2955_v49  ;;  %v3968_v29 = vsel %vm7196_vm3, %v3934_v59, %v3887_v32  ;;  %v1887_v1 = vadd.f32 %v1855_v30, %v1790_v61  ;;  %v3420_v58 = vmul.f32 %v9104_v12, %v3387_v28  ;;  %v7905_v32 = vld [vmem:[#allocation2 + $0x260] sm:$0xff]  ;;  %v1531_v28 = vld [vmem:[#allocation2 + $0x1d1] sm:$0xff]  ;;  %v3625_v30 = vpop.f32.mrf.mxu1 }
 0x2f8   : > { %v3258_v14 = vadd.f32 %v3226_v15, %v3160_v48  ;;  %v2469_v55 = vadd.f32 %v2437_v19, %v2372_v38  ;;  %v2534_v41 = vmul.f32 %v8801_v53, %v7885_v42  ;;  %4001 = vst.msk [vmem:[%s7212_s21 + $0x30] sm:$0xff] %vm3994_vm2, %v3968_v29  ;;  %v3312_v46 = vmul.f32 %v8724_v57, %v9105_v21  ;;  %v3802_v48 = vpop.f32.mrf.mxu2 }
 0x2f9   : > { %v3149_v40 = vadd.f32 %v3117_v7, %v3052_v4  ;;  %v3409_v60 = vmul.f32 %v9104_v12, %v9106_v27  ;;  %v1984_v31 = vadd.f32 %v1952_v20, %v1887_v1  ;;  %v2632_v16 = vmul.f32 %v7850_v43, %v8590_v3  ;;  %v1628_v20 = vld [vmem:[#allocation2 + $0x1d2] sm:$0xff]  ;;  %v2891_v4 = vld [vmem:[#allocation2 + $0x2e0] sm:$0xff] }
 0x2fa   : > { %v3355_v10 = vadd.f32 %v3323_v33, %v3258_v14  ;;  %v2566_v15 = vadd.f32 %v2534_v41, %v2469_v55  ;;  %v2729_v34 = vmul.f32 %v2987_v47, %v8591_v26  ;;  %v2146_v59 = vmul.f32 %v7878_v23, %v8792_v63  ;;  %v9107_v1 = vld [vmem:[#allocation18_spill] sm:$0xff]  ;;  %v9108_v14 = vld [vmem:[#allocation19_spill] sm:$0xff] }
 0x2fb   : > { %v3247_v49 = vadd.f32 %v3215_v45, %v3149_v40  ;;  %v2081_v7 = vadd.f32 %v2049_v18, %v1984_v31  ;;  %v2243_v61 = vmul.f32 %v7885_v42, %v9093_v17  ;;  %v2341_v19 = vmul.f32 %v9095_v36, %v7905_v32  ;;  %v2405_v45 = vld [vmem:[#allocation2 + $0x261] sm:$0xff] }
 0x2fc   : > { %v3452_v38 = vadd.f32 %v3420_v58, %v3355_v10  ;;  %v2664_v33 = vadd.f32 %v2632_v16, %v2566_v15  ;;  %v3803_v43 = vadd.f32 %v3802_v48, %v3625_v30  ;;  %v1467_v18 = vmul.f32 %v9107_v1, %v1434_v13  ;;  %v2988_v31 = vld [vmem:[#allocation2 + $0x2e1] sm:$0xff]  ;;  %v9109_v48 = vld [vmem:[#allocation49_spill] sm:$0xff] }
 0x2fd   : > { %v3344_v47 = vadd.f32 %v3312_v46, %v3247_v49  ;;  %v2178_v29 = vadd.f32 %v2146_v59, %v2081_v7  ;;  %v1564_v55 = vmul.f32 %v9108_v14, %v1531_v28  ;;  %v2826_v58 = vmul.f32 %v7868_v35, %v8882_v50  ;;  %v3085_v49 = vld [vmem:[#allocation2 + $0x2e2] sm:$0xff] }
 0x2fe   : > { %v3488_v41 = vadd.f32 %v7726_v24, %v3452_v38  ;;  %v2761_v40 = vadd.f32 %v2729_v34, %v2664_v33  ;;  %v3888_v21 = vadd.f32 %v7840_v62, %v3803_v43  ;;  %v1499_v46 = vadd.f32 %v1467_v18, %v7783_v25 }
 0x2ff   : > { %v3441_v27 = vadd.f32 %v3409_v60, %v3344_v47  ;;  %v2275_v10 = vadd.f32 %v2243_v61, %v2178_v29  ;;  %v1661_v15 = vmul.f32 %v9045_v9, %v1628_v20  ;;  %v2924_v13 = vmul.f32 %v5311_v8, %v2891_v4 }
 0x300   : > { %4188 = vmatmul.msk.f32.gmra.mxu3 %vm459_vm0, %v3488_v41  ;;  %v2858_v16 = vadd.f32 %v2826_v58, %v2761_v40  ;;  %v2438_v34 = vmul.f32 %v8800_v39, %v2405_v45  ;;  %v3935_v28 = vmax.f32 %v3888_v21, 0.0  ;;  %v1596_v60 = vadd.f32 %v1564_v55, %v1499_v46 }
 0x301   : > { %v3477_v35 = vadd.f32 %v7726_v24, %v3441_v27  ;;  %v2373_v7 = vadd.f32 %v2341_v19, %v2275_v10  ;;  %v1759_v59 = vmul.f32 %v7860_v56, %v8694_v22  ;;  %v3021_v9 = vmul.f32 %v8719_v11, %v2988_v31  ;;  %v9110_v22 = vld [vmem:[#allocation29_spill] sm:$0xff] }
 0x302   : > { %v2956_v25 = vadd.f32 %v2924_v13, %v2858_v16  ;;  %v3969_v61 = vsel %vm7196_vm3, %v3935_v28, %v3888_v21  ;;  %v2535_v38 = vmul.f32 %v8801_v53, %v9109_v48  ;;  %v1693_v33 = vadd.f32 %v1661_v15, %v1596_v60  ;;  %v4333_v21 = vld [vmem:[%s4582_s20 + $0xc0] sm:$0xff]  ;;  %v9112_v15 = vld [vmem:[#allocation78_spill] sm:$0xff] }
 0x303   : > { %4177 = vmatmul.msk.f32.gmra.mxu1 %vm459_vm0, %v3477_v35  ;;  %v2470_v30 = vadd.f32 %v2438_v34, %v2373_v7  ;;  %4002 = vst.msk [vmem:[%s7212_s21 + $0x38] sm:$0xff] %vm3994_vm2, %v3969_v61  ;;  %v3118_v43 = vmul.f32 %v8720_v51, %v3085_v49  ;;  %v3216_v56 = vmul.f32 %v8722_v6, %v9110_v22  ;;  %v3805_v34 = vpop.f32.mrf.mxu2 }
 0x304   : > { %v3053_v19 = vadd.f32 %v3021_v9, %v2956_v25  ;;  %v2633_v47 = vmul.f32 %v2891_v4, %v8590_v3  ;;  %v1791_v29 = vadd.f32 %v1759_v59, %v1693_v33  ;;  %v1856_v1 = vmul.f32 %v7878_v23, %v8710_v44  ;;  %v9111_v4 = vld [vmem:[#allocation28_spill] sm:$0xff] }
 0x305   : > { %v2567_v20 = vadd.f32 %v2535_v38, %v2470_v30  ;;  %v2730_v14 = vmul.f32 %v2988_v31, %v8591_v26  ;;  %v1953_v40 = vmul.f32 %v7885_v42, %v8752_v54  ;;  %v2050_v58 = vmul.f32 %v7905_v32, %v9084_v5  ;;  %v3628_v32 = vpop.f32.mrf.mxu1  ;;  %v9113_v25 = vld [vmem:[#allocation52_spill] sm:$0xff]  ;;  %v9114_v38 = vld [vmem:[#allocation85_spill] sm:$0xff] }
 0x306   : > { %v3150_v18 = vadd.f32 %v3118_v43, %v3053_v19  ;;  %v1888_v41 = vadd.f32 %v1856_v1, %v1791_v29  ;;  %v3313_v10 = vmul.f32 %v8724_v57, %v9111_v4  ;;  %v2827_v44 = vmul.f32 %v3085_v49, %v8882_v50  ;;  %v9115_v43 = vld [vmem:[#allocation91_spill] sm:$0xff]  ;;  %v2601_v29 = vld [vmem:[#allocation2 + $0x2f0] sm:$0xff] }
 0x307   : > { %v2665_v55 = vadd.f32 %v2633_v47, %v2567_v20  ;;  %v3410_v16 = vmul.f32 %v9104_v12, %v9112_v15  ;;  %v2925_v54 = vmul.f32 %v5311_v8, %v9110_v22  ;;  %v2147_v42 = vmul.f32 %v2405_v45, %v8792_v63  ;;  %v9116_v20 = vld [vmem:[#allocation51_spill] sm:$0xff] }
 0x308   : > { %4213 = vmatmul.msk.f32.vlgmr.msra.gmra.mxu3 %vm459_vm0, %v4333_v21  ;;  %v3248_v27 = vadd.f32 %v3216_v56, %v3150_v18  ;;  %v1985_v23 = vadd.f32 %v1953_v40, %v1888_v41  ;;  %v3022_v35 = vmul.f32 %v8719_v11, %v9111_v4  ;;  %v3806_v49 = vadd.f32 %v3805_v34, %v3628_v32  ;;  %v2698_v40 = vld [vmem:[#allocation2 + $0x2f1] sm:$0xff] }
 0x309   : > { %v2762_v46 = vadd.f32 %v2730_v14, %v2665_v55  ;;  %v2244_v59 = vmul.f32 %v9093_v17, %v9109_v48  ;;  %v2342_v9 = vmul.f32 %v9095_v36, %v9113_v25  ;;  %v3119_v63 = vmul.f32 %v8720_v51, %v9112_v15  ;;  %v4334_v17 = vld [vmem:[%s4582_s20 + $0xc8] sm:$0xff]  ;;  %v4336_v25 = vld [vmem:[%s4582_s20 + $0xd8] sm:$0xff] }
 0x30a   : > { %v3345_v31 = vadd.f32 %v3313_v10, %v3248_v27  ;;  %v2082_v5 = vadd.f32 %v2050_v58, %v1985_v23  ;;  %v3889_v45 = vadd.f32 %v7840_v62, %v3806_v49  ;;  %v3217_v33 = vmul.f32 %v8722_v6, %v9114_v38  ;;  %v9117_v27 = vld [vmem:[#allocation93_spill] sm:$0xff] }
 0x30b   : > { %v2859_v13 = vadd.f32 %v2827_v44, %v2762_v46  ;;  %v2439_v22 = vmul.f32 %v8800_v39, %v9115_v43  ;;  %v2536_v47 = vmul.f32 %v8801_v53, %v9116_v20  ;;  %v3314_v14 = vmul.f32 %v8724_v57, %v7622_v2  ;;  %v3808_v41 = vpop.f32.mrf.mxu2  ;;  %v2795_v46 = vld [vmem:[#allocation2 + $0x2f2] sm:$0xff] }
 0x30c   : > { %v3442_v28 = vadd.f32 %v3410_v16, %v3345_v31  ;;  %v2179_v60 = vadd.f32 %v2147_v42, %v2082_v5  ;;  %v3936_v36 = vmax.f32 %v3889_v45, 0.0  ;;  %v3411_v53 = vmul.f32 %v9104_v12, %v9117_v27  ;;  %v4335_v16 = vld [vmem:[%s4582_s20 + $0xd0] sm:$0xff] }
 0x30d   : > { %v2957_v7 = vadd.f32 %v2925_v54, %v2859_v13  ;;  %v3631_v55 = vpop.f32.mrf.mxu1  ;;  %v2634_v10 = vmul.f32 %v8590_v3, %v2601_v29  ;;  %v2731_v15 = vmul.f32 %v8591_v26, %v2698_v40  ;;  %v2828_v42 = vmul.f32 %v8882_v50, %v2795_v46 }
 0x30e   : > { %v3478_v61 = vadd.f32 %v7726_v24, %v3442_v28  ;;  %v2276_v19 = vadd.f32 %v2244_v59, %v2179_v60  ;;  %v3970_v1 = vsel %vm7196_vm3, %v3936_v36, %v3889_v45  ;;  %v3809_v58 = vadd.f32 %v3808_v41, %v3631_v55  ;;  %v9118_v45 = vld [vmem:[#allocation37_spill] sm:$0xff] }
 0x30f   : > { %v3054_v30 = vadd.f32 %v3022_v35, %v2957_v7  ;;  %4003 = vst.msk [vmem:[%s7212_s21 + $0x40] sm:$0xff] %vm3994_vm2, %v3970_v1  ;;  %v2926_v3 = vmul.f32 %v5311_v8, %v9114_v38  ;;  %v3023_v7 = vmul.f32 %v8719_v11, %v7622_v2  ;;  %v3120_v8 = vmul.f32 %v8720_v51, %v9117_v27 }
 0x310   : > { %4178 = vmatmul.msk.f32.gmra.mxu1 %vm459_vm0, %v3478_v61  ;;  %4214 = vmatmul.msk.f32.gmra.mxu3 %vm459_vm0, %v4334_v17  ;;  %v2374_v56 = vadd.f32 %v2342_v9, %v2276_v19  ;;  %v3890_v44 = vadd.f32 %v7840_v62, %v3809_v58  ;;  %v3218_v59 = vmul.f32 %v8722_v6, %v7767_v37  ;;  %v3676_v58 = vpop.f32.mrf.mxu3 }
 0x311   : > { %v3151_v48 = vadd.f32 %v3119_v63, %v3054_v30  ;;  %v3315_v63 = vmul.f32 %v8724_v57, %v7775_v52  ;;  %v3412_v51 = vmul.f32 %v9104_v12, %v9118_v45  ;;  %v4337_v57 = vld [vmem:[%s4582_s20 + $0xe0] sm:$0xff] }
 0x312   : > { %v2471_v39 = vadd.f32 %v2439_v22, %v2374_v56  ;;  %v3937_v13 = vmax.f32 %v3890_v44, 0.0  ;;  %v4338_v56 = vld [vmem:[%s4582_s20 + $0xe8] sm:$0xff] }
 0x313   : > { %v3249_v18 = vadd.f32 %v3217_v33, %v3151_v48  ;;  %v3811_v28 = vpop.f32.mrf.mxu2 }
 0x314   : > { %v2568_v4 = vadd.f32 %v2536_v47, %v2471_v39  ;;  %v3971_v32 = vsel %vm7196_vm3, %v3937_v13, %v3890_v44 }
 0x315   : > { %v3346_v21 = vadd.f32 %v3314_v14, %v3249_v18  ;;  %4004 = vst.msk [vmem:[%s7212_s21 + $0x48] sm:$0xff] %vm3994_vm2, %v3971_v32  ;;  %v3634_v26 = vpop.f32.mrf.mxu1  ;;  %v4339_v14 = vld [vmem:[%s4582_s20 + $0xf0] sm:$0xff] }
 0x316   : > { %v2666_v31 = vadd.f32 %v2634_v10, %v2568_v4  ;;  %v3812_v35 = vadd.f32 %v3811_v28, %v3634_v26 }
 0x317   : > { %v3443_v23 = vadd.f32 %v3411_v53, %v3346_v21  ;;  %v4340_v53 = vld [vmem:[%s4582_s20 + $0xf8] sm:$0xff]  ;;  %s4227_s20 = sshll.u32 %s4511_s9, 8  ;;  %s4028_s9 = scalar_lea.sflag [#allocation5], %s4576_s26 }
 0x318   : > { %4215 = vmatmul.msk.f32.gmra.mxu3 %vm459_vm0, %v4335_v16  ;;  %v2763_v5 = vadd.f32 %v2731_v15, %v2666_v31  ;;  %v3891_v50 = vadd.f32 %v7840_v62, %v3812_v35  ;;  %v3679_v31 = vpop.f32.mrf.mxu3  ;;  %s4039_s14 = scalar_lea.hbm %s8183_s8, %s4227_s20 }
 0x319   : > { %v3479_v54 = vadd.f32 %v7726_v24, %v3443_v23  ;;  %s4042_s16 = sshll.u32 %s4039_s14, 4  ;;  %s4043_s16 = int_to_ptr.hbm [resolvable:$true] %s4042_s16 }
 0x31a   : > { %v2860_v34 = vadd.f32 %v2828_v42, %v2763_v5  ;;  %v3938_v9 = vmax.f32 %v3891_v50, 0.0  ;;  %s4385_s10 = sshra.s32 %s4043_s16, 4  ;;  %s4386_s10 = int_to_ptr.hbm [resolvable:$true] %s4385_s10 }
 0x31b   : > { %4179 = vmatmul.msk.f32.gmra.mxu1 %vm459_vm0, %v3479_v54  ;;  %v3814_v37 = vpop.f32.mrf.mxu2  ;;  %s4387_s12 = scalar_lea.hbm %s4386_s10, 256  ;;  %p4392_p0 = scmp.lt.s32.totalorder %s4386_s10, %s8183_s8 }
 0x31c   : > { %v2958_v49 = vadd.f32 %v2926_v3, %v2860_v34  ;;  %v3972_v11 = vsel %vm7196_vm3, %v3938_v9, %v3891_v50  ;;  %p4388_p6 = scmp.ne.s32.totalorder %s4386_s10, %s4387_s12  ;;  %p4393_p1 = scmp.lt.s32.totalorder %s4391_s15, %s4387_s12 }
 0x31d   : > { %4005 = vst.msk [vmem:[%s7212_s21 + $0x50] sm:$0xff] %vm3994_vm2, %v3972_v11  ;;  %v3637_v6 = vpop.f32.mrf.mxu1 }
 0x31e   : > { %v3055_v60 = vadd.f32 %v3023_v7, %v2958_v49  ;;  %v3815_v30 = vadd.f32 %v3814_v37, %v3637_v6  ;;  %p4389_p9 = pnand %p4388_p6, %p4540_p11  ;;  %p4394_p3 = por %p4393_p1, %p4392_p0 }
 0x320   : > { %4216 = vmatmul.msk.f32.gmra.mxu3 %vm459_vm0, %v4336_v25  ;;  %v3152_v61 = vadd.f32 %v3120_v8, %v3055_v60  ;;  %v3892_v33 = vadd.f32 %v7840_v62, %v3815_v30  ;;  %v3682_v32 = vpop.f32.mrf.mxu3  ;;  %p4390_p13 = pneg %p4389_p9 }
 0x322   : > { %v3250_v2 = vadd.f32 %v3218_v59, %v3152_v61  ;;  %v3939_v52 = vmax.f32 %v3892_v33, 0.0  ;;  %p4395_p4 = pnand %p4394_p3, %p4390_p13 }
 0x323   : > { %v3817_v17 = vpop.f32.mrf.mxu2 }
 0x324   : > { %v3347_v38 = vadd.f32 %v3315_v63, %v3250_v2  ;;  %v3973_v12 = vsel %vm7196_vm3, %v3939_v52, %v3892_v33 }
 0x325   : > { %4006 = vst.msk [vmem:[%s7212_s21 + $0x58] sm:$0xff] %vm3994_vm2, %v3973_v12  ;;  %v3640_v22 = vpop.f32.mrf.mxu1 }
 0x326   : > { %v3444_v19 = vadd.f32 %v3412_v51, %v3347_v38  ;;  %v3818_v36 = vadd.f32 %v3817_v17, %v3640_v22 }
 0x328   : > { %4217 = vmatmul.msk.f32.gmra.mxu3 %vm459_vm0, %v4337_v57  ;;  %v3480_v43 = vadd.f32 %v7726_v24, %v3444_v19  ;;  %v3893_v48 = vadd.f32 %v7840_v62, %v3818_v36  ;;  %v3685_v60 = vpop.f32.mrf.mxu3 }
 0x32a   : > { %4180 = vmatmul.msk.f32.gmra.mxu1 %vm459_vm0, %v3480_v43  ;;  %v3940_v20 = vmax.f32 %v3893_v48, 0.0 }
 0x32b   : > { %v3820_v29 = vpop.f32.mrf.mxu2 }
 0x32c   : > { %v3974_v24 = vsel %vm7196_vm3, %v3940_v20, %v3893_v48 }
 0x32d   : > { %4007 = vst.msk [vmem:[%s7212_s21 + $0x60] sm:$0xff] %vm3994_vm2, %v3974_v24  ;;  %v3643_v47 = vpop.f32.mrf.mxu1 }
 0x32e   : > { %v3821_v1 = vadd.f32 %v3820_v29, %v3643_v47 }
 0x330   : > { %4218 = vmatmul.msk.f32.gmra.mxu3 %vm459_vm0, %v4338_v56  ;;  %v3894_v18 = vadd.f32 %v7840_v62, %v3821_v1 }
 0x332   : > { %v3941_v39 = vmax.f32 %v3894_v18, 0.0 }
 0x333   : > { %v3823_v40 = vpop.f32.mrf.mxu2 }
 0x334   : > { %v3975_v55 = vsel %vm7196_vm3, %v3941_v39, %v3894_v18 }
 0x335   : > { %4008 = vst.msk [vmem:[%s7212_s21 + $0x68] sm:$0xff] %vm3994_vm2, %v3975_v55  ;;  %v3646_v41 = vpop.f32.mrf.mxu1 }
 0x336   : > { %v3824_v21 = vadd.f32 %v3823_v40, %v3646_v41 }
 0x338   : > { %4219 = vmatmul.msk.f32.gmra.mxu3 %vm459_vm0, %v4339_v14  ;;  %v3895_v27 = vadd.f32 %v7840_v62, %v3824_v21 }
 0x33a   : > { %v3942_v4 = vmax.f32 %v3895_v27, 0.0 }
 0x33b   : > { %v3826_v44 = vpop.f32.mrf.mxu2  ;;  %v3688_v2 = vpop.f32.mrf.mxu3 }
 0x33c   : > { %v3976_v10 = vsel %vm7196_vm3, %v3942_v4, %v3895_v27 }
 0x33d   : > { %4009 = vst.msk [vmem:[%s7212_s21 + $0x70] sm:$0xff] %vm3994_vm2, %v3976_v10  ;;  %v3649_v46 = vpop.f32.mrf.mxu1 }
 0x33e   : > { %v3827_v23 = vadd.f32 %v3826_v44, %v3649_v46 }
 0x340   : > { %4220 = vmatmul.msk.f32.gmra.mxu3 %vm459_vm0, %v4340_v53  ;;  %v3896_v15 = vadd.f32 %v7840_v62, %v3827_v23 }
 0x342   : > { %v3943_v16 = vmax.f32 %v3896_v15, 0.0 }
 0x343   : > { %v3829_v5 = vpop.f32.mrf.mxu2 }
 0x344   : > { %v3977_v13 = vsel %vm7196_vm3, %v3943_v16, %v3896_v15 }
 0x345   : > { %4010 = vst.msk [vmem:[%s7212_s21 + $0x78] sm:$0xff] %vm3994_vm2, %v3977_v13  ;;  %v3652_v54 = vpop.f32.mrf.mxu1 }
 0x346   : > { %v3830_v42 = vadd.f32 %v3829_v5, %v3652_v54 }
 0x348   : > { %v3897_v3 = vadd.f32 %v7840_v62, %v3830_v42 }
 0x34a   : > { %v3944_v34 = vmax.f32 %v3897_v3, 0.0 }
 0x34b   : > { %v3832_v35 = vpop.f32.mrf.mxu2 }
 0x34c   : > { %v3978_v26 = vsel %vm7196_vm3, %v3944_v34, %v3897_v3 }
 0x34d   : > { %4011 = vst.msk [vmem:[%s7212_s21 + $0x80] sm:$0xff] %vm3994_vm2, %v3978_v26  ;;  %v3655_v28 = vpop.f32.mrf.mxu1 }
 0x34e   : > { %v3833_v49 = vadd.f32 %v3832_v35, %v3655_v28 }
 0x350   : > { %v3898_v7 = vadd.f32 %v7840_v62, %v3833_v49 }
 0x352   : > { %v3945_v50 = vmax.f32 %v3898_v7, 0.0 }
 0x353   : > { %v3835_v25 = vpop.f32.mrf.mxu2 }
 0x354   : > { %v3979_v8 = vsel %vm7196_vm3, %v3945_v50, %v3898_v7 }
 0x355   : > { %4012 = vst.msk [vmem:[%s7212_s21 + $0x88] sm:$0xff] %vm3994_vm2, %v3979_v8  ;;  %v3658_v59 = vpop.f32.mrf.mxu1  ;;  %v8068_v38 = vpop.f32.mrf.mxu3 }
 0x356   : > { %v3836_v9 = vadd.f32 %v3835_v25, %v3658_v59 }
 0x358   : > { %v3899_v61 = vadd.f32 %v7840_v62, %v3836_v9 }
 0x35a   : > { %v3946_v63 = vmax.f32 %v3899_v61, 0.0 }
 0x35b   : > { %v3838_v45 = vpop.f32.mrf.mxu2 }
 0x35c   : > { %v3980_v11 = vsel %vm7196_vm3, %v3946_v63, %v3899_v61 }
 0x35d   : > { %4013 = vst.msk [vmem:[%s7212_s21 + $0x90] sm:$0xff] %vm3994_vm2, %v3980_v11 }
 0x363   : > { %v3841_v57 = vpop.f32.mrf.mxu2 }
 0x369   : > { %v3661_v51 = vpop.f32.mrf.mxu1 }
 0x36a   : > { %v3839_v6 = vadd.f32 %v3838_v45, %v3661_v51 }
 0x36b   : > { %v3844_v48 = vpop.f32.mrf.mxu2 }
 0x36c   : > { %v3900_v37 = vadd.f32 %v7840_v62, %v3839_v6  ;;  %v8074_v19 = vpop.f32.mrf.mxu3 }
 0x36e   : > { %v3947_v30 = vmax.f32 %v3900_v37, 0.0 }
 0x370   : > { %v3981_v33 = vsel %vm7196_vm3, %v3947_v30, %v3900_v37 }
 0x371   : > { %4014 = vst.msk [vmem:[%s7212_s21 + $0x98] sm:$0xff] %vm3994_vm2, %v3981_v33 }
 0x380   : > { %v3664_v52 = vpop.f32.mrf.mxu1 }
 0x381   : > { %v3842_v43 = vadd.f32 %v3841_v57, %v3664_v52 }
 0x383   : > { %v3901_v12 = vadd.f32 %v7840_v62, %v3842_v43  ;;  %v8077_v22 = vpop.f32.mrf.mxu3 }
 0x385   : > { %v3948_v17 = vmax.f32 %v3901_v12, 0.0 }
 0x387   : > { %v3982_v36 = vsel %vm7196_vm3, %v3948_v17, %v3901_v12 }
 0x388   : > { %4015 = vst.msk [vmem:[%s7212_s21 + $0xa0] sm:$0xff] %vm3994_vm2, %v3982_v36 }
 0x38b   : > { %v3853_v56 = vpop.f32.mrf.mxu3 }
 0x38c   : > { %v3854_v20 = vadd.f32 %v3853_v56, %v3676_v58  ;;  %v3847_v58 = vpop.f32.mrf.mxu2 }
 0x38d   : > { %v3667_v24 = vpop.f32.mrf.mxu1 }
 0x38e   : > { %v3845_v47 = vadd.f32 %v3844_v48, %v3667_v24  ;;  %v3905_v29 = vadd.f32 %v7840_v62, %v3854_v20 }
 0x390   : > { %v3902_v1 = vadd.f32 %v7840_v62, %v3845_v47  ;;  %v3952_v18 = vmax.f32 %v3905_v29, 0.0 }
 0x392   : > { %v3949_v14 = vmax.f32 %v3902_v1, 0.0  ;;  %v3986_v39 = vsel %vm7196_vm3, %v3952_v18, %v3905_v29 }
 0x393   : > { %4019 = vst.msk [vmem:[%s7212_s21 + $0xc0] sm:$0xff] %vm3994_vm2, %v3986_v39  ;;  %v3856_v55 = vpop.f32.mrf.mxu3 }
 0x394   : > { %v3983_v41 = vsel %vm7196_vm3, %v3949_v14, %v3902_v1  ;;  %v3857_v40 = vadd.f32 %v3856_v55, %v3679_v31  ;;  %v3850_v3 = vpop.f32.mrf.mxu2 }
 0x395   : > { %4016 = vst.msk [vmem:[%s7212_s21 + $0xa8] sm:$0xff] %vm3994_vm2, %v3983_v41 }
 0x396   : > { %v3906_v21 = vadd.f32 %v7840_v62, %v3857_v40 }
 0x398   : > { %v3670_v27 = vpop.f32.mrf.mxu1  ;;  %v3953_v53 = vmax.f32 %v3906_v21, 0.0 }
 0x399   : > { %v3848_v4 = vadd.f32 %v3847_v58, %v3670_v27 }
 0x39a   : > { %v3987_v10 = vsel %vm7196_vm3, %v3953_v53, %v3906_v21 }
 0x39b   : > { %v3903_v46 = vadd.f32 %v7840_v62, %v3848_v4  ;;  %4020 = vst.msk [vmem:[%s7212_s21 + $0xc8] sm:$0xff] %vm3994_vm2, %v3987_v10  ;;  %v3859_v44 = vpop.f32.mrf.mxu3 }
 0x39c   : > { %v3860_v23 = vadd.f32 %v3859_v44, %v3682_v32 }
 0x39d   : > { %v3950_v15 = vmax.f32 %v3903_v46, 0.0 }
 0x39e   : > { %v3907_v31 = vadd.f32 %v7840_v62, %v3860_v23 }
 0x39f   : > { %v3984_v16 = vsel %vm7196_vm3, %v3950_v15, %v3903_v46 }
 0x3a0   : > { %4017 = vst.msk [vmem:[%s7212_s21 + $0xb0] sm:$0xff] %vm3994_vm2, %v3984_v16  ;;  %v3954_v13 = vmax.f32 %v3907_v31, 0.0 }
 0x3a2   : > { %v3988_v54 = vsel %vm7196_vm3, %v3954_v13, %v3907_v31 }
 0x3a3   : > { %4021 = vst.msk [vmem:[%s7212_s21 + $0xd0] sm:$0xff] %vm3994_vm2, %v3988_v54  ;;  %v3862_v5 = vpop.f32.mrf.mxu3 }
 0x3a4   : > { %v3863_v42 = vadd.f32 %v3862_v5, %v3685_v60 }
 0x3a6   : > { %v3908_v32 = vadd.f32 %v7840_v62, %v3863_v42 }
 0x3a7   : > { %v3673_v34 = vpop.f32.mrf.mxu1 }
 0x3a8   : > { %v3955_v26 = vmax.f32 %v3908_v32, 0.0  ;;  %v3851_v28 = vadd.f32 %v3850_v3, %v3673_v34 }
 0x3aa   : > { %v3989_v35 = vsel %vm7196_vm3, %v3955_v26, %v3908_v32  ;;  %v3904_v49 = vadd.f32 %v7840_v62, %v3851_v28 }
 0x3ab   : > { %4022 = vst.msk [vmem:[%s7212_s21 + $0xd8] sm:$0xff] %vm3994_vm2, %v3989_v35  ;;  %v3865_v7 = vpop.f32.mrf.mxu3 }
 0x3ac   : > { %v3866_v50 = vadd.f32 %v3865_v7, %v3688_v2  ;;  %v3951_v8 = vmax.f32 %v3904_v49, 0.0 }
 0x3ae   : > { %v3909_v60 = vadd.f32 %v7840_v62, %v3866_v50  ;;  %v3985_v59 = vsel %vm7196_vm3, %v3951_v8, %v3904_v49 }
 0x3af   : > { %4018 = vst.msk [vmem:[%s7212_s21 + $0xb8] sm:$0xff] %vm3994_vm2, %v3985_v59 }
 0x3b0   : > { %v3956_v25 = vmax.f32 %v3909_v60, 0.0 }
 0x3b2   : > { %v3990_v9 = vsel %vm7196_vm3, %v3956_v25, %v3909_v60 }
 0x3b3   : > { %4023 = vst.msk [vmem:[%s7212_s21 + $0xe0] sm:$0xff] %vm3994_vm2, %v3990_v9  ;;  %v3868_v61 = vpop.f32.mrf.mxu3 }
 0x3b4   : > { %v3869_v63 = vadd.f32 %v3868_v61, %v8068_v38 }
 0x3b6   : > { %v3910_v11 = vadd.f32 %v7840_v62, %v3869_v63 }
 0x3b8   : > { %v3957_v2 = vmax.f32 %v3910_v11, 0.0 }
 0x3ba   : > { %v3991_v45 = vsel %vm7196_vm3, %v3957_v2, %v3910_v11 }
 0x3bb   : > { %4024 = vst.msk [vmem:[%s7212_s21 + $0xe8] sm:$0xff] %vm3994_vm2, %v3991_v45  ;;  %v3871_v51 = vpop.f32.mrf.mxu3 }
 0x3bc   : > { %v3872_v6 = vadd.f32 %v3871_v51, %v8074_v19 }
 0x3be   : > { %v3911_v37 = vadd.f32 %v7840_v62, %v3872_v6 }
 0x3c0   : > { %v3958_v30 = vmax.f32 %v3911_v37, 0.0 }
 0x3c2   : > { %v3992_v38 = vsel %vm7196_vm3, %v3958_v30, %v3911_v37 }
 0x3c3   : > { %4025 = vst.msk [vmem:[%s7212_s21 + $0xf0] sm:$0xff] %vm3994_vm2, %v3992_v38  ;;  %v3874_v33 = vpop.f32.mrf.mxu3 }
 0x3c4   : > { %v3875_v57 = vadd.f32 %v3874_v33, %v8077_v22 }
 0x3c6   : > { %v3912_v19 = vadd.f32 %v7840_v62, %v3875_v57 }
 0x3c8   : > { %v3959_v52 = vmax.f32 %v3912_v19, 0.0 }
 0x3ca   : > { %v3993_v43 = vsel %vm7196_vm3, %v3959_v52, %v3912_v19 }
 0x3cb   : > { %4026 = vst.msk [vmem:[%s7212_s21 + $0xf8] sm:$0xff] %vm3994_vm2, %v3993_v43 }
 0x3cc   : > { %4398 = shalt.err (!%p4395_p4)
}
 0x3cd   : > { %s4443_s26 = smov 128   ;;  %s4444_s21 = smov 8  }
 0x3ce   : > { %4233 = dma.vmem_to_hbm [thread:$0]  (%p4540_p11), %s4041_s25, 4096, %s4043_s16, %s4028_s9, %s4443_s26, %s4443_s26, %s4444_s21  }
 0x3cf PF: > { %s4057_s20 = sand.u32 1, %s4425_s27   ;;  %p9119_p7 = scmp.ge.s32.totalorder %s4437_s30, 2 }
 0x3d0   : > { %s4058_s19 = scalar_lea.sflag [#allocation5], %s4057_s20 }
 0x3d1   : > { %p4240_p5 = pnand %p9119_p7, %p4544_p12 }
 0x3d3   : > { %p4241_p8 = pneg %p4240_p5 }
 0x3d5   : > { %4420 = dma.done.wait (%p4241_p8), %s4058_s19, 4096  }
 0x3d6   : > { %4422 = vsyncadd (%p4241_p8), %s4058_s19, 4294963200  ;;  %s9120_s24 = sld [smem:[#allocation9_spill]]  ;;  %p21_p10 = scmp.ge.s32.totalorder %s4515_s11, 4  }
 0x3d7   : > { %s9121_s29 = sld [smem:[#allocation10_spill]]  ;;  %s9122_s27 = smov %s4429_s28 }
 0x3d8   : > { %s9124_s30 = smov %s4515_s11  ;;  %23 = sbr.rel (!%p21_p10) target bundleno = 5 (0x5), region = 105 }
 0x3dc   : > { %s9123_s28 = smov %s9120_s24 }
 0x3dd   :  { %4064 = vsyncpa [#allocation4], 1 }
 0x3de   :  { %4066 = vsyncpa [#allocation4 + $0x1], 1 }
 0x3df   :  { %4067 = vsyncpa [#allocation5], 1 }
 0x3e0   :  { %4069 = vsyncpa [#allocation5 + $0x1], 1 }

</bundles_post_ra>
